<compile_context>
chip_gen: v5e
topology: v5e:2x2
jax: 0.10.0
libtpu: 0.0.40
codegen_flags: <defaults>
</compile_context>

<pallas_src>
import jax
import jax.numpy as jnp
from jax.experimental import pallas as pl
from jax.experimental.pallas import tpu as pltpu

K_IN = 1000    # module input features
K_PAD = 1024   # padded contraction dim (128-aligned)
N1 = 2048      # layer-1 output features
TN1 = 512      # layer-1 output tile (grid = N1 // TN1 = 4 steps)
N2 = 512       # layer-2 output features


def mlp_kernel(x_ref, w1_ref, b1_ref, w2_ref, b2_ref, w3_ref, b3_ref, o_ref, acc2_ref):
    j = pl.program_id(0)

    @pl.when(j == 0)
    def _():
        acc2_ref[...] = jnp.zeros_like(acc2_ref)

    # Layer 1, one 512-wide column block: (B,1024)bf16 @ (1024,512)bf16 -> f32, + bias, ReLU.
    h1 = jnp.dot(x_ref[...], w1_ref[...], preferred_element_type=jnp.float32)
    h1 = jnp.maximum(h1 + b1_ref[...], 0.0)

    # Layer-2 partial: this h1 column block contracts with the matching 512-row slab of W2.
    acc2_ref[...] += jnp.dot(
        h1.astype(jnp.bfloat16), w2_ref[...], preferred_element_type=jnp.float32
    )

    @pl.when(j == pl.num_programs(0) - 1)
    def _():
        h2 = jnp.maximum(acc2_ref[...] + b2_ref[...], 0.0)
        # Layer 3 (512 -> 1): VPU multiply + lane reduction; MXU stays free.
        out = jnp.sum(h2 * w3_ref[...], axis=-1, keepdims=True) + b3_ref[...]
        o_ref[...] = out.astype(o_ref.dtype)


def simple_mlp_forward(x, prepped):
    w1, b1, w2, b2, w3_row, b3 = prepped
    B, K = x.shape
    # Pad K 1000 -> 1024 and cast activations to bf16 (weights already prepared in bf16).
    xp = jnp.pad(x, ((0, 0), (0, K_PAD - K))).astype(jnp.bfloat16)

    return pl.pallas_call(
        mlp_kernel,
        out_shape=jax.ShapeDtypeStruct((B, 1), jnp.float32),
        grid_spec=pltpu.PrefetchScalarGridSpec(
            num_scalar_prefetch=0,
            grid=(N1 // TN1,),
            in_specs=[
                pl.BlockSpec((B, K_PAD), lambda j: (0, 0)),    # x       (resident)
                pl.BlockSpec((K_PAD, TN1), lambda j: (0, j)),  # W1 tile (streamed)
                pl.BlockSpec((1, TN1), lambda j: (0, j)),      # b1 tile (streamed, tiny)
                pl.BlockSpec((TN1, N2), lambda j: (j, 0)),     # W2 slab (streamed)
                pl.BlockSpec((1, N2), lambda j: (0, 0)),       # b2      (resident)
                pl.BlockSpec((1, N2), lambda j: (0, 0)),       # w3 row  (resident)
                pl.BlockSpec((1, 1), lambda j: (0, 0)),        # b3      (resident)
            ],
            out_specs=pl.BlockSpec((B, 1), lambda j: (0, 0)),
            scratch_shapes=[pltpu.VMEM((B, N2), jnp.float32)],  # layer-2 accumulator
        ),
        compiler_params=pltpu.CompilerParams(
            dimension_semantics=("arbitrary",),   # reduction axis for the layer-2 accumulate
            vmem_limit_bytes=32 << 20,            # ~4 MiB actual footprint; plenty of headroom
        ),
    )(xp, w1, b1, w2, b2, w3_row, b3)


def init_params(key):
    """Deterministic init matching the PyTorch module's parameter shapes.

    PyTorch Linear weight is (out, in); we store the transpose (in, out) so the kernel can do
    x @ W directly. Uniform(-bound, bound) with bound = 1/sqrt(fan_in), like nn.Linear's default.
    """
    dims = [(K_IN, N1), (N1, N2), (N2, 1)]
    params = []
    for i, (fan_in, fan_out) in enumerate(dims):
        kw, kb = jax.random.split(jax.random.fold_in(key, i))
        bound = 1.0 / jnp.sqrt(float(fan_in))
        w = jax.random.uniform(kw, (fan_in, fan_out), jnp.float32, -bound, bound)
        b = jax.random.uniform(kb, (1, fan_out), jnp.float32, -bound, bound)
        params += [w, b]
    return tuple(params)


def prepare_params(params):
    """One-time prep: pad W1's K to 1024, cast the two big weights to bf16, W3 as a (1,512) row."""
    w1, b1, w2, b2, w3, b3 = params
    w1p = jnp.pad(w1, ((0, K_PAD - K_IN), (0, 0))).astype(jnp.bfloat16)  # (1024, 2048)
    w2p = w2.astype(jnp.bfloat16)                                        # (2048, 512)
    w3_row = w3.reshape(1, N2).astype(jnp.float32)                       # (1, 512)
    return w1p, b1, w2p, b2, w3_row, b3


def reference_forward(x, prepped):
    """Pure-JAX reference mirroring the kernel's dtype sequence (bf16 weights, f32 accumulate)."""
    w1, b1, w2, b2, w3_row, b3 = prepped
    xp = jnp.pad(x, ((0, 0), (0, K_PAD - x.shape[1]))).astype(jnp.bfloat16)
    h1 = jnp.maximum(jnp.dot(xp, w1, preferred_element_type=jnp.float32) + b1, 0.0)
    h2 = jnp.maximum(
        jnp.dot(h1.astype(jnp.bfloat16), w2, preferred_element_type=jnp.float32) + b2, 0.0
    )
    return jnp.sum(h2 * w3_row, axis=-1, keepdims=True) + b3


if __name__ == "__main__":
    key = jax.random.PRNGKey(0)
    params = init_params(key)
    prepped = prepare_params(params)

    # Small batch (multiple of 8 sublanes); input feature dim fixed at 1000 by the module.
    B = 8
    x = jax.random.normal(jax.random.fold_in(key, 100), (B, K_IN), jnp.float32)

    out = simple_mlp_forward(x, prepped)
    out = jax.block_until_ready(out)

    ref = reference_forward(x, prepped)
    assert out.shape == (B, 1)
    assert jnp.allclose(out, ref, atol=1e-2, rtol=1e-2), "mismatch vs JAX reference"

    print("KERNEL_OK")
</pallas_src>

<mosaic_0001>
module attributes {stable_mosaic.version = 11 : i64} {
  func.func @mlp_kernel(%arg0: i32, %arg1: memref<8x1024xbf16, #tpu.memory_space<vmem>>, %arg2: memref<1024x512xbf16, #tpu.memory_space<vmem>>, %arg3: memref<1x512xf32, #tpu.memory_space<vmem>>, %arg4: memref<512x512xbf16, #tpu.memory_space<vmem>>, %arg5: memref<1x512xf32, #tpu.memory_space<vmem>>, %arg6: memref<1x512xf32, #tpu.memory_space<vmem>>, %arg7: memref<1x1xf32, #tpu.memory_space<vmem>>, %arg8: memref<8x1xf32, #tpu.memory_space<vmem>>, %arg9: memref<8x512xf32, #tpu.memory_space<vmem>>) attributes {dimension_semantics = [#tpu.dimension_semantics<arbitrary>], iteration_bounds = array<i64: 4>, scalar_prefetch = 0 : i64, scratch_operands = 1 : i64, tpu.core_type = #tpu.core_type<tc>, window_params = [{pipeline_mode = #tpu.pipeline_mode<synchronous>, transform_indices = @transform_0, window_bounds = array<i64: 8, 1024>}, {transform_indices = @transform_1, window_bounds = array<i64: 1024, 512>}, {transform_indices = @transform_2, window_bounds = array<i64: 1, 512>}, {transform_indices = @transform_3, window_bounds = array<i64: 512, 512>}, {pipeline_mode = #tpu.pipeline_mode<synchronous>, transform_indices = @transform_4, window_bounds = array<i64: 1, 512>}, {pipeline_mode = #tpu.pipeline_mode<synchronous>, transform_indices = @transform_5, window_bounds = array<i64: 1, 512>}, {pipeline_mode = #tpu.pipeline_mode<synchronous>, transform_indices = @transform_6, window_bounds = array<i64: 1, 1>}, {pipeline_mode = #tpu.pipeline_mode<synchronous>, transform_indices = @transform_7, window_bounds = array<i64: 8, 1>}]} {
    %c0_i32 = arith.constant 0 : i32
    %0 = arith.cmpi eq, %arg0, %c0_i32 : i32
    %1 = arith.extui %0 : i1 to i32
    %c0_i32_0 = arith.constant 0 : i32
    %2 = arith.cmpi ne, %1, %c0_i32_0 : i32
    scf.if %2 {
      %cst_15 = arith.constant 0.000000e+00 : f32
      %20 = vector.broadcast %cst_15 : f32 to vector<8x512xf32>
      %c0_16 = arith.constant 0 : index
      %c0_17 = arith.constant 0 : index
      %21 = vector.load %arg9[%c0_16, %c0_17] : memref<8x512xf32, #tpu.memory_space<vmem>>, vector<8x512xf32>
      tpu.vector_store %arg9[%c0_16, %c0_17], %20 {strides = array<i32>} : memref<8x512xf32, #tpu.memory_space<vmem>>, vector<8x512xf32>,
    } else {
    }
    %c0 = arith.constant 0 : index
    %c0_1 = arith.constant 0 : index
    %3 = vector.load %arg1[%c0, %c0_1] : memref<8x1024xbf16, #tpu.memory_space<vmem>>, vector<8x1024xbf16>
    %c0_2 = arith.constant 0 : index
    %c0_3 = arith.constant 0 : index
    %4 = vector.load %arg2[%c0_2, %c0_3] : memref<1024x512xbf16, #tpu.memory_space<vmem>>, vector<1024x512xbf16>
    %cst = arith.constant dense<0.000000e+00> : vector<8x512xf32>
    %5 = tpu.matmul %3, %4, %cst {dimension_numbers = #tpu.dot_dimension_numbers<[1], [0], [0], [1], [0, 0, 1, 1], [], []>} : vector<8x1024xbf16>, vector<1024x512xbf16>, vector<8x512xf32> -> vector<8x512xf32>
    %c0_4 = arith.constant 0 : index
    %c0_5 = arith.constant 0 : index
    %6 = vector.load %arg3[%c0_4, %c0_5] : memref<1x512xf32, #tpu.memory_space<vmem>>, vector<1x512xf32>
    %7 = vector.broadcast %6 : vector<1x512xf32> to vector<8x512xf32>
    %8 = arith.addf %5, %7 : vector<8x512xf32>
    %cst_6 = arith.constant 0.000000e+00 : f32
    %9 = vector.broadcast %cst_6 : f32 to vector<8x512xf32>
    %10 = arith.maximumf %8, %9 : vector<8x512xf32>
    %c0_7 = arith.constant 0 : index
    %c0_8 = arith.constant 0 : index
    %11 = vector.load %arg9[%c0_7, %c0_8] : memref<8x512xf32, #tpu.memory_space<vmem>>, vector<8x512xf32>
    %12 = arith.truncf %10 : vector<8x512xf32> to vector<8x512xbf16>
    %c0_9 = arith.constant 0 : index
    %c0_10 = arith.constant 0 : index
    %13 = vector.load %arg4[%c0_9, %c0_10] : memref<512x512xbf16, #tpu.memory_space<vmem>>, vector<512x512xbf16>
    %cst_11 = arith.constant dense<0.000000e+00> : vector<8x512xf32>
    %14 = tpu.matmul %12, %13, %cst_11 {dimension_numbers = #tpu.dot_dimension_numbers<[1], [0], [0], [1], [0, 0, 1, 1], [], []>} : vector<8x512xbf16>, vector<512x512xbf16>, vector<8x512xf32> -> vector<8x512xf32>
    %15 = arith.addf %11, %14 : vector<8x512xf32>
    %c0_12 = arith.constant 0 : index
    %c0_13 = arith.constant 0 : index
    %16 = vector.load %arg9[%c0_12, %c0_13] : memref<8x512xf32, #tpu.memory_space<vmem>>, vector<8x512xf32>
    tpu.vector_store %arg9[%c0_12, %c0_13], %15 {strides = array<i32>} : memref<8x512xf32, #tpu.memory_space<vmem>>, vector<8x512xf32>,
    %c3_i32 = arith.constant 3 : i32
    %17 = arith.cmpi eq, %arg0, %c3_i32 : i32
    %18 = arith.extui %17 : i1 to i32
    %c0_i32_14 = arith.constant 0 : i32
    %19 = arith.cmpi ne, %18, %c0_i32_14 : i32
    scf.if %19 {
      %c0_15 = arith.constant 0 : index
      %c0_16 = arith.constant 0 : index
      %20 = vector.load %arg9[%c0_15, %c0_16] : memref<8x512xf32, #tpu.memory_space<vmem>>, vector<8x512xf32>
      %c0_17 = arith.constant 0 : index
      %c0_18 = arith.constant 0 : index
      %21 = vector.load %arg5[%c0_17, %c0_18] : memref<1x512xf32, #tpu.memory_space<vmem>>, vector<1x512xf32>
      %22 = vector.broadcast %21 : vector<1x512xf32> to vector<8x512xf32>
      %23 = arith.addf %20, %22 : vector<8x512xf32>
      %cst_19 = arith.constant 0.000000e+00 : f32
      %24 = vector.broadcast %cst_19 : f32 to vector<8x512xf32>
      %25 = arith.maximumf %23, %24 : vector<8x512xf32>
      %c0_20 = arith.constant 0 : index
      %c0_21 = arith.constant 0 : index
      %26 = vector.load %arg6[%c0_20, %c0_21] : memref<1x512xf32, #tpu.memory_space<vmem>>, vector<1x512xf32>
      %27 = vector.broadcast %26 : vector<1x512xf32> to vector<8x512xf32>
      %28 = arith.mulf %25, %27 : vector<8x512xf32>
      %cst_22 = arith.constant dense<0.000000e+00> : vector<8xf32>
      %29 = vector.multi_reduction <add>, %28, %cst_22 [1] : vector<8x512xf32> to vector<8xf32>
      %30 = vector.shape_cast %29 : vector<8xf32> to vector<8x1xf32>
      %c0_23 = arith.constant 0 : index
      %c0_24 = arith.constant 0 : index
      %31 = vector.load %arg7[%c0_23, %c0_24] : memref<1x1xf32, #tpu.memory_space<vmem>>, vector<1x1xf32>
      %32 = vector.broadcast %31 : vector<1x1xf32> to vector<8x1xf32>
      %33 = arith.addf %30, %32 : vector<8x1xf32>
      %c0_25 = arith.constant 0 : index
      %c0_26 = arith.constant 0 : index
      %34 = vector.load %arg8[%c0_25, %c0_26] : memref<8x1xf32, #tpu.memory_space<vmem>>, vector<8x1xf32>
      tpu.vector_store %arg8[%c0_25, %c0_26], %33 {strides = array<i32>} : memref<8x1xf32, #tpu.memory_space<vmem>>, vector<8x1xf32>,
    } else {
    }
    return
  }
  func.func @transform_0(%arg0: i32) -> (i32, i32) {
    %c0_i32 = arith.constant 0 : i32
    %c0_i32_0 = arith.constant 0 : i32
    %c0_i32_1 = arith.constant 0 : i32
    return %c0_i32, %c0_i32_0 : i32, i32
  }
  func.func @transform_1(%arg0: i32) -> (i32, i32) {
    %c0_i32 = arith.constant 0 : i32
    %c0_i32_0 = arith.constant 0 : i32
    return %c0_i32, %arg0 : i32, i32
  }
  func.func @transform_2(%arg0: i32) -> (i32, i32) {
    %c0_i32 = arith.constant 0 : i32
    %c0_i32_0 = arith.constant 0 : i32
    return %c0_i32, %arg0 : i32, i32
  }
  func.func @transform_3(%arg0: i32) -> (i32, i32) {
    %c0_i32 = arith.constant 0 : i32
    %c0_i32_0 = arith.constant 0 : i32
    return %arg0, %c0_i32 : i32, i32
  }
  func.func @transform_4(%arg0: i32) -> (i32, i32) {
    %c0_i32 = arith.constant 0 : i32
    %c0_i32_0 = arith.constant 0 : i32
    %c0_i32_1 = arith.constant 0 : i32
    return %c0_i32, %c0_i32_0 : i32, i32
  }
  func.func @transform_5(%arg0: i32) -> (i32, i32) {
    %c0_i32 = arith.constant 0 : i32
    %c0_i32_0 = arith.constant 0 : i32
    %c0_i32_1 = arith.constant 0 : i32
    return %c0_i32, %c0_i32_0 : i32, i32
  }
  func.func @transform_6(%arg0: i32) -> (i32, i32) {
    %c0_i32 = arith.constant 0 : i32
    %c0_i32_0 = arith.constant 0 : i32
    %c0_i32_1 = arith.constant 0 : i32
    return %c0_i32, %c0_i32_0 : i32, i32
  }
  func.func @transform_7(%arg0: i32) -> (i32, i32) {
    %c0_i32 = arith.constant 0 : i32
    %c0_i32_0 = arith.constant 0 : i32
    %c0_i32_1 = arith.constant 0 : i32
    return %c0_i32, %c0_i32_0 : i32, i32
  }
}

</mosaic_0001>

<bundles_post_ra>
// kernel: tpu_custom_call.1
= control target key start
LH: loop header
LB: loop body
LE: loop exit
PB: predicated region body
PF: predicated region fallthrough
CT: control target
= control target key end

     0   :  { %s6981_s0 = inlined_call_operand.hbm [shape: bf16[8,1024], index: 0, kind: input, shape index: {}]   ;;  %s6982_s1 = inlined_call_operand.hbm [shape: bf16[1024,2048], index: 1, kind: input, shape index: {}]   ;;  %s6983_s2 = inlined_call_operand.hbm [shape: f32[1,2048], index: 2, kind: input, shape index: {}]   ;;  %s6984_s3 = inlined_call_operand.hbm [shape: bf16[2048,512], index: 3, kind: input, shape index: {}]   ;;  %s6985_s4 = inlined_call_operand.hbm [shape: f32[1,512], index: 4, kind: input, shape index: {}]   ;;  %s6986_s5 = inlined_call_operand.hbm [shape: f32[1,512], index: 5, kind: input, shape index: {}]   ;;  %s6987_s6 = inlined_call_operand.<no memory space> [shape: f32[1,1], index: 6, kind: input, shape index: {}]   ;;  %s6988_s7 = inlined_call_operand.vmem [shape: f32[8,1], index: 7, kind: output, shape index: {}]  }
   0x1   :  { %6990 = sst [smem:[#allocation20_spill]] %s6981_s0  ;;  %v12_v0 = vstv %s6987_s6 }
   0x2   :  { %6991 = sst [smem:[#allocation21_spill]] %s6985_s4  ;;  %13 = vst [vmem:[#allocation3] sm:$0x1] %v12_v0 }
   0x3   :  { %14 = vsyncpa [#allocation5], 0 }
   0x4   :  { %15 = vsyncpa [#allocation7], 0 }
   0x5   :  { %17 = vsyncpa [#allocation7 + $0x1], 0 }
   0x6   :  { %18 = vsyncpa [#allocation10], 0 }
   0x7   :  { %20 = vsyncpa [#allocation10 + $0x1], 0 }
   0x8   :  { %21 = vsyncpa [#allocation13], 0  ;;  %s5894_s26 = smov 0   ;;  %s5896_s27 = smov 0  }
   0x9   :  { %s5898_s28 = smov 0   ;;  %s5900_s29 = smov 0  }
   0xa LB: > { %s5913_s6 = sadd.s32 4294967295, %s5842_s29   ;;  %s5916_s30 = sadd.s32 1, %s5842_s29   ;;  %s5842_s29 = sphi %s5900_s29, %s7007_s29   ;;  %s5838_s28 = sphi %s5898_s28, %s7006_s28   ;;  %s5834_s27 = sphi %s5896_s27, %s7005_s27   ;;  %s5830_s26 = sphi %s5894_s26, %s7004_s26  }
   0xb   : > { %s52_s8 = ssub.s32 %s5842_s29, %s5916_s30  ;;  %s55_s9 = sadd.s32 1, %s5838_s28 }
   0xc   : > { %p53_p0 = scmp.eq.s32.totalorder %s52_s8, 0  ;;  %p62_p1 = scmp.ne.s32.totalorder %s5838_s28, %s5834_s27 }
   0xd   : > { %p63_p2 = scmp.eq.s32.totalorder %s5842_s29, 0  ;;  %p68_p3 = scmp.ne.s32.totalorder %s5834_s27, %s5830_s26 }
   0xe   : > { %s5926_s10 = scalar_select %p53_p0, %s5838_s28, %s55_s9  }
   0xf   : > { %p5928_p4 = por %p63_p2, %p62_p1  ;;  %p69_p5 = scmp.eq.s32.totalorder %s5913_s6, 0 }
  0x10   : > { %6992 = sst [smem:[#allocation19_spill]] %s5926_s10  ;;  %p3578_p6 = scmp.ge.s32.totalorder %s5842_s29, 1 }
  0x11   : > { %p215_p7 = scmp.lt.s32.totalorder %s5842_s29, 5  ;;  %p5937_p8 = por %p69_p5, %p68_p3 }
  0x12   : > { %p3579_p9 = scmp.ne.s32.totalorder %s5913_s6, 0  ;;  %s6996_s4 = sld [smem:[#allocation21_spill]] }
  0x13   : > { %p5942_p10 = pnand %p3578_p6, %p215_p7  ;;  %s5844_s17 = smov [#allocation11]  }
  0x14   : > { %s241_s18 = sshll.u32 %s5844_s17, 4  ;;  %p5567_p13 = scmp.lt.s32.totalorder %s5842_s29, 4  ;;  %s242_s18 = int_to_ptr.vmem [resolvable:$true] %s241_s18 }
  0x15   : > { %p5544_p11 = pneg %p5942_p10  ;;  %s5960_s21 = sand.u32 1, %s5838_s28  }
  0x16   : > { %p5964_p0 = pnand %p5567_p13, %p5928_p4  ;;  %s3583_s23 = sshll.u32 %s5960_s21, 11 }
  0x17   : > { %p5953_p12 = pnand %p5544_p11, %p69_p5  ;;  %s5139_s24 = sshll.u32 %s5842_s29, 4 }
  0x18   : > { %s239_s16 = sshll.u32 %s6996_s4, 4  ;;  %s276_s8 = scalar_lea.hbm %s6982_s1, %s5139_s24  ;;  %s240_s16 = int_to_ptr.hbm [resolvable:$true] %s239_s16 }
  0x19   : > { %5550 = dma.hbm_to_vmem [thread:$0]  (!%p5953_p12), %s240_s16, 64, %s242_s18, [#allocation10]  }
  0x1a   : > { %s277_s9 = sshll.u32 %s276_s8, 4  ;;  %s271_s14 = scalar_lea.vmem [#allocation6], %s3583_s23  ;;  %s278_s9 = int_to_ptr.hbm [resolvable:$true] %s277_s9 }
  0x1b   : > { %s279_s15 = sshll.u32 %s271_s14, 4  ;;  %s6999_s0 = sld [smem:[#allocation20_spill]]  ;;  %s280_s15 = int_to_ptr.vmem [resolvable:$true] %s279_s15 }
  0x1c   : > { %s7000_s4 = sand.u32 1, %s5842_s29   ;;  %s5642_s16 = sshra.s32 %s278_s9, 4  ;;  %s5643_s16 = int_to_ptr.hbm [resolvable:$true] %s5642_s16 }
  0x1d   : > { %s5980_s10 = scalar_lea.sflag [#allocation7], %s7000_s4  ;;  %s5644_s18 = scalar_lea.hbm %s5643_s16, 2048 }
  0x1e   : > { %p5645_p1 = scmp.ne.s32.totalorder %s5643_s16, %s5644_s18  ;;  %p5646_p2 = pneg %p5964_p0 }
  0x1f   : > { %s5649_s25 = scalar_lea.hbm %s6982_s1, 8192  ;;  %p5650_p6 = scmp.lt.s32.totalorder %s5643_s16, %s6982_s1 }
  0x20   : > { %p5647_p3 = pnand %p5646_p2, %p5645_p1  ;;  %p5651_p7 = scmp.lt.s32.totalorder %s5649_s25, %s5644_s18 }
  0x21   : > { %s227_s20 = sshll.u32 %s6999_s0, 4  ;;  %s228_s20 = int_to_ptr.hbm [resolvable:$true] %s227_s20 }
  0x22   : > { %p5648_p4 = pneg %p5647_p3  ;;  %p5652_p11 = por %p5651_p7, %p5650_p6 }
  0x24   : > { %p5653_p13 = pnand %p5652_p11, %p5648_p4 }
  0x26   : > { %5656 = shalt.err (!%p5653_p13)
}
  0x27   : > { %s5845_s4 = smov 1024   ;;  %s6989_s14 = smov 256  }
  0x28   : > { %s5847_s11 = smov 16   ;;  %s5848_s17 = smov [#allocation4]  }
  0x29   : > { %5557 = dma.hbm_to_vmem [thread:$0]  (!%p5964_p0), %s278_s9, 32768, %s280_s15, %s5980_s10, %s5845_s4, %s6989_s14, %s5847_s11  }
  0x2a   : > { %s229_s16 = sshll.u32 %s5848_s17, 4  ;;  %s251_s24 = sshll.u32 %s6986_s5, 4  ;;  %s230_s16 = int_to_ptr.vmem [resolvable:$true] %s229_s16  ;;  %s252_s24 = int_to_ptr.hbm [resolvable:$true] %s251_s24 }
  0x2b   : > { %5547 = dma.hbm_to_vmem [thread:$0]  (!%p5953_p12), %s228_s20, 512, %s230_s16, [#allocation5]  }
  0x2c   : > { %s3586_s25 = sshll.u32 %s5960_s21, 2  ;;  %s5849_s26 = smov [#allocation12]  }
  0x2d   : > { %s253_s8 = sshll.u32 %s5849_s26, 4  ;;  %s3587_s0 = sshll.u32 %s5842_s29, 2  ;;  %s254_s8 = int_to_ptr.vmem [resolvable:$true] %s253_s8 }
  0x2e   : > { %5553 = dma.hbm_to_vmem [thread:$0]  (!%p5953_p12), %s252_s24, 64, %s254_s8, [#allocation13]  }
  0x2f   : > { %s297_s4 = scalar_lea.hbm %s6983_s2, %s3587_s0  ;;  %s293_s17 = scalar_lea.vmem [#allocation8], %s3586_s25 }
  0x30   : > { %s301_s14 = sshll.u32 %s293_s17, 4  ;;  %s299_s18 = sshll.u32 %s297_s4, 4  ;;  %s302_s14 = int_to_ptr.vmem [resolvable:$true] %s301_s14  ;;  %s300_s18 = int_to_ptr.hbm [resolvable:$true] %s299_s18 }
  0x31   : > { %s5732_s23 = sshra.s32 %s300_s18, 4  ;;  %s5739_s24 = scalar_lea.hbm %s6983_s2, 16  ;;  %s5733_s23 = int_to_ptr.hbm [resolvable:$true] %s5732_s23 }
  0x32   : > { %s5734_s20 = scalar_lea.hbm %s5733_s23, 4  ;;  %p5740_p12 = scmp.lt.s32.totalorder %s5733_s23, %s6983_s2 }
  0x33   : > { %p5735_p1 = scmp.ne.s32.totalorder %s5733_s23, %s5734_s20  ;;  %p5741_p6 = scmp.lt.s32.totalorder %s5739_s24, %s5734_s20 }
  0x35   : > { %p5737_p3 = pnand %p5735_p1, %p5646_p2  ;;  %p5742_p7 = por %p5741_p6, %p5740_p12 }
  0x37   : > { %p5738_p4 = pneg %p5737_p3 }
  0x39   : > { %p5743_p11 = pnand %p5742_p7, %p5738_p4 }
  0x3b   : > { %5746 = shalt.err (!%p5743_p11)
}
  0x3c   : > { %5560 = dma.hbm_to_vmem [thread:$0]  (!%p5964_p0), %s300_s18, 64, %s302_s14, %s5980_s10  }
  0x3d   : > { %s3588_s0 = sshll.u32 %s5960_s21, 10  ;;  %s5141_s25 = sshll.u32 %s5842_s29, 10 }
  0x3e   : > { %s318_s4 = scalar_lea.hbm %s6984_s3, %s5141_s25  ;;  %s312_s23 = scalar_lea.vmem [#allocation9], %s3588_s0 }
  0x3f   : > { %s319_s17 = sshll.u32 %s318_s4, 4  ;;  %s321_s20 = sshll.u32 %s312_s23, 4  ;;  %s320_s17 = int_to_ptr.hbm [resolvable:$true] %s319_s17  ;;  %s322_s20 = int_to_ptr.vmem [resolvable:$true] %s321_s20 }
  0x40   : > { %s7001_s16 = sand.u32 1, %s5842_s29   ;;  %s5762_s24 = sshra.s32 %s320_s17, 4  ;;  %s5763_s24 = int_to_ptr.hbm [resolvable:$true] %s5762_s24 }
  0x41   : > { %s309_s19 = scalar_lea.sflag [#allocation10], %s7001_s16  ;;  %s5764_s26 = scalar_lea.hbm %s5763_s24, 1024 }
  0x42   : > { %p5765_p13 = scmp.ne.s32.totalorder %s5763_s24, %s5764_s26  ;;  %s5769_s14 = scalar_lea.hbm %s6984_s3, 4096 }
  0x43   : > { %p5770_p4 = scmp.lt.s32.totalorder %s5763_s24, %s6984_s3  ;;  %p5771_p12 = scmp.lt.s32.totalorder %s5769_s14, %s5764_s26 }
  0x44   : > { %p5767_p1 = pnand %p5765_p13, %p5646_p2 }
  0x45   : > { %p5772_p6 = por %p5771_p12, %p5770_p4 }
  0x46   : > { %p5768_p3 = pneg %p5767_p1 }
  0x48   : > { %p5773_p7 = pnand %p5772_p6, %p5768_p3 }
  0x4a   : > { %5776 = shalt.err (!%p5773_p7)
}
  0x4b   : > { %s7002_s29 = smov 256   ;;  %333 = sbr.rel (%p5942_p10) target bundleno = 843 (0x34b), region = 48 }
  0x4c   : > { %5563 = dma.hbm_to_vmem [thread:$0]  (!%p5964_p0), %s320_s17, 16384, %s322_s20, %s309_s19, %s7002_s29, %s7002_s29, %s5847_s11  }
  0x50   : > { %5809 = dma.done.wait (%p69_p5), [#allocation5], 512  }
  0x51   : > { %5811 = vsyncadd (%p69_p5), [#allocation5], 4294966784  ;;  %s340_s0 = sand.u32 1, %s5913_s6   ;;  %s342_s25 = sand.u32 1, %s5834_s27  }
  0x52   : > { %s3594_s9 = sshll.u32 %s342_s25, 11  ;;  %s341_s22 = scalar_lea.sflag [#allocation7], %s340_s0 }
  0x53   : > { %s6051_s15 = scalar_lea.vmem [#allocation6], %s3594_s9 }
  0x54   : > { %5813 = dma.done.wait (%p5937_p8), %s341_s22, 32832  }
  0x55   : > { %5815 = vsyncadd (%p5937_p8), %s341_s22, 4294934464  ;;  %s3595_s13 = sshll.u32 %s342_s25, 2  ;;  %s3596_s11 = sshll.u32 %s342_s25, 10 }
  0x56   : > { %s6057_s4 = scalar_lea.vmem [#allocation8], %s3595_s13  ;;  %s361_s17 = scalar_lea.sflag [#allocation10], %s340_s0 }
  0x57   : > { %s6059_s23 = scalar_lea.vmem [#allocation9], %s3596_s11 }
  0x58   : > { %5817 = dma.done.wait (%p5937_p8), %s361_s17, 16384  }
  0x59   : > { %5819 = vsyncadd (%p5937_p8), %s361_s17, 4294950912 }
  0x5a   : > { %5821 = dma.done.wait (%p69_p5), [#allocation10], 64  }
  0x5b   : > { %5823 = vsyncadd (%p69_p5), [#allocation10], 4294967232 }
  0x5c   : > { %5825 = dma.done.wait (%p69_p5), [#allocation13], 64  }
  0x5d   : > { %5827 = vsyncadd (%p69_p5), [#allocation13], 4294967232  ;;  %417 = sbr.rel (%p3579_p9) target bundleno = 103 (0x67), region = 76 }
  0x62   : > { %v5850_v1 = vmov 0.0  }
  0x63   : > { %418 = vst [vmem:[#allocation2 + $0x10] sm:$0xff] %v5850_v1 }
  0x64   : > { %419 = vst [vmem:[#allocation2] sm:$0xff] %v5850_v1 }
  0x65   : > { %420 = vst [vmem:[#allocation2 + $0x18] sm:$0xff] %v5850_v1 }
  0x66   : > { %421 = vst [vmem:[#allocation2 + $0x8] sm:$0xff] %v5850_v1 }
  0x67 PF: > { %v3714_v2 = vld [vmem:[%s6051_s15 + $0xe0] sm:$0xf]  ;;  %v5172_v3 = vld [vmem:[%s6051_s15 + $0xec] sm:$0xf0]  ;;  %p5136_p5 = scmp.ne.s32.totalorder %s5913_s6, 3 }
  0x68   : > { %v3842_v4 = vld [vmem:[%s6051_s15 + $0x1e0] sm:$0xf]  ;;  %v3715_v5 = vor.u32 %v5172_v3, %v3714_v2  ;;  %v5204_v6 = vld [vmem:[%s6051_s15 + $0x1ec] sm:$0xf0] }
  0x69   : > { %v3970_v7 = vld [vmem:[%s6051_s15 + $0x2e0] sm:$0xf]  ;;  %v5236_v8 = vld [vmem:[%s6051_s15 + $0x2ec] sm:$0xf0]  ;;  %v3843_v9 = vor.u32 %v5204_v6, %v3842_v4 }
  0x6a   : > { %v3971_v10 = vor.u32 %v5236_v8, %v3970_v7  ;;  %v4098_v11 = vld [vmem:[%s6051_s15 + $0x3e0] sm:$0xf]  ;;  %v5268_v12 = vld [vmem:[%s6051_s15 + $0x3ec] sm:$0xf0]  ;;  %2000 = vmatpush.bf16.msra.mxu0 %v3715_v5 }
  0x6b   : > { %v3698_v13 = vld [vmem:[%s6051_s15 + $0xc0] sm:$0xf]  ;;  %v4099_v14 = vor.u32 %v5268_v12, %v4098_v11  ;;  %v5168_v15 = vld [vmem:[%s6051_s15 + $0xcc] sm:$0xf0]  ;;  %2013 = vmatpush.bf16.msra.mxu1 %v3843_v9 }
  0x6c   : > { %v3826_v16 = vld [vmem:[%s6051_s15 + $0x1c0] sm:$0xf]  ;;  %v5200_v17 = vld [vmem:[%s6051_s15 + $0x1cc] sm:$0xf0]  ;;  %2026 = vmatpush.bf16.msra.mxu2 %v3971_v10  ;;  %v3699_v18 = vor.u32 %v5168_v15, %v3698_v13 }
  0x6d   : > { %v3827_v19 = vor.u32 %v5200_v17, %v3826_v16  ;;  %v3954_v20 = vld [vmem:[%s6051_s15 + $0x2c0] sm:$0xf]  ;;  %v5232_v21 = vld [vmem:[%s6051_s15 + $0x2cc] sm:$0xf0]  ;;  %2039 = vmatpush.bf16.msra.mxu3 %v4099_v14 }
  0x6e   : > { %v4082_v22 = vld [vmem:[%s6051_s15 + $0x3c0] sm:$0xf]  ;;  %v3955_v23 = vor.u32 %v5232_v21, %v3954_v20  ;;  %v5264_v24 = vld [vmem:[%s6051_s15 + $0x3cc] sm:$0xf0]  ;;  %2001 = vmatpush.bf16.msra.mxu0 %v3699_v18 }
  0x6f   : > { %v3682_v25 = vld [vmem:[%s6051_s15 + $0xa0] sm:$0xf]  ;;  %v5164_v26 = vld [vmem:[%s6051_s15 + $0xac] sm:$0xf0]  ;;  %v4083_v27 = vor.u32 %v5264_v24, %v4082_v22  ;;  %2014 = vmatpush.bf16.msra.mxu1 %v3827_v19 }
  0x70   : > { %v3810_v28 = vld [vmem:[%s6051_s15 + $0x1a0] sm:$0xf]  ;;  %v5196_v29 = vld [vmem:[%s6051_s15 + $0x1ac] sm:$0xf0]  ;;  %v3683_v31 = vor.u32 %v5164_v26, %v3682_v25  ;;  %2027 = vmatpush.bf16.msra.mxu2 %v3955_v23 }
  0x71   : > { %v3938_v30 = vld [vmem:[%s6051_s15 + $0x2a0] sm:$0xf]  ;;  %v5228_v32 = vld [vmem:[%s6051_s15 + $0x2ac] sm:$0xf0]  ;;  %v3811_v35 = vor.u32 %v5196_v29, %v3810_v28  ;;  %2040 = vmatpush.bf16.msra.mxu3 %v4083_v27 }
  0x72   : > { %v4066_v33 = vld [vmem:[%s6051_s15 + $0x3a0] sm:$0xf]  ;;  %v5260_v34 = vld [vmem:[%s6051_s15 + $0x3ac] sm:$0xf0]  ;;  %v3939_v36 = vor.u32 %v5228_v32, %v3938_v30  ;;  %2002 = vmatpush.bf16.msra.mxu0 %v3683_v31 }
  0x73   : > { %v3666_v37 = vld [vmem:[%s6051_s15 + $0x80] sm:$0xf]  ;;  %v5160_v38 = vld [vmem:[%s6051_s15 + $0x8c] sm:$0xf0]  ;;  %v4067_v40 = vor.u32 %v5260_v34, %v4066_v33  ;;  %2015 = vmatpush.bf16.msra.mxu1 %v3811_v35 }
  0x74   : > { %v3794_v39 = vld [vmem:[%s6051_s15 + $0x180] sm:$0xf]  ;;  %v5192_v41 = vld [vmem:[%s6051_s15 + $0x18c] sm:$0xf0]  ;;  %v3667_v46 = vor.u32 %v5160_v38, %v3666_v37  ;;  %2028 = vmatpush.bf16.msra.mxu2 %v3939_v36 }
  0x75   : > { %v3922_v42 = vld [vmem:[%s6051_s15 + $0x280] sm:$0xf]  ;;  %v5224_v43 = vld [vmem:[%s6051_s15 + $0x28c] sm:$0xf0]  ;;  %v3795_v47 = vor.u32 %v5192_v41, %v3794_v39  ;;  %2041 = vmatpush.bf16.msra.mxu3 %v4067_v40 }
  0x76   : > { %v4050_v44 = vld [vmem:[%s6051_s15 + $0x380] sm:$0xf]  ;;  %v5256_v45 = vld [vmem:[%s6051_s15 + $0x38c] sm:$0xf0]  ;;  %v3923_v48 = vor.u32 %v5224_v43, %v3922_v42  ;;  %2003 = vmatpush.bf16.msra.mxu0 %v3667_v46 }
  0x77   : > { %v3650_v49 = vld [vmem:[%s6051_s15 + $0x60] sm:$0xf]  ;;  %v5156_v50 = vld [vmem:[%s6051_s15 + $0x6c] sm:$0xf0]  ;;  %v4051_v52 = vor.u32 %v5256_v45, %v4050_v44  ;;  %2016 = vmatpush.bf16.msra.mxu1 %v3795_v47 }
  0x78   : > { %v3778_v51 = vld [vmem:[%s6051_s15 + $0x160] sm:$0xf]  ;;  %v5188_v53 = vld [vmem:[%s6051_s15 + $0x16c] sm:$0xf0]  ;;  %v3651_v58 = vor.u32 %v5156_v50, %v3650_v49  ;;  %2029 = vmatpush.bf16.msra.mxu2 %v3923_v48 }
  0x79   : > { %v3906_v54 = vld [vmem:[%s6051_s15 + $0x260] sm:$0xf]  ;;  %v5220_v55 = vld [vmem:[%s6051_s15 + $0x26c] sm:$0xf0]  ;;  %v3779_v59 = vor.u32 %v5188_v53, %v3778_v51  ;;  %2042 = vmatpush.bf16.msra.mxu3 %v4051_v52 }
  0x7a   : > { %v4034_v56 = vld [vmem:[%s6051_s15 + $0x360] sm:$0xf]  ;;  %v5252_v57 = vld [vmem:[%s6051_s15 + $0x36c] sm:$0xf0]  ;;  %v3907_v60 = vor.u32 %v5220_v55, %v3906_v54  ;;  %2004 = vmatpush.bf16.msra.mxu0 %v3651_v58 }
  0x7b   : > { %v3634_v61 = vld [vmem:[%s6051_s15 + $0x40] sm:$0xf]  ;;  %v5152_v62 = vld [vmem:[%s6051_s15 + $0x4c] sm:$0xf0]  ;;  %v4035_v0 = vor.u32 %v5252_v57, %v4034_v56  ;;  %2017 = vmatpush.bf16.msra.mxu1 %v3779_v59 }
  0x7c   : > { %v3762_v63 = vld [vmem:[%s6051_s15 + $0x140] sm:$0xf]  ;;  %v5184_v1 = vld [vmem:[%s6051_s15 + $0x14c] sm:$0xf0]  ;;  %v3635_v6 = vor.u32 %v5152_v62, %v3634_v61  ;;  %2030 = vmatpush.bf16.msra.mxu2 %v3907_v60 }
  0x7d   : > { %v3890_v2 = vld [vmem:[%s6051_s15 + $0x240] sm:$0xf]  ;;  %v5216_v3 = vld [vmem:[%s6051_s15 + $0x24c] sm:$0xf0]  ;;  %v3763_v7 = vor.u32 %v5184_v1, %v3762_v63  ;;  %2043 = vmatpush.bf16.msra.mxu3 %v4035_v0 }
  0x7e   : > { %v4018_v4 = vld [vmem:[%s6051_s15 + $0x340] sm:$0xf]  ;;  %v5248_v5 = vld [vmem:[%s6051_s15 + $0x34c] sm:$0xf0]  ;;  %v3891_v8 = vor.u32 %v5216_v3, %v3890_v2  ;;  %2005 = vmatpush.bf16.msra.mxu0 %v3635_v6 }
  0x7f   : > { %v3618_v9 = vld [vmem:[%s6051_s15 + $0x20] sm:$0xf]  ;;  %v5148_v10 = vld [vmem:[%s6051_s15 + $0x2c] sm:$0xf0]  ;;  %v4019_v12 = vor.u32 %v5248_v5, %v4018_v4  ;;  %2018 = vmatpush.bf16.msra.mxu1 %v3763_v7  ;;  %v423_v4 = vld [vmem:[#allocation4 + $0x8] sm:$0xff] }
  0x80   : > { %v3746_v11 = vld [vmem:[%s6051_s15 + $0x120] sm:$0xf]  ;;  %v5180_v13 = vld [vmem:[%s6051_s15 + $0x12c] sm:$0xf0]  ;;  %v3619_v18 = vor.u32 %v5148_v10, %v3618_v9  ;;  %2031 = vmatpush.bf16.msra.mxu2 %v3891_v8  ;;  %v698_v10 = vunpack.c.l.b16 %v423_v4 }
  0x81   : > { %v3874_v14 = vld [vmem:[%s6051_s15 + $0x220] sm:$0xf]  ;;  %v5212_v15 = vld [vmem:[%s6051_s15 + $0x22c] sm:$0xf0]  ;;  %v3747_v21 = vor.u32 %v5180_v13, %v3746_v11  ;;  %2044 = vmatpush.bf16.msra.mxu3 %v4019_v12  ;;  %v699_v12 = vunpack.c.h.b16 %v423_v4 }
  0x82   : > { %v4002_v16 = vld [vmem:[%s6051_s15 + $0x320] sm:$0xf]  ;;  %v5244_v17 = vld [vmem:[%s6051_s15 + $0x32c] sm:$0xf0]  ;;  %v3875_v22 = vor.u32 %v5212_v15, %v3874_v14  ;;  %2006 = vmatpush.bf16.msra.mxu0 %v3619_v18 }
  0x83   : > { %v3602_v19 = vld [vmem:[%s6051_s15] sm:$0xf]  ;;  %v5144_v20 = vld [vmem:[%s6051_s15 + $0xc] sm:$0xf0]  ;;  %v4003_v26 = vor.u32 %v5244_v17, %v4002_v16  ;;  %2019 = vmatpush.bf16.msra.mxu1 %v3747_v21 }
  0x84   : > { %v3730_v23 = vld [vmem:[%s6051_s15 + $0x100] sm:$0xf]  ;;  %v5176_v24 = vld [vmem:[%s6051_s15 + $0x10c] sm:$0xf0]  ;;  %v3603_v33 = vor.u32 %v5144_v20, %v3602_v19  ;;  %2032 = vmatpush.bf16.msra.mxu2 %v3875_v22  ;;  %v6171_v20 = vpack.c.b16 %v698_v10, %v698_v10  ;;  %v6175_v22 = vpack.c.b16 %v699_v12, %v699_v12  ;;  %v5170_v10 = vld [vmem:[%s6051_s15 + $0xe4] sm:$0xf] }
  0x85   : > { %v3858_v25 = vld [vmem:[%s6051_s15 + $0x200] sm:$0xf]  ;;  %v5208_v27 = vld [vmem:[%s6051_s15 + $0x20c] sm:$0xf0]  ;;  %v3731_v37 = vor.u32 %v5176_v24, %v3730_v23  ;;  %2045 = vmatpush.bf16.msra.mxu3 %v4003_v26  ;;  %v5202_v12 = vld [vmem:[%s6051_s15 + $0x1e4] sm:$0xf] }
  0x86   : > { %v3986_v28 = vld [vmem:[%s6051_s15 + $0x300] sm:$0xf]  ;;  %v5240_v29 = vld [vmem:[%s6051_s15 + $0x30c] sm:$0xf0]  ;;  %v3859_v38 = vor.u32 %v5208_v27, %v3858_v25  ;;  %2007 = vmatpush.bf16.msra.mxu0 %v3603_v33 }
  0x87   : > { %v4226_v30 = vld [vmem:[%s6051_s15 + $0x4e0] sm:$0xf]  ;;  %v5300_v31 = vld [vmem:[%s6051_s15 + $0x4ec] sm:$0xf0]  ;;  %v3987_v41 = vor.u32 %v5240_v29, %v3986_v28  ;;  %2020 = vmatpush.bf16.msra.mxu1 %v3731_v37 }
  0x88   : > { %v4354_v32 = vld [vmem:[%s6051_s15 + $0x5e0] sm:$0xf]  ;;  %v5332_v34 = vld [vmem:[%s6051_s15 + $0x5ec] sm:$0xf0]  ;;  %v4227_v42 = vor.u32 %v5300_v31, %v4226_v30  ;;  %2033 = vmatpush.bf16.msra.mxu2 %v3859_v38 }
  0x89   : > { %v4482_v35 = vld [vmem:[%s6051_s15 + $0x6e0] sm:$0xf]  ;;  %v5364_v36 = vld [vmem:[%s6051_s15 + $0x6ec] sm:$0xf0]  ;;  %v4355_v43 = vor.u32 %v5332_v34, %v4354_v32  ;;  %2046 = vmatpush.bf16.msra.mxu3 %v3987_v41 }
  0x8a   : > { %v4610_v39 = vld [vmem:[%s6051_s15 + $0x7e0] sm:$0xf]  ;;  %v5396_v40 = vld [vmem:[%s6051_s15 + $0x7ec] sm:$0xf0]  ;;  %v4483_v44 = vor.u32 %v5364_v36, %v4482_v35  ;;  %2052 = vmatpush.bf16.msrb.mxu0 %v4227_v42 }
  0x8b   : > { %v4210_v45 = vld [vmem:[%s6051_s15 + $0x4c0] sm:$0xf]  ;;  %v5296_v46 = vld [vmem:[%s6051_s15 + $0x4cc] sm:$0xf0]  ;;  %v4611_v48 = vor.u32 %v5396_v40, %v4610_v39  ;;  %2065 = vmatpush.bf16.msrb.mxu1 %v4355_v43  ;;  %2034 = vmatmul.bf16.vlgmr.msra.gmra.mxu2 %v6171_v20 }
  0x8c   : > { %v4338_v47 = vld [vmem:[%s6051_s15 + $0x5c0] sm:$0xf]  ;;  %v5328_v49 = vld [vmem:[%s6051_s15 + $0x5cc] sm:$0xf0]  ;;  %v4211_v54 = vor.u32 %v5296_v46, %v4210_v45  ;;  %2078 = vmatpush.bf16.msrb.mxu2 %v4483_v44  ;;  %2047 = vmatmul.bf16.vlgmr.msra.gmra.mxu3 %v6175_v22 }
  0x8d   : > { %v4466_v50 = vld [vmem:[%s6051_s15 + $0x6c0] sm:$0xf]  ;;  %v5360_v51 = vld [vmem:[%s6051_s15 + $0x6cc] sm:$0xf0]  ;;  %v4339_v56 = vor.u32 %v5328_v49, %v4338_v47  ;;  %2091 = vmatpush.bf16.msrb.mxu3 %v4611_v48 }
  0x8e   : > { %v4594_v52 = vld [vmem:[%s6051_s15 + $0x7c0] sm:$0xf]  ;;  %v5392_v53 = vld [vmem:[%s6051_s15 + $0x7cc] sm:$0xf0]  ;;  %v4467_v57 = vor.u32 %v5360_v51, %v4466_v50  ;;  %2053 = vmatpush.bf16.msrb.mxu0 %v4211_v54 }
  0x8f   : > { %v4194_v55 = vld [vmem:[%s6051_s15 + $0x4a0] sm:$0xf]  ;;  %v5292_v58 = vld [vmem:[%s6051_s15 + $0x4ac] sm:$0xf0]  ;;  %v4595_v61 = vor.u32 %v5392_v53, %v4594_v52  ;;  %2066 = vmatpush.bf16.msrb.mxu1 %v4339_v56 }
  0x90   : > { %v4322_v59 = vld [vmem:[%s6051_s15 + $0x5a0] sm:$0xf]  ;;  %v5324_v60 = vld [vmem:[%s6051_s15 + $0x5ac] sm:$0xf0]  ;;  %v4195_v2 = vor.u32 %v5292_v58, %v4194_v55  ;;  %2079 = vmatpush.bf16.msrb.mxu2 %v4467_v57 }
  0x91   : > { %v4450_v62 = vld [vmem:[%s6051_s15 + $0x6a0] sm:$0xf]  ;;  %v5356_v63 = vld [vmem:[%s6051_s15 + $0x6ac] sm:$0xf0]  ;;  %v4323_v3 = vor.u32 %v5324_v60, %v4322_v59  ;;  %2092 = vmatpush.bf16.msrb.mxu3 %v4595_v61 }
  0x92   : > { %v4578_v0 = vld [vmem:[%s6051_s15 + $0x7a0] sm:$0xf]  ;;  %v5388_v1 = vld [vmem:[%s6051_s15 + $0x7ac] sm:$0xf0]  ;;  %v4451_v6 = vor.u32 %v5356_v63, %v4450_v62  ;;  %2054 = vmatpush.bf16.msrb.mxu0 %v4195_v2 }
  0x93   : > { %v422_v5 = vld [vmem:[#allocation4] sm:$0xff]  ;;  %v5288_v8 = vld [vmem:[%s6051_s15 + $0x48c] sm:$0xf0]  ;;  %v4579_v13 = vor.u32 %v5388_v1, %v4578_v0  ;;  %2067 = vmatpush.bf16.msrb.mxu1 %v4323_v3 }
  0x94   : > { %v4178_v7 = vld [vmem:[%s6051_s15 + $0x480] sm:$0xf]  ;;  %v696_v11 = vunpack.c.l.b16 %v422_v5  ;;  %v5320_v14 = vld [vmem:[%s6051_s15 + $0x58c] sm:$0xf0]  ;;  %v697_v17 = vunpack.c.h.b16 %v422_v5  ;;  %2080 = vmatpush.bf16.msrb.mxu2 %v4451_v6  ;;  %v425_v5 = vld [vmem:[#allocation4 + $0x18] sm:$0xff] }
  0x95   : > { %v4306_v9 = vld [vmem:[%s6051_s15 + $0x580] sm:$0xf]  ;;  %v5352_v16 = vld [vmem:[%s6051_s15 + $0x68c] sm:$0xf0]  ;;  %v4179_v23 = vor.u32 %v5288_v8, %v4178_v7  ;;  %2093 = vmatpush.bf16.msrb.mxu3 %v4579_v13 }
  0x96   : > { %v4434_v15 = vld [vmem:[%s6051_s15 + $0x680] sm:$0xf]  ;;  %v5384_v19 = vld [vmem:[%s6051_s15 + $0x78c] sm:$0xf0]  ;;  %v6173_v21 = vpack.c.b16 %v696_v11, %v696_v11  ;;  %v6177_v24 = vpack.c.b16 %v697_v17, %v697_v17  ;;  %v4307_v25 = vor.u32 %v5320_v14, %v4306_v9  ;;  %v3716_v11 = vld [vmem:[%s6051_s15 + $0xf0] sm:$0xf0]  ;;  %v702_v17 = vunpack.c.l.b16 %v425_v5 }
  0x97   : > { %v4562_v18 = vld [vmem:[%s6051_s15 + $0x780] sm:$0xf]  ;;  %v4435_v26 = vor.u32 %v5352_v16, %v4434_v15  ;;  %v5284_v28 = vld [vmem:[%s6051_s15 + $0x46c] sm:$0xf0]  ;;  %2055 = vmatpush.bf16.msrb.mxu0 %v4179_v23  ;;  %v3844_v14 = vld [vmem:[%s6051_s15 + $0x1f0] sm:$0xf0] }
  0x98   : > { %v4162_v27 = vld [vmem:[%s6051_s15 + $0x460] sm:$0xf]  ;;  %v4563_v30 = vor.u32 %v5384_v19, %v4562_v18  ;;  %v5316_v31 = vld [vmem:[%s6051_s15 + $0x56c] sm:$0xf0]  ;;  %2008 = vmatmul.bf16.vlgmr.msra.gmra.mxu0 %v6173_v21  ;;  %2021 = vmatmul.bf16.vlgmr.msra.gmra.mxu1 %v6177_v24  ;;  %v5234_v15 = vld [vmem:[%s6051_s15 + $0x2e4] sm:$0xf] }
  0x99   : > { %v4290_v29 = vld [vmem:[%s6051_s15 + $0x560] sm:$0xf]  ;;  %v5348_v33 = vld [vmem:[%s6051_s15 + $0x66c] sm:$0xf0]  ;;  %v4163_v36 = vor.u32 %v5284_v28, %v4162_v27  ;;  %2068 = vmatpush.bf16.msrb.mxu1 %v4307_v25  ;;  %2081 = vmatpush.bf16.msrb.mxu2 %v4435_v26  ;;  %v3972_v16 = vld [vmem:[%s6051_s15 + $0x2f0] sm:$0xf0]  ;;  %v703_v27 = vunpack.c.h.b16 %v425_v5 }
  0x9a   : > { %v4418_v32 = vld [vmem:[%s6051_s15 + $0x660] sm:$0xf]  ;;  %v5380_v35 = vld [vmem:[%s6051_s15 + $0x76c] sm:$0xf0]  ;;  %v4291_v37 = vor.u32 %v5316_v31, %v4290_v29  ;;  %2094 = vmatpush.bf16.msrb.mxu3 %v4563_v30  ;;  %v5266_v23 = vld [vmem:[%s6051_s15 + $0x3e4] sm:$0xf]  ;;  %v3719_v29 = vor.u32 %v5170_v10, %v3716_v11  ;;  %v3847_v31 = vor.u32 %v5202_v12, %v3844_v14 }
  0x9b   : > { %v4546_v34 = vld [vmem:[%s6051_s15 + $0x760] sm:$0xf]  ;;  %v4419_v38 = vor.u32 %v5348_v33, %v4418_v32  ;;  %v5280_v40 = vld [vmem:[%s6051_s15 + $0x44c] sm:$0xf0]  ;;  %2056 = vmatpush.bf16.msrb.mxu0 %v4163_v36  ;;  %v4100_v25 = vld [vmem:[%s6051_s15 + $0x3f0] sm:$0xf0]  ;;  %v3975_v32 = vor.u32 %v5234_v15, %v3972_v16 }
  0x9c   : > { %v4146_v39 = vld [vmem:[%s6051_s15 + $0x440] sm:$0xf]  ;;  %v4547_v42 = vor.u32 %v5380_v35, %v4546_v34  ;;  %v5312_v43 = vld [vmem:[%s6051_s15 + $0x54c] sm:$0xf0]  ;;  %v5166_v33 = vld [vmem:[%s6051_s15 + $0xc4] sm:$0xf]  ;;  %v4103_v36 = vor.u32 %v5266_v23, %v4100_v25 }
  0x9d   : > { %v4274_v41 = vld [vmem:[%s6051_s15 + $0x540] sm:$0xf]  ;;  %v5344_v45 = vld [vmem:[%s6051_s15 + $0x64c] sm:$0xf0]  ;;  %v4147_v48 = vor.u32 %v5280_v40, %v4146_v39  ;;  %2069 = vmatpush.bf16.msrb.mxu1 %v4291_v37  ;;  %2082 = vmatpush.bf16.msrb.mxu2 %v4419_v38  ;;  %v3700_v34 = vld [vmem:[%s6051_s15 + $0xd0] sm:$0xf0]  ;;  %v6229_v40 = vpack.c.b16 %v702_v17, %v702_v17 }
  0x9e   : > { %v4402_v44 = vld [vmem:[%s6051_s15 + $0x640] sm:$0xf]  ;;  %v5376_v47 = vld [vmem:[%s6051_s15 + $0x74c] sm:$0xf0]  ;;  %v4275_v49 = vor.u32 %v5312_v43, %v4274_v41  ;;  %2095 = vmatpush.bf16.msrb.mxu3 %v4547_v42  ;;  %v5198_v35 = vld [vmem:[%s6051_s15 + $0x1c4] sm:$0xf] }
  0x9f   : > { %v4530_v46 = vld [vmem:[%s6051_s15 + $0x740] sm:$0xf]  ;;  %v4403_v50 = vor.u32 %v5344_v45, %v4402_v44  ;;  %v5276_v52 = vld [vmem:[%s6051_s15 + $0x42c] sm:$0xf0]  ;;  %2057 = vmatpush.bf16.msrb.mxu0 %v4147_v48  ;;  %v3828_v37 = vld [vmem:[%s6051_s15 + $0x1d0] sm:$0xf0]  ;;  %v6235_v44 = vpack.c.b16 %v703_v27, %v703_v27  ;;  %v3703_v45 = vor.u32 %v5166_v33, %v3700_v34 }
  0xa0   : > { %v4130_v51 = vld [vmem:[%s6051_s15 + $0x420] sm:$0xf]  ;;  %v4531_v54 = vor.u32 %v5376_v47, %v4530_v46  ;;  %v5308_v55 = vld [vmem:[%s6051_s15 + $0x52c] sm:$0xf0]  ;;  %v5230_v38 = vld [vmem:[%s6051_s15 + $0x2c4] sm:$0xf]  ;;  %v3831_v47 = vor.u32 %v5198_v35, %v3828_v37 }
  0xa1   : > { %v4258_v53 = vld [vmem:[%s6051_s15 + $0x520] sm:$0xf]  ;;  %v5340_v57 = vld [vmem:[%s6051_s15 + $0x62c] sm:$0xf0]  ;;  %v4131_v61 = vor.u32 %v5276_v52, %v4130_v51  ;;  %2070 = vmatpush.bf16.msrb.mxu1 %v4275_v49  ;;  %2083 = vmatpush.bf16.msrb.mxu2 %v4403_v50  ;;  %v3956_v39 = vld [vmem:[%s6051_s15 + $0x2d0] sm:$0xf0] }
  0xa2   : > { %v4386_v56 = vld [vmem:[%s6051_s15 + $0x620] sm:$0xf]  ;;  %v5372_v59 = vld [vmem:[%s6051_s15 + $0x72c] sm:$0xf0]  ;;  %v4259_v1 = vor.u32 %v5308_v55, %v4258_v53  ;;  %2096 = vmatpush.bf16.msrb.mxu3 %v4531_v54  ;;  %v5262_v41 = vld [vmem:[%s6051_s15 + $0x3c4] sm:$0xf]  ;;  %v3959_v48 = vor.u32 %v5230_v38, %v3956_v39 }
  0xa3   : > { %v4514_v58 = vld [vmem:[%s6051_s15 + $0x720] sm:$0xf]  ;;  %v5272_v62 = vld [vmem:[%s6051_s15 + $0x40c] sm:$0xf0]  ;;  %v4387_v2 = vor.u32 %v5340_v57, %v4386_v56  ;;  %2058 = vmatpush.bf16.msrb.mxu0 %v4131_v61  ;;  %v4084_v42 = vld [vmem:[%s6051_s15 + $0x3d0] sm:$0xf0] }
  0xa4   : > { %v4114_v60 = vld [vmem:[%s6051_s15 + $0x400] sm:$0xf]  ;;  %v5304_v0 = vld [vmem:[%s6051_s15 + $0x50c] sm:$0xf0]  ;;  %v4515_v6 = vor.u32 %v5372_v59, %v4514_v58  ;;  %v5162_v49 = vld [vmem:[%s6051_s15 + $0xa4] sm:$0xf]  ;;  %v4087_v52 = vor.u32 %v5262_v41, %v4084_v42 }
  0xa5   : > { %v4242_v63 = vld [vmem:[%s6051_s15 + $0x500] sm:$0xf]  ;;  %v5336_v4 = vld [vmem:[%s6051_s15 + $0x60c] sm:$0xf0]  ;;  %v4115_v13 = vor.u32 %v5272_v62, %v4114_v60  ;;  %2071 = vmatpush.bf16.msrb.mxu1 %v4259_v1  ;;  %2084 = vmatpush.bf16.msrb.mxu2 %v4387_v2  ;;  %v3684_v50 = vld [vmem:[%s6051_s15 + $0xb0] sm:$0xf0] }
  0xa6   : > { %v4370_v3 = vld [vmem:[%s6051_s15 + $0x600] sm:$0xf]  ;;  %v5368_v8 = vld [vmem:[%s6051_s15 + $0x70c] sm:$0xf0]  ;;  %v4243_v18 = vor.u32 %v5304_v0, %v4242_v63  ;;  %2097 = vmatpush.bf16.msrb.mxu3 %v4515_v6  ;;  %v5194_v51 = vld [vmem:[%s6051_s15 + $0x1a4] sm:$0xf]  ;;  %v3687_v58 = vor.u32 %v5162_v49, %v3684_v50 }
  0xa7   : > { %v4498_v7 = vld [vmem:[%s6051_s15 + $0x700] sm:$0xf]  ;;  %v424_v9 = vld [vmem:[#allocation4 + $0x10] sm:$0xff]  ;;  %v4371_v19 = vor.u32 %v5336_v4, %v4370_v3  ;;  %2059 = vmatpush.bf16.msrb.mxu0 %v4115_v13  ;;  %v5226_v54 = vld [vmem:[%s6051_s15 + $0x2a4] sm:$0xf] }
  0xa8   : > { %v700_v26 = vunpack.c.l.b16 %v424_v9  ;;  %v4499_v28 = vor.u32 %v5368_v8, %v4498_v7  ;;  %v701_v30 = vunpack.c.h.b16 %v424_v9  ;;  %v3812_v53 = vld [vmem:[%s6051_s15 + $0x1b0] sm:$0xf0]  ;;  %v5258_v56 = vld [vmem:[%s6051_s15 + $0x3a4] sm:$0xf] }
  0xa9   : > { %2072 = vmatpush.bf16.msrb.mxu1 %v4243_v18  ;;  %2085 = vmatpush.bf16.msrb.mxu2 %v4371_v19  ;;  %v3940_v55 = vld [vmem:[%s6051_s15 + $0x2b0] sm:$0xf0]  ;;  %v3815_v59 = vor.u32 %v5194_v51, %v3812_v53  ;;  %v5158_v61 = vld [vmem:[%s6051_s15 + $0x84] sm:$0xf] }
  0xaa   : > { %v6233_v43 = vpack.c.b16 %v700_v26, %v700_v26  ;;  %2098 = vmatpush.bf16.msrb.mxu3 %v4499_v28  ;;  %v6237_v46 = vpack.c.b16 %v701_v30, %v701_v30  ;;  %v4068_v57 = vld [vmem:[%s6051_s15 + $0x3b0] sm:$0xf0]  ;;  %v3943_v60 = vor.u32 %v5226_v54, %v3940_v55  ;;  %v5190_v63 = vld [vmem:[%s6051_s15 + $0x184] sm:$0xf] }
  0xab   : > { %2104 = vmatpush.bf16.msra.mxu0 %v3719_v29  ;;  %v3668_v62 = vld [vmem:[%s6051_s15 + $0x90] sm:$0xf0]  ;;  %v4071_v0 = vor.u32 %v5258_v56, %v4068_v57  ;;  %v5222_v2 = vld [vmem:[%s6051_s15 + $0x284] sm:$0xf] }
  0xac   : > { %2086 = vmatmul.bf16.vlgmr.msrb.gmra.mxu2 %v6229_v40  ;;  %2060 = vmatmul.bf16.vlgmr.msrb.gmra.mxu0 %v6233_v43  ;;  %v3796_v1 = vld [vmem:[%s6051_s15 + $0x190] sm:$0xf0]  ;;  %v5254_v4 = vld [vmem:[%s6051_s15 + $0x384] sm:$0xf]  ;;  %v3671_v6 = vor.u32 %v5158_v61, %v3668_v62 }
  0xad   : > { %2117 = vmatpush.bf16.msra.mxu1 %v3847_v31  ;;  %2130 = vmatpush.bf16.msra.mxu2 %v3975_v32  ;;  %v3924_v3 = vld [vmem:[%s6051_s15 + $0x290] sm:$0xf0]  ;;  %v3799_v7 = vor.u32 %v5190_v63, %v3796_v1  ;;  %v5154_v9 = vld [vmem:[%s6051_s15 + $0x64] sm:$0xf] }
  0xae   : > { %2143 = vmatpush.bf16.msra.mxu3 %v4103_v36  ;;  %2073 = vmatmul.bf16.vlgmr.msrb.gmra.mxu1 %v6237_v46  ;;  %v4052_v5 = vld [vmem:[%s6051_s15 + $0x390] sm:$0xf0]  ;;  %v3927_v8 = vor.u32 %v5222_v2, %v3924_v3  ;;  %v5186_v11 = vld [vmem:[%s6051_s15 + $0x164] sm:$0xf] }
  0xaf   : > { %2099 = vmatmul.bf16.vlgmr.msrb.gmra.mxu3 %v6235_v44  ;;  %2105 = vmatpush.bf16.msra.mxu0 %v3703_v45  ;;  %v3652_v10 = vld [vmem:[%s6051_s15 + $0x70] sm:$0xf0]  ;;  %v4055_v12 = vor.u32 %v5254_v4, %v4052_v5  ;;  %v5218_v14 = vld [vmem:[%s6051_s15 + $0x264] sm:$0xf] }
  0xb0   : > { %v3780_v13 = vld [vmem:[%s6051_s15 + $0x170] sm:$0xf0]  ;;  %v5250_v16 = vld [vmem:[%s6051_s15 + $0x364] sm:$0xf]  ;;  %v3655_v18 = vor.u32 %v5154_v9, %v3652_v10 }
  0xb1   : > { %2118 = vmatpush.bf16.msra.mxu1 %v3831_v47  ;;  %2131 = vmatpush.bf16.msra.mxu2 %v3959_v48  ;;  %v3908_v15 = vld [vmem:[%s6051_s15 + $0x270] sm:$0xf0]  ;;  %v3783_v19 = vor.u32 %v5186_v11, %v3780_v13  ;;  %v5150_v25 = vld [vmem:[%s6051_s15 + $0x44] sm:$0xf] }
  0xb2   : > { %2144 = vmatpush.bf16.msra.mxu3 %v4087_v52  ;;  %v4036_v17 = vld [vmem:[%s6051_s15 + $0x370] sm:$0xf0]  ;;  %v3911_v23 = vor.u32 %v5218_v14, %v3908_v15  ;;  %v5182_v27 = vld [vmem:[%s6051_s15 + $0x144] sm:$0xf] }
  0xb3   : > { %2106 = vmatpush.bf16.msra.mxu0 %v3687_v58  ;;  %v3636_v26 = vld [vmem:[%s6051_s15 + $0x50] sm:$0xf0]  ;;  %v4039_v28 = vor.u32 %v5250_v16, %v4036_v17  ;;  %v5214_v30 = vld [vmem:[%s6051_s15 + $0x244] sm:$0xf] }
  0xb4   : > { %v3764_v29 = vld [vmem:[%s6051_s15 + $0x150] sm:$0xf0]  ;;  %v5246_v32 = vld [vmem:[%s6051_s15 + $0x344] sm:$0xf]  ;;  %v3639_v34 = vor.u32 %v5150_v25, %v3636_v26 }
  0xb5   : > { %2119 = vmatpush.bf16.msra.mxu1 %v3815_v59  ;;  %2132 = vmatpush.bf16.msra.mxu2 %v3943_v60  ;;  %v3892_v31 = vld [vmem:[%s6051_s15 + $0x250] sm:$0xf0]  ;;  %v3767_v35 = vor.u32 %v5182_v27, %v3764_v29  ;;  %v5146_v37 = vld [vmem:[%s6051_s15 + $0x24] sm:$0xf] }
  0xb6   : > { %2145 = vmatpush.bf16.msra.mxu3 %v4071_v0  ;;  %v4020_v33 = vld [vmem:[%s6051_s15 + $0x350] sm:$0xf0]  ;;  %v3895_v36 = vor.u32 %v5214_v30, %v3892_v31  ;;  %v5178_v39 = vld [vmem:[%s6051_s15 + $0x124] sm:$0xf] }
  0xb7   : > { %2107 = vmatpush.bf16.msra.mxu0 %v3671_v6  ;;  %v3620_v38 = vld [vmem:[%s6051_s15 + $0x30] sm:$0xf0]  ;;  %v4023_v41 = vor.u32 %v5246_v32, %v4020_v33  ;;  %v5210_v45 = vld [vmem:[%s6051_s15 + $0x224] sm:$0xf] }
  0xb8   : > { %v3748_v42 = vld [vmem:[%s6051_s15 + $0x130] sm:$0xf0]  ;;  %v5242_v48 = vld [vmem:[%s6051_s15 + $0x324] sm:$0xf]  ;;  %v3623_v50 = vor.u32 %v5146_v37, %v3620_v38 }
  0xb9   : > { %2120 = vmatpush.bf16.msra.mxu1 %v3799_v7  ;;  %2133 = vmatpush.bf16.msra.mxu2 %v3927_v8  ;;  %v3876_v47 = vld [vmem:[%s6051_s15 + $0x230] sm:$0xf0]  ;;  %v5142_v51 = vld [vmem:[%s6051_s15 + $0x4] sm:$0xf]  ;;  %v3751_v53 = vor.u32 %v5178_v39, %v3748_v42 }
  0xba   : > { %2146 = vmatpush.bf16.msra.mxu3 %v4055_v12  ;;  %v4004_v49 = vld [vmem:[%s6051_s15 + $0x330] sm:$0xf0]  ;;  %v3879_v54 = vor.u32 %v5210_v45, %v3876_v47  ;;  %v5174_v55 = vld [vmem:[%s6051_s15 + $0x104] sm:$0xf] }
  0xbb   : > { %2108 = vmatpush.bf16.msra.mxu0 %v3655_v18  ;;  %v3604_v52 = vld [vmem:[%s6051_s15 + $0x10] sm:$0xf0]  ;;  %v5206_v57 = vld [vmem:[%s6051_s15 + $0x204] sm:$0xf]  ;;  %v4007_v58 = vor.u32 %v5242_v48, %v4004_v49 }
  0xbc   : > { %v3732_v56 = vld [vmem:[%s6051_s15 + $0x110] sm:$0xf0]  ;;  %v5238_v60 = vld [vmem:[%s6051_s15 + $0x304] sm:$0xf]  ;;  %v3607_v1 = vor.u32 %v5142_v51, %v3604_v52 }
  0xbd   : > { %2121 = vmatpush.bf16.msra.mxu1 %v3783_v19  ;;  %2134 = vmatpush.bf16.msra.mxu2 %v3911_v23  ;;  %v3860_v59 = vld [vmem:[%s6051_s15 + $0x210] sm:$0xf0]  ;;  %v5298_v62 = vld [vmem:[%s6051_s15 + $0x4e4] sm:$0xf]  ;;  %v3735_v5 = vor.u32 %v5174_v55, %v3732_v56 }
  0xbe   : > { %2147 = vmatpush.bf16.msra.mxu3 %v4039_v28  ;;  %v3988_v61 = vld [vmem:[%s6051_s15 + $0x310] sm:$0xf0]  ;;  %v5330_v0 = vld [vmem:[%s6051_s15 + $0x5e4] sm:$0xf]  ;;  %v3863_v6 = vor.u32 %v5206_v57, %v3860_v59 }
  0xbf   : > { %2109 = vmatpush.bf16.msra.mxu0 %v3639_v34  ;;  %v4228_v63 = vld [vmem:[%s6051_s15 + $0x4f0] sm:$0xf0]  ;;  %v5362_v3 = vld [vmem:[%s6051_s15 + $0x6e4] sm:$0xf]  ;;  %v3991_v9 = vor.u32 %v5238_v60, %v3988_v61 }
  0xc0   : > { %v4356_v2 = vld [vmem:[%s6051_s15 + $0x5f0] sm:$0xf0]  ;;  %v5394_v7 = vld [vmem:[%s6051_s15 + $0x7e4] sm:$0xf]  ;;  %v4231_v10 = vor.u32 %v5298_v62, %v4228_v63 }
  0xc1   : > { %2122 = vmatpush.bf16.msra.mxu1 %v3767_v35  ;;  %2135 = vmatpush.bf16.msra.mxu2 %v3895_v36  ;;  %v4484_v4 = vld [vmem:[%s6051_s15 + $0x6f0] sm:$0xf0]  ;;  %v4359_v11 = vor.u32 %v5330_v0, %v4356_v2  ;;  %v5294_v13 = vld [vmem:[%s6051_s15 + $0x4c4] sm:$0xf] }
  0xc2   : > { %2148 = vmatpush.bf16.msra.mxu3 %v4023_v41  ;;  %v4612_v8 = vld [vmem:[%s6051_s15 + $0x7f0] sm:$0xf0]  ;;  %v4487_v12 = vor.u32 %v5362_v3, %v4484_v4  ;;  %v5326_v15 = vld [vmem:[%s6051_s15 + $0x5c4] sm:$0xf] }
  0xc3   : > { %2110 = vmatpush.bf16.msra.mxu0 %v3623_v50  ;;  %v4212_v14 = vld [vmem:[%s6051_s15 + $0x4d0] sm:$0xf0]  ;;  %v4615_v16 = vor.u32 %v5394_v7, %v4612_v8  ;;  %v5358_v18 = vld [vmem:[%s6051_s15 + $0x6c4] sm:$0xf] }
  0xc4   : > { %v4340_v17 = vld [vmem:[%s6051_s15 + $0x5d0] sm:$0xf0]  ;;  %v5390_v23 = vld [vmem:[%s6051_s15 + $0x7c4] sm:$0xf]  ;;  %v4215_v26 = vor.u32 %v5294_v13, %v4212_v14 }
  0xc5   : > { %2123 = vmatpush.bf16.msra.mxu1 %v3751_v53  ;;  %2136 = vmatpush.bf16.msra.mxu2 %v3879_v54  ;;  %v4468_v19 = vld [vmem:[%s6051_s15 + $0x6d0] sm:$0xf0]  ;;  %v4343_v27 = vor.u32 %v5326_v15, %v4340_v17  ;;  %v5290_v29 = vld [vmem:[%s6051_s15 + $0x4a4] sm:$0xf] }
  0xc6   : > { %2149 = vmatpush.bf16.msra.mxu3 %v4007_v58  ;;  %v4596_v25 = vld [vmem:[%s6051_s15 + $0x7d0] sm:$0xf0]  ;;  %v4471_v28 = vor.u32 %v5358_v18, %v4468_v19  ;;  %v5322_v31 = vld [vmem:[%s6051_s15 + $0x5a4] sm:$0xf] }
  0xc7   : > { %2111 = vmatpush.bf16.msra.mxu0 %v3607_v1  ;;  %v4196_v30 = vld [vmem:[%s6051_s15 + $0x4b0] sm:$0xf0]  ;;  %v4599_v32 = vor.u32 %v5390_v23, %v4596_v25  ;;  %v5354_v34 = vld [vmem:[%s6051_s15 + $0x6a4] sm:$0xf] }
  0xc8   : > { %v4324_v33 = vld [vmem:[%s6051_s15 + $0x5b0] sm:$0xf0]  ;;  %v5386_v36 = vld [vmem:[%s6051_s15 + $0x7a4] sm:$0xf]  ;;  %v4199_v38 = vor.u32 %v5290_v29, %v4196_v30 }
  0xc9   : > { %2124 = vmatpush.bf16.msra.mxu1 %v3735_v5  ;;  %2137 = vmatpush.bf16.msra.mxu2 %v3863_v6  ;;  %v4452_v35 = vld [vmem:[%s6051_s15 + $0x6b0] sm:$0xf0]  ;;  %v4327_v39 = vor.u32 %v5322_v31, %v4324_v33  ;;  %v5286_v42 = vld [vmem:[%s6051_s15 + $0x484] sm:$0xf] }
  0xca   : > { %2150 = vmatpush.bf16.msra.mxu3 %v3991_v9  ;;  %v4580_v37 = vld [vmem:[%s6051_s15 + $0x7b0] sm:$0xf0]  ;;  %2112 = vmatmul.bf16.vlgmr.msra.gmra.mxu0 %v6173_v21  ;;  %v4455_v41 = vor.u32 %v5354_v34, %v4452_v35  ;;  %v5318_v47 = vld [vmem:[%s6051_s15 + $0x584] sm:$0xf] }
  0xcb   : > { %2156 = vmatpush.bf16.msrb.mxu0 %v4231_v10  ;;  %v4180_v45 = vld [vmem:[%s6051_s15 + $0x490] sm:$0xf0]  ;;  %v4583_v48 = vor.u32 %v5386_v36, %v4580_v37  ;;  %v5350_v50 = vld [vmem:[%s6051_s15 + $0x684] sm:$0xf] }
  0xcc   : > { %2138 = vmatmul.bf16.vlgmr.msra.gmra.mxu2 %v6171_v20  ;;  %2125 = vmatmul.bf16.vlgmr.msra.gmra.mxu1 %v6177_v24  ;;  %v4308_v49 = vld [vmem:[%s6051_s15 + $0x590] sm:$0xf0]  ;;  %v5382_v52 = vld [vmem:[%s6051_s15 + $0x784] sm:$0xf]  ;;  %v4183_v54 = vor.u32 %v5286_v42, %v4180_v45  ;;  %v3722_v45 = vld [vmem:[%s6051_s15 + $0xe8] sm:$0xf] }
  0xcd   : > { %2169 = vmatpush.bf16.msrb.mxu1 %v4359_v11  ;;  %2182 = vmatpush.bf16.msrb.mxu2 %v4487_v12  ;;  %v4436_v51 = vld [vmem:[%s6051_s15 + $0x690] sm:$0xf0]  ;;  %v4311_v55 = vor.u32 %v5318_v47, %v4308_v49  ;;  %v5282_v57 = vld [vmem:[%s6051_s15 + $0x464] sm:$0xf]  ;;  %v5173_v47 = vld [vmem:[%s6051_s15 + $0xf4] sm:$0xf0] }
  0xce   : > { %2195 = vmatpush.bf16.msrb.mxu3 %v4615_v16  ;;  %v4564_v53 = vld [vmem:[%s6051_s15 + $0x790] sm:$0xf0]  ;;  %v4439_v56 = vor.u32 %v5350_v50, %v4436_v51  ;;  %v5314_v59 = vld [vmem:[%s6051_s15 + $0x564] sm:$0xf]  ;;  %v5205_v50 = vld [vmem:[%s6051_s15 + $0x1f4] sm:$0xf0] }
  0xcf   : > { %2151 = vmatmul.bf16.vlgmr.msra.gmra.mxu3 %v6175_v22  ;;  %2157 = vmatpush.bf16.msrb.mxu0 %v4215_v26  ;;  %v4164_v58 = vld [vmem:[%s6051_s15 + $0x470] sm:$0xf0]  ;;  %v4567_v60 = vor.u32 %v5382_v52, %v4564_v53  ;;  %v5346_v62 = vld [vmem:[%s6051_s15 + $0x664] sm:$0xf]  ;;  %v3978_v51 = vld [vmem:[%s6051_s15 + $0x2e8] sm:$0xf] }
  0xd0   : > { %v4292_v61 = vld [vmem:[%s6051_s15 + $0x570] sm:$0xf0]  ;;  %v5378_v0 = vld [vmem:[%s6051_s15 + $0x764] sm:$0xf]  ;;  %v4167_v2 = vor.u32 %v5282_v57, %v4164_v58  ;;  %v5237_v52 = vld [vmem:[%s6051_s15 + $0x2f4] sm:$0xf0]  ;;  %v3723_v58 = vor.u32 %v5173_v47, %v3722_v45 }
  0xd1   : > { %2170 = vmatpush.bf16.msrb.mxu1 %v4343_v27  ;;  %2183 = vmatpush.bf16.msrb.mxu2 %v4471_v28  ;;  %v4420_v63 = vld [vmem:[%s6051_s15 + $0x670] sm:$0xf0]  ;;  %v4295_v3 = vor.u32 %v5314_v59, %v4292_v61  ;;  %v5278_v5 = vld [vmem:[%s6051_s15 + $0x444] sm:$0xf]  ;;  %v3706_v61 = vld [vmem:[%s6051_s15 + $0xc8] sm:$0xf] }
  0xd2   : > { %2196 = vmatpush.bf16.msrb.mxu3 %v4599_v32  ;;  %v4548_v1 = vld [vmem:[%s6051_s15 + $0x770] sm:$0xf0]  ;;  %v4423_v4 = vor.u32 %v5346_v62, %v4420_v63  ;;  %v5310_v7 = vld [vmem:[%s6051_s15 + $0x544] sm:$0xf]  ;;  %v5169_v62 = vld [vmem:[%s6051_s15 + $0xd4] sm:$0xf0] }
  0xd3   : > { %2158 = vmatpush.bf16.msrb.mxu0 %v4199_v38  ;;  %v4148_v6 = vld [vmem:[%s6051_s15 + $0x450] sm:$0xf0]  ;;  %v4551_v8 = vor.u32 %v5378_v0, %v4548_v1  ;;  %v5342_v10 = vld [vmem:[%s6051_s15 + $0x644] sm:$0xf]  ;;  %v3834_v63 = vld [vmem:[%s6051_s15 + $0x1c8] sm:$0xf] }
  0xd4   : > { %v4276_v9 = vld [vmem:[%s6051_s15 + $0x550] sm:$0xf0]  ;;  %v5374_v12 = vld [vmem:[%s6051_s15 + $0x744] sm:$0xf]  ;;  %v4151_v14 = vor.u32 %v5278_v5, %v4148_v6  ;;  %v5201_v1 = vld [vmem:[%s6051_s15 + $0x1d4] sm:$0xf0]  ;;  %v3707_v6 = vor.u32 %v5169_v62, %v3706_v61 }
  0xd5   : > { %2171 = vmatpush.bf16.msrb.mxu1 %v4327_v39  ;;  %2184 = vmatpush.bf16.msrb.mxu2 %v4455_v41  ;;  %v4404_v11 = vld [vmem:[%s6051_s15 + $0x650] sm:$0xf0]  ;;  %v4279_v15 = vor.u32 %v5310_v7, %v4276_v9  ;;  %v5274_v17 = vld [vmem:[%s6051_s15 + $0x424] sm:$0xf]  ;;  %v5265_v5 = vld [vmem:[%s6051_s15 + $0x3d4] sm:$0xf0]  ;;  %v3835_v7 = vor.u32 %v5201_v1, %v3834_v63 }
  0xd6   : > { %2197 = vmatpush.bf16.msrb.mxu3 %v4583_v48  ;;  %v4532_v13 = vld [vmem:[%s6051_s15 + $0x750] sm:$0xf0]  ;;  %v4407_v16 = vor.u32 %v5342_v10, %v4404_v11  ;;  %v5306_v19 = vld [vmem:[%s6051_s15 + $0x524] sm:$0xf]  ;;  %v3850_v48 = vld [vmem:[%s6051_s15 + $0x1e8] sm:$0xf] }
  0xd7   : > { %2159 = vmatpush.bf16.msrb.mxu0 %v4183_v54  ;;  %v4132_v18 = vld [vmem:[%s6051_s15 + $0x430] sm:$0xf0]  ;;  %v4535_v23 = vor.u32 %v5374_v12, %v4532_v13  ;;  %v5338_v26 = vld [vmem:[%s6051_s15 + $0x624] sm:$0xf]  ;;  %v3851_v59 = vor.u32 %v5205_v50, %v3850_v48  ;;  %v3690_v9 = vld [vmem:[%s6051_s15 + $0xa8] sm:$0xf] }
  0xd8   : > { %v4260_v25 = vld [vmem:[%s6051_s15 + $0x530] sm:$0xf0]  ;;  %v5370_v28 = vld [vmem:[%s6051_s15 + $0x724] sm:$0xf]  ;;  %v4135_v30 = vor.u32 %v5274_v17, %v4132_v18  ;;  %v5165_v10 = vld [vmem:[%s6051_s15 + $0xb4] sm:$0xf0] }
  0xd9   : > { %2172 = vmatpush.bf16.msrb.mxu1 %v4311_v55  ;;  %2185 = vmatpush.bf16.msrb.mxu2 %v4439_v56  ;;  %v4388_v27 = vld [vmem:[%s6051_s15 + $0x630] sm:$0xf0]  ;;  %v5270_v31 = vld [vmem:[%s6051_s15 + $0x404] sm:$0xf]  ;;  %v4263_v33 = vor.u32 %v5306_v19, %v4260_v25  ;;  %v4106_v55 = vld [vmem:[%s6051_s15 + $0x3e8] sm:$0xf]  ;;  %v3691_v18 = vor.u32 %v5165_v10, %v3690_v9 }
  0xda   : > { %2198 = vmatpush.bf16.msrb.mxu3 %v4567_v60  ;;  %v4516_v29 = vld [vmem:[%s6051_s15 + $0x730] sm:$0xf0]  ;;  %v4391_v34 = vor.u32 %v5338_v26, %v4388_v27  ;;  %v5302_v35 = vld [vmem:[%s6051_s15 + $0x504] sm:$0xf]  ;;  %v5269_v56 = vld [vmem:[%s6051_s15 + $0x3f4] sm:$0xf0]  ;;  %v3979_v60 = vor.u32 %v5237_v52, %v3978_v51 }
  0xdb   : > { %2160 = vmatpush.bf16.msrb.mxu0 %v4167_v2  ;;  %v4116_v32 = vld [vmem:[%s6051_s15 + $0x410] sm:$0xf0]  ;;  %v5334_v37 = vld [vmem:[%s6051_s15 + $0x604] sm:$0xf]  ;;  %v4519_v38 = vor.u32 %v5370_v28, %v4516_v29  ;;  %v4107_v0 = vor.u32 %v5269_v56, %v4106_v55  ;;  %v3962_v2 = vld [vmem:[%s6051_s15 + $0x2c8] sm:$0xf] }
  0xdc   : > { %v4244_v36 = vld [vmem:[%s6051_s15 + $0x510] sm:$0xf0]  ;;  %v5366_v41 = vld [vmem:[%s6051_s15 + $0x704] sm:$0xf]  ;;  %v4119_v49 = vor.u32 %v5270_v31, %v4116_v32  ;;  %v3818_v11 = vld [vmem:[%s6051_s15 + $0x1a8] sm:$0xf] }
  0xdd   : > { %2173 = vmatpush.bf16.msrb.mxu1 %v4295_v3  ;;  %2186 = vmatpush.bf16.msrb.mxu2 %v4423_v4  ;;  %v4372_v39 = vld [vmem:[%s6051_s15 + $0x610] sm:$0xf0]  ;;  %v4247_v53 = vor.u32 %v5302_v35, %v4244_v36  ;;  %v5233_v3 = vld [vmem:[%s6051_s15 + $0x2d4] sm:$0xf0]  ;;  %v4090_v4 = vld [vmem:[%s6051_s15 + $0x3c8] sm:$0xf] }
  0xde   : > { %2199 = vmatpush.bf16.msrb.mxu3 %v4551_v8  ;;  %v4500_v42 = vld [vmem:[%s6051_s15 + $0x710] sm:$0xf0]  ;;  %v4375_v54 = vor.u32 %v5334_v37, %v4372_v39  ;;  %v3963_v8 = vor.u32 %v5233_v3, %v3962_v2  ;;  %v4091_v12 = vor.u32 %v5265_v5, %v4090_v4  ;;  %v5197_v13 = vld [vmem:[%s6051_s15 + $0x1b4] sm:$0xf0]  ;;  %v3674_v25 = vld [vmem:[%s6051_s15 + $0x88] sm:$0xf] }
  0xdf   : > { %2161 = vmatpush.bf16.msrb.mxu0 %v4151_v14  ;;  %v4503_v57 = vor.u32 %v5366_v41, %v4500_v42  ;;  %v3946_v14 = vld [vmem:[%s6051_s15 + $0x2a8] sm:$0xf]  ;;  %v5261_v17 = vld [vmem:[%s6051_s15 + $0x3b4] sm:$0xf0]  ;;  %v3819_v19 = vor.u32 %v5197_v13, %v3818_v11 }
  0xe0   : > { %v5161_v26 = vld [vmem:[%s6051_s15 + $0x94] sm:$0xf0]  ;;  %v3802_v27 = vld [vmem:[%s6051_s15 + $0x188] sm:$0xf] }
  0xe1   : > { %2174 = vmatpush.bf16.msrb.mxu1 %v4279_v15  ;;  %2187 = vmatpush.bf16.msrb.mxu2 %v4407_v16  ;;  %v5229_v15 = vld [vmem:[%s6051_s15 + $0x2b4] sm:$0xf0]  ;;  %v4074_v16 = vld [vmem:[%s6051_s15 + $0x3a8] sm:$0xf] }
  0xe2   : > { %2200 = vmatpush.bf16.msrb.mxu3 %v4535_v23  ;;  %v3947_v23 = vor.u32 %v5229_v15, %v3946_v14  ;;  %v4075_v28 = vor.u32 %v5261_v17, %v4074_v16  ;;  %v5193_v29 = vld [vmem:[%s6051_s15 + $0x194] sm:$0xf0]  ;;  %v4058_v32 = vld [vmem:[%s6051_s15 + $0x388] sm:$0xf] }
  0xe3   : > { %2162 = vmatpush.bf16.msrb.mxu0 %v4135_v30  ;;  %v3930_v30 = vld [vmem:[%s6051_s15 + $0x288] sm:$0xf]  ;;  %v5225_v31 = vld [vmem:[%s6051_s15 + $0x294] sm:$0xf0]  ;;  %v3803_v35 = vor.u32 %v5193_v29, %v3802_v27 }
  0xe4   : > { %v3931_v36 = vor.u32 %v5225_v31, %v3930_v30  ;;  %v3658_v37 = vld [vmem:[%s6051_s15 + $0x68] sm:$0xf]  ;;  %v5189_v42 = vld [vmem:[%s6051_s15 + $0x174] sm:$0xf0] }
  0xe5   : > { %2175 = vmatpush.bf16.msrb.mxu1 %v4263_v33  ;;  %2188 = vmatpush.bf16.msrb.mxu2 %v4391_v34  ;;  %v5257_v33 = vld [vmem:[%s6051_s15 + $0x394] sm:$0xf0]  ;;  %v3675_v34 = vor.u32 %v5161_v26, %v3674_v25  ;;  %v3786_v39 = vld [vmem:[%s6051_s15 + $0x168] sm:$0xf] }
  0xe6   : > { %2201 = vmatpush.bf16.msrb.mxu3 %v4519_v38  ;;  %v5157_v38 = vld [vmem:[%s6051_s15 + $0x74] sm:$0xf0]  ;;  %v4059_v41 = vor.u32 %v5257_v33, %v4058_v32  ;;  %v3914_v45 = vld [vmem:[%s6051_s15 + $0x268] sm:$0xf]  ;;  %v3787_v51 = vor.u32 %v5189_v42, %v3786_v39 }
  0xe7   : > { %2163 = vmatpush.bf16.msrb.mxu0 %v4119_v49  ;;  %v5221_v47 = vld [vmem:[%s6051_s15 + $0x274] sm:$0xf0]  ;;  %v4042_v48 = vld [vmem:[%s6051_s15 + $0x368] sm:$0xf]  ;;  %v3659_v50 = vor.u32 %v5157_v38, %v3658_v37 }
  0xe8   : > { %v5253_v49 = vld [vmem:[%s6051_s15 + $0x374] sm:$0xf0]  ;;  %v3915_v52 = vor.u32 %v5221_v47, %v3914_v45  ;;  %v3770_v55 = vld [vmem:[%s6051_s15 + $0x148] sm:$0xf] }
  0xe9   : > { %2176 = vmatpush.bf16.msrb.mxu1 %v4247_v53  ;;  %2189 = vmatpush.bf16.msrb.mxu2 %v4375_v54  ;;  %v3642_v53 = vld [vmem:[%s6051_s15 + $0x48] sm:$0xf]  ;;  %v5153_v54 = vld [vmem:[%s6051_s15 + $0x54] sm:$0xf0]  ;;  %v4043_v56 = vor.u32 %v5253_v49, %v4042_v48 }
  0xea   : > { %2202 = vmatpush.bf16.msrb.mxu3 %v4503_v57  ;;  %2164 = vmatmul.bf16.vlgmr.msrb.gmra.mxu0 %v6233_v43  ;;  %v5185_v57 = vld [vmem:[%s6051_s15 + $0x154] sm:$0xf0]  ;;  %v3643_v62 = vor.u32 %v5153_v54, %v3642_v53  ;;  %v3626_v1 = vld [vmem:[%s6051_s15 + $0x28] sm:$0xf] }
  0xeb   : > { %2208 = vmatpush.bf16.msra.mxu0 %v3723_v58  ;;  %v3898_v58 = vld [vmem:[%s6051_s15 + $0x248] sm:$0xf]  ;;  %v5249_v61 = vld [vmem:[%s6051_s15 + $0x354] sm:$0xf0]  ;;  %v3771_v63 = vor.u32 %v5185_v57, %v3770_v55 }
  0xec   : > { %2190 = vmatmul.bf16.vlgmr.msrb.gmra.mxu2 %v6229_v40  ;;  %2177 = vmatmul.bf16.vlgmr.msrb.gmra.mxu1 %v6237_v46  ;;  %v5149_v2 = vld [vmem:[%s6051_s15 + $0x34] sm:$0xf0]  ;;  %v3754_v3 = vld [vmem:[%s6051_s15 + $0x128] sm:$0xf] }
  0xed   : > { %2221 = vmatpush.bf16.msra.mxu1 %v3851_v59  ;;  %2234 = vmatpush.bf16.msra.mxu2 %v3979_v60  ;;  %v5217_v59 = vld [vmem:[%s6051_s15 + $0x254] sm:$0xf0]  ;;  %v4026_v60 = vld [vmem:[%s6051_s15 + $0x348] sm:$0xf]  ;;  %v3627_v10 = vor.u32 %v5149_v2, %v3626_v1 }
  0xee   : > { %2247 = vmatpush.bf16.msra.mxu3 %v4107_v0  ;;  %v3899_v0 = vor.u32 %v5217_v59, %v3898_v58  ;;  %v4027_v4 = vor.u32 %v5249_v61, %v4026_v60  ;;  %v5181_v5 = vld [vmem:[%s6051_s15 + $0x134] sm:$0xf0]  ;;  %v3610_v11 = vld [vmem:[%s6051_s15 + $0x8] sm:$0xf] }
  0xef   : > { %2203 = vmatmul.bf16.vlgmr.msrb.gmra.mxu3 %v6235_v44  ;;  %2209 = vmatpush.bf16.msra.mxu0 %v3707_v6  ;;  %v3882_v6 = vld [vmem:[%s6051_s15 + $0x228] sm:$0xf]  ;;  %v5245_v9 = vld [vmem:[%s6051_s15 + $0x334] sm:$0xf0]  ;;  %v3755_v13 = vor.u32 %v5181_v5, %v3754_v3 }
  0xf0   : > { %v3738_v15 = vld [vmem:[%s6051_s15 + $0x108] sm:$0xf]  ;;  %v5177_v16 = vld [vmem:[%s6051_s15 + $0x114] sm:$0xf0] }
  0xf1   : > { %2222 = vmatpush.bf16.msra.mxu1 %v3835_v7  ;;  %2235 = vmatpush.bf16.msra.mxu2 %v3963_v8  ;;  %v5213_v7 = vld [vmem:[%s6051_s15 + $0x234] sm:$0xf0]  ;;  %v4010_v8 = vld [vmem:[%s6051_s15 + $0x328] sm:$0xf]  ;;  %v3739_v33 = vor.u32 %v5177_v16, %v3738_v15 }
  0xf2   : > { %2248 = vmatpush.bf16.msra.mxu3 %v4091_v12  ;;  %v5145_v12 = vld [vmem:[%s6051_s15 + $0x14] sm:$0xf0]  ;;  %v3883_v14 = vor.u32 %v5213_v7, %v3882_v6  ;;  %v3866_v17 = vld [vmem:[%s6051_s15 + $0x208] sm:$0xf] }
  0xf3   : > { %2210 = vmatpush.bf16.msra.mxu0 %v3691_v18  ;;  %v4011_v18 = vor.u32 %v5245_v9, %v4010_v8  ;;  %v5241_v25 = vld [vmem:[%s6051_s15 + $0x314] sm:$0xf0]  ;;  %v4234_v26 = vld [vmem:[%s6051_s15 + $0x4e8] sm:$0xf]  ;;  %v3611_v29 = vor.u32 %v5145_v12, %v3610_v11 }
  0xf4   : > { %v5301_v27 = vld [vmem:[%s6051_s15 + $0x4f4] sm:$0xf0]  ;;  %v4490_v31 = vld [vmem:[%s6051_s15 + $0x6e8] sm:$0xf] }
  0xf5   : > { %2223 = vmatpush.bf16.msra.mxu1 %v3819_v19  ;;  %2236 = vmatpush.bf16.msra.mxu2 %v3947_v23  ;;  %v5209_v19 = vld [vmem:[%s6051_s15 + $0x214] sm:$0xf0]  ;;  %v3994_v23 = vld [vmem:[%s6051_s15 + $0x308] sm:$0xf]  ;;  %v4235_v38 = vor.u32 %v5301_v27, %v4234_v26 }
  0xf6   : > { %2249 = vmatpush.bf16.msra.mxu3 %v4075_v28  ;;  %v4362_v28 = vld [vmem:[%s6051_s15 + $0x5e8] sm:$0xf]  ;;  %v5333_v30 = vld [vmem:[%s6051_s15 + $0x5f4] sm:$0xf0]  ;;  %v3995_v37 = vor.u32 %v5241_v25, %v3994_v23 }
  0xf7   : > { %2211 = vmatpush.bf16.msra.mxu0 %v3675_v34  ;;  %v5365_v32 = vld [vmem:[%s6051_s15 + $0x6f4] sm:$0xf0]  ;;  %v3867_v34 = vor.u32 %v5209_v19, %v3866_v17  ;;  %v4363_v39 = vor.u32 %v5333_v30, %v4362_v28  ;;  %v4218_v42 = vld [vmem:[%s6051_s15 + $0x4c8] sm:$0xf]  ;;  %v6470_v28 = vld [vmem:[%s6057_s4] sm:$0xf] }
  0xf8   : > { %v5297_v45 = vld [vmem:[%s6051_s15 + $0x4d4] sm:$0xf0]  ;;  %v4346_v47 = vld [vmem:[%s6051_s15 + $0x5c8] sm:$0xf] }
  0xf9   : > { %2224 = vmatpush.bf16.msra.mxu1 %v3803_v35  ;;  %2237 = vmatpush.bf16.msra.mxu2 %v3931_v36  ;;  %v4618_v35 = vld [vmem:[%s6051_s15 + $0x7e8] sm:$0xf]  ;;  %v5397_v36 = vld [vmem:[%s6051_s15 + $0x7f4] sm:$0xf0]  ;;  %v4219_v54 = vor.u32 %v5297_v45, %v4218_v42 }
  0xfa   : > { %2250 = vmatpush.bf16.msra.mxu3 %v4059_v41  ;;  %v4491_v41 = vor.u32 %v5365_v32, %v4490_v31  ;;  %v4619_v48 = vor.u32 %v5397_v36, %v4618_v35  ;;  %v5329_v49 = vld [vmem:[%s6051_s15 + $0x5d4] sm:$0xf0]  ;;  %v4202_v57 = vld [vmem:[%s6051_s15 + $0x4a8] sm:$0xf] }
  0xfb   : > { %2212 = vmatpush.bf16.msra.mxu0 %v3659_v50  ;;  %v4474_v50 = vld [vmem:[%s6051_s15 + $0x6c8] sm:$0xf]  ;;  %v5393_v53 = vld [vmem:[%s6051_s15 + $0x7d4] sm:$0xf0]  ;;  %v4347_v55 = vor.u32 %v5329_v49, %v4346_v47 }
  0xfc   : > { %v5293_v58 = vld [vmem:[%s6051_s15 + $0x4b4] sm:$0xf0]  ;;  %v4330_v59 = vld [vmem:[%s6051_s15 + $0x5a8] sm:$0xf] }
  0xfd   : > { %2225 = vmatpush.bf16.msra.mxu1 %v3787_v51  ;;  %2238 = vmatpush.bf16.msra.mxu2 %v3915_v52  ;;  %v5361_v51 = vld [vmem:[%s6051_s15 + $0x6d4] sm:$0xf0]  ;;  %v4602_v52 = vld [vmem:[%s6051_s15 + $0x7c8] sm:$0xf]  ;;  %v4203_v2 = vor.u32 %v5293_v58, %v4202_v57 }
  0xfe   : > { %2251 = vmatpush.bf16.msra.mxu3 %v4043_v56  ;;  %v4475_v56 = vor.u32 %v5361_v51, %v4474_v50  ;;  %v4603_v60 = vor.u32 %v5393_v53, %v4602_v52  ;;  %v5325_v61 = vld [vmem:[%s6051_s15 + $0x5b4] sm:$0xf0]  ;;  %v4186_v5 = vld [vmem:[%s6051_s15 + $0x488] sm:$0xf] }
  0xff   : > { %2213 = vmatpush.bf16.msra.mxu0 %v3643_v62  ;;  %v4458_v62 = vld [vmem:[%s6051_s15 + $0x6a8] sm:$0xf]  ;;  %v5389_v1 = vld [vmem:[%s6051_s15 + $0x7b4] sm:$0xf0]  ;;  %v4331_v3 = vor.u32 %v5325_v61, %v4330_v59 }
 0x100   : > { %v5289_v6 = vld [vmem:[%s6051_s15 + $0x494] sm:$0xf0]  ;;  %v4314_v7 = vld [vmem:[%s6051_s15 + $0x588] sm:$0xf] }
 0x101   : > { %2226 = vmatpush.bf16.msra.mxu1 %v3771_v63  ;;  %2239 = vmatpush.bf16.msra.mxu2 %v3899_v0  ;;  %v5357_v63 = vld [vmem:[%s6051_s15 + $0x6b4] sm:$0xf0]  ;;  %v4586_v0 = vld [vmem:[%s6051_s15 + $0x7a8] sm:$0xf] }
 0x102   : > { %2252 = vmatpush.bf16.msra.mxu3 %v4027_v4  ;;  %v4459_v4 = vor.u32 %v5357_v63, %v4458_v62  ;;  %v4587_v8 = vor.u32 %v5389_v1, %v4586_v0  ;;  %v5321_v9 = vld [vmem:[%s6051_s15 + $0x594] sm:$0xf0]  ;;  %v4570_v12 = vld [vmem:[%s6051_s15 + $0x788] sm:$0xf] }
 0x103   : > { %2214 = vmatpush.bf16.msra.mxu0 %v3627_v10  ;;  %v4442_v10 = vld [vmem:[%s6051_s15 + $0x688] sm:$0xf]  ;;  %v5353_v11 = vld [vmem:[%s6051_s15 + $0x694] sm:$0xf0]  ;;  %v4315_v16 = vor.u32 %v5321_v9, %v4314_v7 }
 0x104   : > { %v4170_v15 = vld [vmem:[%s6051_s15 + $0x468] sm:$0xf]  ;;  %v4443_v17 = vor.u32 %v5353_v11, %v4442_v10  ;;  %v5317_v23 = vld [vmem:[%s6051_s15 + $0x574] sm:$0xf0] }
 0x105   : > { %2227 = vmatpush.bf16.msra.mxu1 %v3755_v13  ;;  %2240 = vmatpush.bf16.msra.mxu2 %v3883_v14  ;;  %v5385_v13 = vld [vmem:[%s6051_s15 + $0x794] sm:$0xf0]  ;;  %v4187_v14 = vor.u32 %v5289_v6, %v4186_v5  ;;  %v4298_v19 = vld [vmem:[%s6051_s15 + $0x568] sm:$0xf] }
 0x106   : > { %2253 = vmatpush.bf16.msra.mxu3 %v4011_v18  ;;  %v5285_v18 = vld [vmem:[%s6051_s15 + $0x474] sm:$0xf0]  ;;  %v4571_v25 = vor.u32 %v5385_v13, %v4570_v12  ;;  %v4426_v26 = vld [vmem:[%s6051_s15 + $0x668] sm:$0xf] }
 0x107   : > { %2215 = vmatpush.bf16.msra.mxu0 %v3611_v29  ;;  %v5349_v27 = vld [vmem:[%s6051_s15 + $0x674] sm:$0xf0]  ;;  %v4554_v29 = vld [vmem:[%s6051_s15 + $0x768] sm:$0xf]  ;;  %v4171_v31 = vor.u32 %v5285_v18, %v4170_v15  ;;  %v5171_v15 = vld [vmem:[%s6051_s15 + $0xec] sm:$0xf] }
 0x108   : > { %v5381_v30 = vld [vmem:[%s6051_s15 + $0x774] sm:$0xf0]  ;;  %v4154_v32 = vld [vmem:[%s6051_s15 + $0x448] sm:$0xf] }
 0x109   : > { %2228 = vmatpush.bf16.msra.mxu1 %v3739_v33  ;;  %2241 = vmatpush.bf16.msra.mxu2 %v3867_v34  ;;  %v4299_v33 = vor.u32 %v5317_v23, %v4298_v19  ;;  %v4427_v34 = vor.u32 %v5349_v27, %v4426_v26  ;;  %v5281_v35 = vld [vmem:[%s6051_s15 + $0x454] sm:$0xf0]  ;;  %v4282_v36 = vld [vmem:[%s6051_s15 + $0x548] sm:$0xf]  ;;  %v3852_v19 = vld [vmem:[%s6051_s15 + $0x1f8] sm:$0xf0] }
 0x10a   : > { %2254 = vmatpush.bf16.msra.mxu3 %v3995_v37  ;;  %2216 = vmatmul.bf16.vlgmr.msra.gmra.mxu0 %v6173_v21  ;;  %v684_v37 = vperm.slane %v6470_v28, 0  ;;  %v5345_v42 = vld [vmem:[%s6051_s15 + $0x654] sm:$0xf0]  ;;  %v4538_v45 = vld [vmem:[%s6051_s15 + $0x748] sm:$0xf] }
 0x10b   : > { %2260 = vmatpush.bf16.msrb.mxu0 %v4235_v38  ;;  %v4555_v38 = vor.u32 %v5381_v30, %v4554_v29  ;;  %v5377_v47 = vld [vmem:[%s6051_s15 + $0x754] sm:$0xf0]  ;;  %v4138_v52 = vld [vmem:[%s6051_s15 + $0x428] sm:$0xf]  ;;  %v5235_v23 = vld [vmem:[%s6051_s15 + $0x2ec] sm:$0xf] }
 0x10c   : > { %2242 = vmatmul.bf16.vlgmr.msra.gmra.mxu2 %v6171_v20  ;;  %2229 = vmatmul.bf16.vlgmr.msra.gmra.mxu1 %v6177_v24  ;;  %v5277_v53 = vld [vmem:[%s6051_s15 + $0x434] sm:$0xf0]  ;;  %v4539_v57 = vor.u32 %v5377_v47, %v4538_v45  ;;  %v4394_v59 = vld [vmem:[%s6051_s15 + $0x628] sm:$0xf]  ;;  %v3836_v45 = vld [vmem:[%s6051_s15 + $0x1d8] sm:$0xf0] }
 0x10d   : > { %2273 = vmatpush.bf16.msrb.mxu1 %v4363_v39  ;;  %2286 = vmatpush.bf16.msrb.mxu2 %v4491_v41  ;;  %v5313_v39 = vld [vmem:[%s6051_s15 + $0x554] sm:$0xf0]  ;;  %v4410_v41 = vld [vmem:[%s6051_s15 + $0x648] sm:$0xf]  ;;  %v4139_v0 = vor.u32 %v5277_v53, %v4138_v52  ;;  %v5231_v47 = vld [vmem:[%s6051_s15 + $0x2cc] sm:$0xf] }
 0x10e   : > { %2299 = vmatpush.bf16.msrb.mxu3 %v4619_v48  ;;  %v4155_v48 = vor.u32 %v5281_v35, %v4154_v32  ;;  %v4283_v50 = vor.u32 %v5313_v39, %v4282_v36  ;;  %v4411_v51 = vor.u32 %v5345_v42, %v4410_v41  ;;  %v5309_v58 = vld [vmem:[%s6051_s15 + $0x534] sm:$0xf0]  ;;  %v4522_v61 = vld [vmem:[%s6051_s15 + $0x728] sm:$0xf]  ;;  %v4108_v32 = vld [vmem:[%s6051_s15 + $0x3f8] sm:$0xf0] }
 0x10f   : > { %2255 = vmatmul.bf16.vlgmr.msra.gmra.mxu3 %v6175_v22  ;;  %2261 = vmatpush.bf16.msrb.mxu0 %v4219_v54  ;;  %v4266_v54 = vld [vmem:[%s6051_s15 + $0x528] sm:$0xf]  ;;  %v5373_v62 = vld [vmem:[%s6051_s15 + $0x734] sm:$0xf0]  ;;  %v3708_v39 = vld [vmem:[%s6051_s15 + $0xd8] sm:$0xf0] }
 0x110   : > { %v4122_v1 = vld [vmem:[%s6051_s15 + $0x408] sm:$0xf]  ;;  %v5305_v6 = vld [vmem:[%s6051_s15 + $0x514] sm:$0xf0]  ;;  %v4523_v9 = vor.u32 %v5373_v62, %v4522_v61  ;;  %v5199_v41 = vld [vmem:[%s6051_s15 + $0x1cc] sm:$0xf] }
 0x111   : > { %2274 = vmatpush.bf16.msrb.mxu1 %v4347_v55  ;;  %2287 = vmatpush.bf16.msrb.mxu2 %v4475_v56  ;;  %v4250_v5 = vld [vmem:[%s6051_s15 + $0x508] sm:$0xf]  ;;  %v5337_v10 = vld [vmem:[%s6051_s15 + $0x614] sm:$0xf0]  ;;  %v5227_v61 = vld [vmem:[%s6051_s15 + $0x2ac] sm:$0xf] }
 0x112   : > { %2300 = vmatpush.bf16.msrb.mxu3 %v4603_v60  ;;  %v5341_v60 = vld [vmem:[%s6051_s15 + $0x634] sm:$0xf0]  ;;  %v4378_v7 = vld [vmem:[%s6051_s15 + $0x608] sm:$0xf]  ;;  %v4251_v29 = vor.u32 %v5305_v6, %v4250_v5  ;;  %v3948_v62 = vld [vmem:[%s6051_s15 + $0x2b8] sm:$0xf0] }
 0x113   : > { %2262 = vmatpush.bf16.msrb.mxu0 %v4203_v2  ;;  %v5273_v2 = vld [vmem:[%s6051_s15 + $0x414] sm:$0xf0]  ;;  %v4506_v11 = vld [vmem:[%s6051_s15 + $0x708] sm:$0xf]  ;;  %v4379_v30 = vor.u32 %v5337_v10, %v4378_v7  ;;  %v3676_v5 = vld [vmem:[%s6051_s15 + $0x98] sm:$0xf0] }
 0x114   : > { %v5369_v12 = vld [vmem:[%s6051_s15 + $0x714] sm:$0xf0]  ;;  %v4123_v18 = vor.u32 %v5273_v2, %v4122_v1  ;;  %v5191_v6 = vld [vmem:[%s6051_s15 + $0x18c] sm:$0xf]  ;;  %v3932_v10 = vld [vmem:[%s6051_s15 + $0x298] sm:$0xf0] }
 0x115   : > { %2275 = vmatpush.bf16.msrb.mxu1 %v4331_v3  ;;  %2288 = vmatpush.bf16.msrb.mxu2 %v4459_v4  ;;  %v2009_v49 = vpop.f32.mrf.mxu0  ;;  %v2022_v56 = vpop.f32.mrf.mxu1  ;;  %v4267_v3 = vor.u32 %v5309_v58, %v4266_v54  ;;  %v4395_v4 = vor.u32 %v5341_v60, %v4394_v59  ;;  %v3839_v54 = vor.u32 %v5199_v41, %v3836_v45  ;;  %v5195_v58 = vld [vmem:[%s6051_s15 + $0x1ac] sm:$0xf]  ;;  %v3820_v60 = vld [vmem:[%s6051_s15 + $0x1b8] sm:$0xf0] }
 0x116   : > { %2301 = vmatpush.bf16.msrb.mxu3 %v4587_v8  ;;  %v2010_v55 = vadd.f32 %v2009_v49, %v684_v37  ;;  %v2035_v8 = vpop.f32.mrf.mxu2  ;;  %v5263_v49 = vld [vmem:[%s6051_s15 + $0x3cc] sm:$0xf]  ;;  %v3823_v2 = vor.u32 %v5195_v58, %v3820_v60  ;;  %v3772_v45 = vld [vmem:[%s6051_s15 + $0x158] sm:$0xf0] }
 0x117   : > { %2263 = vmatpush.bf16.msrb.mxu0 %v4187_v14  ;;  %v2048_v14 = vpop.f32.mrf.mxu3  ;;  %v5147_v58 = vld [vmem:[%s6051_s15 + $0x2c] sm:$0xf] }
 0x118   : > { %v2023_v63 = vadd.f32 %v2022_v56, %v2010_v55  ;;  %v5163_v56 = vld [vmem:[%s6051_s15 + $0xac] sm:$0xf] }
 0x119   : > { %2276 = vmatpush.bf16.msrb.mxu1 %v4315_v16  ;;  %2289 = vmatpush.bf16.msrb.mxu2 %v4443_v17  ;;  %v3724_v16 = vld [vmem:[%s6051_s15 + $0xf8] sm:$0xf0]  ;;  %v5203_v17 = vld [vmem:[%s6051_s15 + $0x1ec] sm:$0xf] }
 0x11a   : > { %2302 = vmatpush.bf16.msrb.mxu3 %v4571_v25  ;;  %v2036_v13 = vadd.f32 %v2035_v8, %v2023_v63  ;;  %v3980_v25 = vld [vmem:[%s6051_s15 + $0x2f8] sm:$0xf0]  ;;  %v3727_v35 = vor.u32 %v5171_v15, %v3724_v16  ;;  %v3855_v36 = vor.u32 %v5203_v17, %v3852_v19  ;;  %v5259_v63 = vld [vmem:[%s6051_s15 + $0x3ac] sm:$0xf] }
 0x11b   : > { %2264 = vmatpush.bf16.msrb.mxu0 %v4171_v31  ;;  %v5267_v31 = vld [vmem:[%s6051_s15 + $0x3ec] sm:$0xf]  ;;  %v3983_v37 = vor.u32 %v5235_v23, %v3980_v25  ;;  %v3804_v8 = vld [vmem:[%s6051_s15 + $0x198] sm:$0xf0] }
 0x11c   : > { %v6505_v26 = vadd.f32 %v2048_v14, %v2036_v13  ;;  %v4111_v42 = vor.u32 %v5267_v31, %v4108_v32  ;;  %v3807_v15 = vor.u32 %v5191_v6, %v3804_v8  ;;  %v5155_v17 = vld [vmem:[%s6051_s15 + $0x6c] sm:$0xf]  ;;  %v3916_v31 = vld [vmem:[%s6051_s15 + $0x278] sm:$0xf0] }
 0x11d   : > { %2277 = vmatpush.bf16.msrb.mxu1 %v4299_v33  ;;  %2290 = vmatpush.bf16.msrb.mxu2 %v4427_v34  ;;  %v2011_v27 = vpop.f32.mrf.mxu0  ;;  %v2024_v33 = vpop.f32.mrf.mxu1  ;;  %v4507_v34 = vor.u32 %v5369_v12, %v4506_v11  ;;  %v5255_v11 = vld [vmem:[%s6051_s15 + $0x38c] sm:$0xf]  ;;  %v4060_v12 = vld [vmem:[%s6051_s15 + $0x398] sm:$0xf0] }
 0x11e   : > { %2303 = vmatpush.bf16.msrb.mxu3 %v4555_v38  ;;  %v5167_v38 = vld [vmem:[%s6051_s15 + $0xcc] sm:$0xf]  ;;  %v4063_v27 = vor.u32 %v5255_v11, %v4060_v12  ;;  %v4044_v33 = vld [vmem:[%s6051_s15 + $0x378] sm:$0xf0] }
 0x11f   : > { %2265 = vmatpush.bf16.msrb.mxu0 %v4155_v48  ;;  %v3964_v48 = vld [vmem:[%s6051_s15 + $0x2d8] sm:$0xf0]  ;;  %v3711_v52 = vor.u32 %v5167_v38, %v3708_v39  ;;  %v2050_v53 = vpop.f32.mrf.mxu3  ;;  %v5187_v19 = vld [vmem:[%s6051_s15 + $0x16c] sm:$0xf] }
 0x120   : > { %v3967_v55 = vor.u32 %v5231_v47, %v3964_v48  ;;  %v5251_v32 = vld [vmem:[%s6051_s15 + $0x36c] sm:$0xf]  ;;  %v3644_v38 = vld [vmem:[%s6051_s15 + $0x58] sm:$0xf0] }
 0x121   : > { %2278 = vmatpush.bf16.msrb.mxu1 %v4283_v50  ;;  %2291 = vmatpush.bf16.msrb.mxu2 %v4411_v51  ;;  %v4092_v50 = vld [vmem:[%s6051_s15 + $0x3d8] sm:$0xf0]  ;;  %v2037_v51 = vpop.f32.mrf.mxu2  ;;  %v5183_v39 = vld [vmem:[%s6051_s15 + $0x14c] sm:$0xf] }
 0x122   : > { %2304 = vmatpush.bf16.msrb.mxu3 %v4539_v57  ;;  %v3692_v57 = vld [vmem:[%s6051_s15 + $0xb8] sm:$0xf0]  ;;  %v4095_v59 = vor.u32 %v5263_v49, %v4092_v50  ;;  %v5215_v47 = vld [vmem:[%s6051_s15 + $0x24c] sm:$0xf] }
 0x123   : > { %2266 = vmatpush.bf16.msrb.mxu0 %v4139_v0  ;;  %v4076_v0 = vld [vmem:[%s6051_s15 + $0x3b8] sm:$0xf0]  ;;  %v3695_v1 = vor.u32 %v5163_v56, %v3692_v57  ;;  %v5247_v51 = vld [vmem:[%s6051_s15 + $0x34c] sm:$0xf]  ;;  %v3775_v56 = vor.u32 %v5183_v39, %v3772_v45 }
 0x124   : > { %v4079_v7 = vor.u32 %v5259_v63, %v4076_v0  ;;  %v3900_v48 = vld [vmem:[%s6051_s15 + $0x258] sm:$0xf0]  ;;  %v5179_v60 = vld [vmem:[%s6051_s15 + $0x12c] sm:$0xf] }
 0x125   : > { %2279 = vmatpush.bf16.msrb.mxu1 %v4267_v3  ;;  %2292 = vmatpush.bf16.msrb.mxu2 %v4395_v4  ;;  %v3951_v3 = vor.u32 %v5227_v61, %v3948_v62  ;;  %v5159_v4 = vld [vmem:[%s6051_s15 + $0x8c] sm:$0xf]  ;;  %v3903_v57 = vor.u32 %v5215_v47, %v3900_v48  ;;  %v3756_v63 = vld [vmem:[%s6051_s15 + $0x138] sm:$0xf0] }
 0x126   : > { %2305 = vmatpush.bf16.msrb.mxu3 %v4523_v9  ;;  %v5223_v9 = vld [vmem:[%s6051_s15 + $0x28c] sm:$0xf]  ;;  %v3679_v13 = vor.u32 %v5159_v4, %v3676_v5  ;;  %v3612_v6 = vld [vmem:[%s6051_s15 + $0x18] sm:$0xf0] }
 0x127   : > { %2267 = vmatpush.bf16.msrb.mxu0 %v4123_v18  ;;  %v3935_v16 = vor.u32 %v5223_v9, %v3932_v10  ;;  %v3660_v18 = vld [vmem:[%s6051_s15 + $0x78] sm:$0xf0]  ;;  %v5211_v0 = vld [vmem:[%s6051_s15 + $0x22c] sm:$0xf] }
 0x128   : > { %v5143_v5 = vld [vmem:[%s6051_s15 + $0xc] sm:$0xf]  ;;  %v3740_v10 = vld [vmem:[%s6051_s15 + $0x118] sm:$0xf0] }
 0x129   : > { %2280 = vmatpush.bf16.msrb.mxu1 %v4251_v29  ;;  %2293 = vmatpush.bf16.msrb.mxu2 %v4379_v30  ;;  %v2061_v14 = vpop.f32.mrf.mxu0  ;;  %v3788_v29 = vld [vmem:[%s6051_s15 + $0x178] sm:$0xf0]  ;;  %v5219_v30 = vld [vmem:[%s6051_s15 + $0x26c] sm:$0xf] }
 0x12a   : > { %2306 = vmatpush.bf16.msrb.mxu3 %v4507_v34  ;;  %2268 = vmatmul.bf16.vlgmr.msrb.gmra.mxu0 %v6233_v43  ;;  %v2062_v23 = vadd.f32 %v2061_v14, %v6505_v26  ;;  %v3791_v26 = vor.u32 %v5187_v19, %v3788_v29  ;;  %v5175_v9 = vld [vmem:[%s6051_s15 + $0x10c] sm:$0xf]  ;;  %v3868_v14 = vld [vmem:[%s6051_s15 + $0x218] sm:$0xf0] }
 0x12b   : > { %2312 = vmatpush.bf16.msra.mxu0 %v3727_v35  ;;  %v2074_v25 = vpop.f32.mrf.mxu1  ;;  %v3663_v35 = vor.u32 %v5155_v17, %v3660_v18  ;;  %v5207_v11 = vld [vmem:[%s6051_s15 + $0x20c] sm:$0xf]  ;;  %v4236_v19 = vld [vmem:[%s6051_s15 + $0x4f8] sm:$0xf0] }
 0x12c   : > { %2294 = vmatmul.bf16.vlgmr.msrb.gmra.mxu2 %v6229_v40  ;;  %2281 = vmatmul.bf16.vlgmr.msrb.gmra.mxu1 %v6237_v46  ;;  %v2075_v34 = vadd.f32 %v2074_v25, %v2062_v23  ;;  %v5299_v18 = vld [vmem:[%s6051_s15 + $0x4ec] sm:$0xf]  ;;  %v3615_v25 = vor.u32 %v5143_v5, %v3612_v6  ;;  %v4220_v39 = vld [vmem:[%s6051_s15 + $0x4d8] sm:$0xf0] }
 0x12d   : > { %2325 = vmatpush.bf16.msra.mxu1 %v3855_v36  ;;  %2338 = vmatpush.bf16.msra.mxu2 %v3983_v37  ;;  %v3919_v36 = vor.u32 %v5219_v30, %v3916_v31  ;;  %v5151_v37 = vld [vmem:[%s6051_s15 + $0x4c] sm:$0xf]  ;;  %v4492_v30 = vld [vmem:[%s6051_s15 + $0x6f8] sm:$0xf0]  ;;  %v3743_v31 = vor.u32 %v5175_v9, %v3740_v10 }
 0x12e   : > { %2351 = vmatpush.bf16.msra.mxu3 %v4111_v42  ;;  %v4047_v42 = vor.u32 %v5251_v32, %v4044_v33  ;;  %v3647_v53 = vor.u32 %v5151_v37, %v3644_v38  ;;  %v5331_v23 = vld [vmem:[%s6051_s15 + $0x5ec] sm:$0xf]  ;;  %v3871_v32 = vor.u32 %v5207_v11, %v3868_v14  ;;  %v4348_v45 = vld [vmem:[%s6051_s15 + $0x5d8] sm:$0xf0] }
 0x12f   : > { %2307 = vmatmul.bf16.vlgmr.msrb.gmra.mxu3 %v6235_v44  ;;  %2313 = vmatpush.bf16.msra.mxu0 %v3711_v52  ;;  %v2087_v41 = vpop.f32.mrf.mxu2  ;;  %v4028_v52 = vld [vmem:[%s6051_s15 + $0x358] sm:$0xf0]  ;;  %v5363_v29 = vld [vmem:[%s6051_s15 + $0x6ec] sm:$0xf] }
 0x130   : > { %v2088_v49 = vadd.f32 %v2087_v41, %v2075_v34  ;;  %v4031_v62 = vor.u32 %v5247_v51, %v4028_v52  ;;  %v5395_v33 = vld [vmem:[%s6051_s15 + $0x7ec] sm:$0xf]  ;;  %v4620_v34 = vld [vmem:[%s6051_s15 + $0x7f8] sm:$0xf0]  ;;  %v4495_v37 = vor.u32 %v5363_v29, %v4492_v30 }
 0x131   : > { %2326 = vmatpush.bf16.msra.mxu1 %v3839_v54  ;;  %2339 = vmatpush.bf16.msra.mxu2 %v3967_v55  ;;  %v2063_v55 = vpop.f32.mrf.mxu0  ;;  %v5295_v38 = vld [vmem:[%s6051_s15 + $0x4cc] sm:$0xf]  ;;  %v4476_v48 = vld [vmem:[%s6051_s15 + $0x6d8] sm:$0xf0] }
 0x132   : > { %2352 = vmatpush.bf16.msra.mxu3 %v4095_v59  ;;  %v2100_v50 = vpop.f32.mrf.mxu3  ;;  %v3628_v59 = vld [vmem:[%s6051_s15 + $0x38] sm:$0xf0]  ;;  %v5327_v41 = vld [vmem:[%s6051_s15 + $0x5cc] sm:$0xf]  ;;  %v4223_v51 = vor.u32 %v5295_v38, %v4220_v39 }
 0x133   : > { %2314 = vmatpush.bf16.msra.mxu0 %v3695_v1  ;;  %v6554_v54 = vadd.f32 %v2100_v50, %v2088_v49  ;;  %v2076_v61 = vpop.f32.mrf.mxu1  ;;  %v3884_v1 = vld [vmem:[%s6051_s15 + $0x238] sm:$0xf0]  ;;  %v3631_v4 = vor.u32 %v5147_v58, %v3628_v59  ;;  %v5359_v47 = vld [vmem:[%s6051_s15 + $0x6cc] sm:$0xf]  ;;  %v4351_v52 = vor.u32 %v5327_v41, %v4348_v45 }
 0x134   : > { %v3887_v8 = vor.u32 %v5211_v0, %v3884_v1  ;;  %v5391_v49 = vld [vmem:[%s6051_s15 + $0x7cc] sm:$0xf]  ;;  %v4604_v50 = vld [vmem:[%s6051_s15 + $0x7d8] sm:$0xf0] }
 0x135   : > { %2327 = vmatpush.bf16.msra.mxu1 %v3823_v2  ;;  %2340 = vmatpush.bf16.msra.mxu2 %v3951_v3  ;;  %v5243_v2 = vld [vmem:[%s6051_s15 + $0x32c] sm:$0xf]  ;;  %v4012_v3 = vld [vmem:[%s6051_s15 + $0x338] sm:$0xf0]  ;;  %v4607_v58 = vor.u32 %v5391_v49, %v4604_v50 }
 0x136   : > { %2353 = vmatpush.bf16.msra.mxu3 %v4079_v7  ;;  %v3759_v7 = vor.u32 %v5179_v60, %v3756_v63  ;;  %v5291_v55 = vld [vmem:[%s6051_s15 + $0x4ac] sm:$0xf]  ;;  %v4332_v59 = vld [vmem:[%s6051_s15 + $0x5b8] sm:$0xf0] }
 0x137   : > { %2315 = vmatpush.bf16.msra.mxu0 %v3679_v13  ;;  %v2089_v12 = vpop.f32.mrf.mxu2  ;;  %v4015_v13 = vor.u32 %v5243_v2, %v4012_v3  ;;  %v5355_v60 = vld [vmem:[%s6051_s15 + $0x6ac] sm:$0xf]  ;;  %v4460_v61 = vld [vmem:[%s6051_s15 + $0x6b8] sm:$0xf0] }
 0x138   : > { %v4588_v63 = vld [vmem:[%s6051_s15 + $0x7b8] sm:$0xf0]  ;;  %v4463_v1 = vor.u32 %v5355_v60, %v4460_v61  ;;  %v5287_v2 = vld [vmem:[%s6051_s15 + $0x48c] sm:$0xf]  ;;  %v685_v60 = vperm.slane %v6470_v28, 1 }
 0x139   : > { %2328 = vmatpush.bf16.msra.mxu1 %v3807_v15  ;;  %2341 = vmatpush.bf16.msra.mxu2 %v3935_v16  ;;  %v5239_v15 = vld [vmem:[%s6051_s15 + $0x30c] sm:$0xf]  ;;  %v3996_v16 = vld [vmem:[%s6051_s15 + $0x318] sm:$0xf0] }
 0x13a   : > { %2354 = vmatpush.bf16.msra.mxu3 %v4063_v27  ;;  %v2102_v17 = vpop.f32.mrf.mxu3  ;;  %v4364_v27 = vld [vmem:[%s6051_s15 + $0x5f8] sm:$0xf0]  ;;  %v5283_v12 = vld [vmem:[%s6051_s15 + $0x46c] sm:$0xf] }
 0x13b   : > { %2316 = vmatpush.bf16.msra.mxu0 %v3663_v35  ;;  %v3999_v35 = vor.u32 %v5239_v15, %v3996_v16  ;;  %v4188_v3 = vld [vmem:[%s6051_s15 + $0x498] sm:$0xf0]  ;;  %v5315_v14 = vld [vmem:[%s6051_s15 + $0x56c] sm:$0xf] }
 0x13c   : > { %v4316_v5 = vld [vmem:[%s6051_s15 + $0x598] sm:$0xf0]  ;;  %v5375_v39 = vld [vmem:[%s6051_s15 + $0x74c] sm:$0xf] }
 0x13d   : > { %2329 = vmatpush.bf16.msra.mxu1 %v3791_v26  ;;  %2342 = vmatpush.bf16.msra.mxu2 %v3919_v36  ;;  %v4239_v26 = vor.u32 %v5299_v18, %v4236_v19  ;;  %v4367_v36 = vor.u32 %v5331_v23, %v4364_v27  ;;  %v4444_v6 = vld [vmem:[%s6051_s15 + $0x698] sm:$0xf0]  ;;  %v5347_v18 = vld [vmem:[%s6051_s15 + $0x66c] sm:$0xf] }
 0x13e   : > { %2355 = vmatpush.bf16.msra.mxu3 %v4047_v42  ;;  %v4623_v42 = vor.u32 %v5395_v33, %v4620_v34  ;;  %v4300_v17 = vld [vmem:[%s6051_s15 + $0x578] sm:$0xf0]  ;;  %v5379_v23 = vld [vmem:[%s6051_s15 + $0x76c] sm:$0xf] }
 0x13f   : > { %2317 = vmatpush.bf16.msra.mxu0 %v3647_v53  ;;  %v4479_v53 = vor.u32 %v5359_v47, %v4476_v48  ;;  %v4428_v19 = vld [vmem:[%s6051_s15 + $0x678] sm:$0xf0]  ;;  %v4303_v29 = vor.u32 %v5315_v14, %v4300_v17  ;;  %v5311_v33 = vld [vmem:[%s6051_s15 + $0x54c] sm:$0xf] }
 0x140   : > { %v4431_v30 = vor.u32 %v5347_v18, %v4428_v19  ;;  %v4540_v41 = vld [vmem:[%s6051_s15 + $0x758] sm:$0xf0]  ;;  %v5275_v49 = vld [vmem:[%s6051_s15 + $0x42c] sm:$0xf]  ;;  %v4994_v18 = vld [vmem:[%s6059_s23 + $0x2e0] sm:$0xf] }
 0x141   : > { %2330 = vmatpush.bf16.msra.mxu1 %v3775_v56  ;;  %2343 = vmatpush.bf16.msra.mxu2 %v3903_v57  ;;  %v4204_v56 = vld [vmem:[%s6051_s15 + $0x4b8] sm:$0xf0]  ;;  %v5323_v57 = vld [vmem:[%s6051_s15 + $0x5ac] sm:$0xf]  ;;  %v5492_v19 = vld [vmem:[%s6059_s23 + $0x2ec] sm:$0xf0] }
 0x142   : > { %2356 = vmatpush.bf16.msra.mxu3 %v4031_v62  ;;  %v5387_v62 = vld [vmem:[%s6051_s15 + $0x7ac] sm:$0xf]  ;;  %v4207_v0 = vor.u32 %v5291_v55, %v4204_v56  ;;  %v4140_v50 = vld [vmem:[%s6051_s15 + $0x438] sm:$0xf0] }
 0x143   : > { %2318 = vmatpush.bf16.msra.mxu0 %v3631_v4  ;;  %v5319_v4 = vld [vmem:[%s6051_s15 + $0x58c] sm:$0xf]  ;;  %v4268_v55 = vld [vmem:[%s6051_s15 + $0x538] sm:$0xf0]  ;;  %v4143_v61 = vor.u32 %v5275_v49, %v4140_v50  ;;  %v4818_v49 = vld [vmem:[%s6059_s23 + $0x180] sm:$0xf] }
 0x144   : > { %v4319_v10 = vor.u32 %v5319_v4, %v4316_v5  ;;  %v5339_v56 = vld [vmem:[%s6051_s15 + $0x62c] sm:$0xf] }
 0x145   : > { %2331 = vmatpush.bf16.msra.mxu1 %v3759_v7  ;;  %2344 = vmatpush.bf16.msra.mxu2 %v3887_v8  ;;  %v5383_v7 = vld [vmem:[%s6051_s15 + $0x78c] sm:$0xf]  ;;  %v4572_v8 = vld [vmem:[%s6051_s15 + $0x798] sm:$0xf0] }
 0x146   : > { %2357 = vmatpush.bf16.msra.mxu3 %v4015_v13  ;;  %v4172_v13 = vld [vmem:[%s6051_s15 + $0x478] sm:$0xf0]  ;;  %v4575_v16 = vor.u32 %v5383_v7, %v4572_v8  ;;  %v5335_v28 = vld [vmem:[%s6051_s15 + $0x60c] sm:$0xf]  ;;  %v4738_v7 = vld [vmem:[%s6059_s23 + $0xe0] sm:$0xf] }
 0x147   : > { %2319 = vmatpush.bf16.msra.mxu0 %v3615_v25  ;;  %v6608_v9 = vpop.f32.mrf.mxu0  ;;  %v4556_v25 = vld [vmem:[%s6051_s15 + $0x778] sm:$0xf0]  ;;  %v4175_v27 = vor.u32 %v5283_v12, %v4172_v13  ;;  %v5367_v5 = vld [vmem:[%s6051_s15 + $0x70c] sm:$0xf]  ;;  %v5428_v8 = vld [vmem:[%s6059_s23 + $0xec] sm:$0xf0] }
 0x148   : > { %v5460_v12 = vld [vmem:[%s6059_s23 + $0x1ec] sm:$0xf0]  ;;  %v4739_v17 = vor.u32 %v5428_v8, %v4738_v7 }
 0x149   : > { %2332 = vmatpush.bf16.msra.mxu1 %v3743_v31  ;;  %2345 = vmatpush.bf16.msra.mxu2 %v3871_v32  ;;  %v6613_v15 = vpop.f32.mrf.mxu1  ;;  %v5279_v31 = vld [vmem:[%s6051_s15 + $0x44c] sm:$0xf]  ;;  %v4156_v32 = vld [vmem:[%s6051_s15 + $0x458] sm:$0xf0] }
 0x14a   : > { %2358 = vmatpush.bf16.msra.mxu3 %v3999_v35  ;;  %2320 = vmatmul.bf16.vlgmr.msra.gmra.mxu0 %v6173_v21  ;;  %v4591_v21 = vor.u32 %v5387_v62, %v4588_v63  ;;  %v4559_v35 = vor.u32 %v5379_v23, %v4556_v25  ;;  %v5271_v62 = vld [vmem:[%s6051_s15 + $0x40c] sm:$0xf]  ;;  %v4722_v25 = vld [vmem:[%s6059_s23 + $0xc0] sm:$0xf] }
 0x14b   : > { %2364 = vmatpush.bf16.msrb.mxu0 %v4239_v26  ;;  %v4284_v26 = vld [vmem:[%s6051_s15 + $0x558] sm:$0xf0] }
 0x14c   : > { %2346 = vmatmul.bf16.vlgmr.msra.gmra.mxu2 %v6171_v20  ;;  %2333 = vmatmul.bf16.vlgmr.msra.gmra.mxu1 %v6177_v24  ;;  %v4335_v20 = vor.u32 %v5323_v57, %v4332_v59  ;;  %v4191_v24 = vor.u32 %v5287_v2, %v4188_v3  ;;  %v4287_v47 = vor.u32 %v5311_v33, %v4284_v26  ;;  %v4396_v57 = vld [vmem:[%s6051_s15 + $0x638] sm:$0xf0]  ;;  %v4978_v33 = vld [vmem:[%s6059_s23 + $0x2c0] sm:$0xf] }
 0x14d   : > { %2377 = vmatpush.bf16.msrb.mxu1 %v4367_v36  ;;  %2390 = vmatpush.bf16.msrb.mxu2 %v4495_v37  ;;  %v5343_v36 = vld [vmem:[%s6051_s15 + $0x64c] sm:$0xf]  ;;  %v4412_v37 = vld [vmem:[%s6051_s15 + $0x658] sm:$0xf0] }
 0x14e   : > { %2403 = vmatpush.bf16.msrb.mxu3 %v4623_v42  ;;  %v4159_v42 = vor.u32 %v5279_v31, %v4156_v32  ;;  %v4415_v48 = vor.u32 %v5343_v36, %v4412_v37  ;;  %v4524_v59 = vld [vmem:[%s6051_s15 + $0x738] sm:$0xf0]  ;;  %v4995_v31 = vor.u32 %v5492_v19, %v4994_v18  ;;  %v4706_v36 = vld [vmem:[%s6059_s23 + $0xa0] sm:$0xf]  ;;  %v5420_v37 = vld [vmem:[%s6059_s23 + $0xac] sm:$0xf0] }
 0x14f   : > { %2359 = vmatmul.bf16.vlgmr.msra.gmra.mxu3 %v6175_v22  ;;  %2365 = vmatpush.bf16.msrb.mxu0 %v4223_v51  ;;  %v5351_v22 = vld [vmem:[%s6051_s15 + $0x68c] sm:$0xf]  ;;  %v6623_v34 = vpop.f32.mrf.mxu2  ;;  %v2115_v45 = vpop.f32.mrf.mxu0  ;;  %v4252_v2 = vld [vmem:[%s6051_s15 + $0x518] sm:$0xf0]  ;;  %v5436_v18 = vld [vmem:[%s6059_s23 + $0x12c] sm:$0xf0] }
 0x150   : > { %v4447_v11 = vor.u32 %v5351_v22, %v4444_v6  ;;  %v5307_v51 = vld [vmem:[%s6051_s15 + $0x52c] sm:$0xf]  ;;  %v4508_v6 = vld [vmem:[%s6051_s15 + $0x718] sm:$0xf0]  ;;  %v5484_v45 = vld [vmem:[%s6059_s23 + $0x2ac] sm:$0xf0] }
 0x151   : > { %2378 = vmatpush.bf16.msrb.mxu1 %v4351_v52  ;;  %2391 = vmatpush.bf16.msrb.mxu2 %v4479_v53  ;;  %v2128_v52 = vpop.f32.mrf.mxu1  ;;  %v4543_v53 = vor.u32 %v5375_v39, %v4540_v41  ;;  %v4271_v63 = vor.u32 %v5307_v51, %v4268_v55  ;;  %v4834_v39 = vld [vmem:[%s6059_s23 + $0x1a0] sm:$0xf]  ;;  %v5452_v41 = vld [vmem:[%s6059_s23 + $0x1ac] sm:$0xf0] }
 0x152   : > { %2404 = vmatpush.bf16.msrb.mxu3 %v4607_v58  ;;  %v6628_v38 = vpop.f32.mrf.mxu3  ;;  %v5371_v58 = vld [vmem:[%s6051_s15 + $0x72c] sm:$0xf]  ;;  %v5480_v55 = vld [vmem:[%s6059_s23 + $0x28c] sm:$0xf0] }
 0x153   : > { %2366 = vmatpush.bf16.msrb.mxu0 %v4207_v0  ;;  %v4399_v0 = vor.u32 %v5339_v56, %v4396_v57  ;;  %v4527_v4 = vor.u32 %v5371_v58, %v4524_v59  ;;  %v5412_v57 = vld [vmem:[%s6059_s23 + $0x6c] sm:$0xf0] }
 0x155   : > { %2379 = vmatpush.bf16.msrb.mxu1 %v4335_v20  ;;  %2392 = vmatpush.bf16.msrb.mxu2 %v4463_v1  ;;  %v4124_v20 = vld [vmem:[%s6051_s15 + $0x418] sm:$0xf0]  ;;  %v5303_v1 = vld [vmem:[%s6051_s15 + $0x50c] sm:$0xf] }
 0x156   : > { %2405 = vmatpush.bf16.msrb.mxu3 %v4591_v21  ;;  %v4380_v21 = vld [vmem:[%s6051_s15 + $0x618] sm:$0xf0]  ;;  %v4255_v13 = vor.u32 %v5303_v1, %v4252_v2  ;;  %v5476_v1 = vld [vmem:[%s6059_s23 + $0x26c] sm:$0xf0] }
 0x157   : > { %2367 = vmatpush.bf16.msrb.mxu0 %v4191_v24  ;;  %v2141_v3 = vpop.f32.mrf.mxu2  ;;  %v2114_v24 = vadd.f32 %v6608_v9, %v685_v60  ;;  %v4383_v14 = vor.u32 %v5335_v28, %v4380_v21  ;;  %v4802_v60 = vld [vmem:[%s6059_s23 + $0x160] sm:$0xf] }
 0x158   : > { %v4658_v3 = vld [vmem:[%s6059_s23 + $0x40] sm:$0xf] }
 0x159   : > { %2380 = vmatpush.bf16.msrb.mxu1 %v4319_v10  ;;  %2393 = vmatpush.bf16.msrb.mxu2 %v4447_v11  ;;  %v4127_v10 = vor.u32 %v5271_v62, %v4124_v20  ;;  %v4866_v11 = vld [vmem:[%s6059_s23 + $0x1e0] sm:$0xf]  ;;  %v2127_v23 = vadd.f32 %v6613_v15, %v2114_v24 }
 0x15a   : > { %2406 = vmatpush.bf16.msrb.mxu3 %v4575_v16  ;;  %v2154_v22 = vpop.f32.mrf.mxu3  ;;  %v4511_v16 = vor.u32 %v5367_v5, %v4508_v6  ;;  %v4867_v9 = vor.u32 %v5460_v12, %v4866_v11  ;;  %v4930_v20 = vld [vmem:[%s6059_s23 + $0x260] sm:$0xf]  ;;  %v5440_v5 = vld [vmem:[%s6059_s23 + $0x14c] sm:$0xf0] }
 0x15b   : > { %2368 = vmatpush.bf16.msrb.mxu0 %v4175_v27  ;;  %v5424_v27 = vld [vmem:[%s6059_s23 + $0xcc] sm:$0xf0]  ;;  %v2140_v26 = vadd.f32 %v6623_v34, %v2127_v23  ;;  %v4962_v34 = vld [vmem:[%s6059_s23 + $0x2a0] sm:$0xf]  ;;  %v4931_v6 = vor.u32 %v5476_v1, %v4930_v20 }
 0x15c   : > { %v4723_v32 = vor.u32 %v5424_v27, %v4722_v25  ;;  %v4963_v50 = vor.u32 %v5484_v45, %v4962_v34  ;;  %v4786_v21 = vld [vmem:[%s6059_s23 + $0x140] sm:$0xf]  ;;  %v5472_v11 = vld [vmem:[%s6059_s23 + $0x24c] sm:$0xf0] }
 0x15d   : > { %2381 = vmatpush.bf16.msrb.mxu1 %v4303_v29  ;;  %2394 = vmatpush.bf16.msrb.mxu2 %v4431_v30  ;;  %v4850_v29 = vld [vmem:[%s6059_s23 + $0x1c0] sm:$0xf]  ;;  %v5456_v30 = vld [vmem:[%s6059_s23 + $0x1cc] sm:$0xf0]  ;;  %v4787_v12 = vor.u32 %v5440_v5, %v4786_v21  ;;  %v4692_v21 = vld [vmem:[%s6059_s23 + $0x90] sm:$0xf0] }
 0x15e   : > { %2407 = vmatpush.bf16.msrb.mxu3 %v4559_v35  ;;  %v5488_v35 = vld [vmem:[%s6059_s23 + $0x2cc] sm:$0xf0]  ;;  %v4851_v15 = vor.u32 %v5456_v30, %v4850_v29  ;;  %v4898_v25 = vld [vmem:[%s6059_s23 + $0x220] sm:$0xf]  ;;  %v5446_v5 = vld [vmem:[%s6059_s23 + $0x184] sm:$0xf] }
 0x15f   : > { %2369 = vmatpush.bf16.msrb.mxu0 %v4159_v42  ;;  %v4979_v42 = vor.u32 %v5488_v35, %v4978_v33  ;;  %v5468_v27 = vld [vmem:[%s6059_s23 + $0x22c] sm:$0xf0]  ;;  %v4626_v30 = vld [vmem:[%s6059_s23] sm:$0xf] }
 0x160   : > { %v5432_v35 = vld [vmem:[%s6059_s23 + $0x10c] sm:$0xf0]  ;;  %v4882_v34 = vld [vmem:[%s6059_s23 + $0x200] sm:$0xf] }
 0x161   : > { %2382 = vmatpush.bf16.msrb.mxu1 %v4287_v47  ;;  %2395 = vmatpush.bf16.msrb.mxu2 %v4415_v48  ;;  %v4835_v47 = vor.u32 %v5452_v41, %v4834_v39  ;;  %v5416_v48 = vld [vmem:[%s6059_s23 + $0x8c] sm:$0xf0]  ;;  %v4868_v39 = vld [vmem:[%s6059_s23 + $0x1f0] sm:$0xf0]  ;;  %v4899_v41 = vor.u32 %v5468_v27, %v4898_v25  ;;  %v5406_v27 = vld [vmem:[%s6059_s23 + $0x44] sm:$0xf] }
 0x162   : > { %2408 = vmatpush.bf16.msrb.mxu3 %v4543_v53  ;;  %v4946_v53 = vld [vmem:[%s6059_s23 + $0x280] sm:$0xf]  ;;  %v5464_v45 = vld [vmem:[%s6059_s23 + $0x20c] sm:$0xf0] }
 0x163   : > { %2370 = vmatpush.bf16.msrb.mxu0 %v4143_v61  ;;  %v5444_v61 = vld [vmem:[%s6059_s23 + $0x16c] sm:$0xf0]  ;;  %v4947_v62 = vor.u32 %v5480_v55, %v4946_v53  ;;  %v4852_v53 = vld [vmem:[%s6059_s23 + $0x1d0] sm:$0xf0]  ;;  %v4883_v55 = vor.u32 %v5464_v45, %v4882_v34 }
 0x164   : > { %v4803_v2 = vor.u32 %v5444_v61, %v4802_v60  ;;  %v5418_v61 = vld [vmem:[%s6059_s23 + $0xa4] sm:$0xf]  ;;  %v4772_v34 = vld [vmem:[%s6059_s23 + $0x130] sm:$0xf0] }
 0x165   : > { %2383 = vmatpush.bf16.msrb.mxu1 %v4271_v63  ;;  %2396 = vmatpush.bf16.msrb.mxu2 %v4399_v0 }
 0x166   : > { %2409 = vmatpush.bf16.msrb.mxu3 %v4527_v4  ;;  %v5408_v4 = vld [vmem:[%s6059_s23 + $0x4c] sm:$0xf0] }
 0x167   : > { %2371 = vmatpush.bf16.msrb.mxu0 %v4127_v10  ;;  %v2165_v52 = vpop.f32.mrf.mxu0  ;;  %v4659_v7 = vor.u32 %v5408_v4, %v4658_v3  ;;  %v4914_v10 = vld [vmem:[%s6059_s23 + $0x240] sm:$0xf]  ;;  %v4964_v3 = vld [vmem:[%s6059_s23 + $0x2b0] sm:$0xf0] }
 0x168   : > { %v4915_v19 = vor.u32 %v5472_v11, %v4914_v10  ;;  %v5410_v11 = vld [vmem:[%s6059_s23 + $0x64] sm:$0xf] }
 0x169   : > { %2384 = vmatpush.bf16.msrb.mxu1 %v4255_v13  ;;  %2397 = vmatpush.bf16.msrb.mxu2 %v4383_v14  ;;  %v2178_v59 = vpop.f32.mrf.mxu1  ;;  %v4642_v13 = vld [vmem:[%s6059_s23 + $0x20] sm:$0xf]  ;;  %v5404_v14 = vld [vmem:[%s6059_s23 + $0x2c] sm:$0xf0] }
 0x16a   : > { %2410 = vmatpush.bf16.msrb.mxu3 %v4511_v16  ;;  %2372 = vmatmul.bf16.vlgmr.msrb.gmra.mxu0 %v6233_v43  ;;  %v4707_v43 = vor.u32 %v5420_v37, %v4706_v36  ;;  %v4643_v23 = vor.u32 %v5404_v14, %v4642_v13  ;;  %v5458_v37 = vld [vmem:[%s6059_s23 + $0x1e4] sm:$0xf] }
 0x16b   : > { %3196 = vmatpush.bf16.msra.mxu0 %v4739_v17  ;;  %v4770_v17 = vld [vmem:[%s6059_s23 + $0x120] sm:$0xf]  ;;  %v5442_v14 = vld [vmem:[%s6059_s23 + $0x164] sm:$0xf] }
 0x16c   : > { %2385 = vmatmul.bf16.vlgmr.msrb.gmra.mxu1 %v6237_v46  ;;  %2398 = vmatmul.bf16.vlgmr.msrb.gmra.mxu2 %v6229_v40  ;;  %v2153_v46 = vadd.f32 %v6628_v38, %v2140_v26  ;;  %v4690_v40 = vld [vmem:[%s6059_s23 + $0x80] sm:$0xf]  ;;  %v4771_v29 = vor.u32 %v5436_v18, %v4770_v17  ;;  %v4740_v26 = vld [vmem:[%s6059_s23 + $0xf0] sm:$0xf0] }
 0x16d   : > { %3209 = vmatpush.bf16.msra.mxu1 %v4867_v9  ;;  %2411 = vmatmul.bf16.vlgmr.msrb.gmra.mxu3 %v6235_v44  ;;  %v5448_v44 = vld [vmem:[%s6059_s23 + $0x18c] sm:$0xf0]  ;;  %v4691_v51 = vor.u32 %v5416_v48, %v4690_v40  ;;  %v4674_v38 = vld [vmem:[%s6059_s23 + $0x60] sm:$0xf]  ;;  %v5490_v48 = vld [vmem:[%s6059_s23 + $0x2e4] sm:$0xf] }
 0x16e   : > { %3222 = vmatpush.bf16.msra.mxu2 %v4995_v31  ;;  %v4819_v56 = vor.u32 %v5448_v44, %v4818_v49  ;;  %v2166_v58 = vadd.f32 %v2165_v52, %v2153_v46  ;;  %v4675_v63 = vor.u32 %v5412_v57, %v4674_v38  ;;  %v5400_v31 = vld [vmem:[%s6059_s23 + $0xc] sm:$0xf0]  ;;  %v2416_v46 = vmax.f32 %v6554_v54, 0.0  ;;  %v4996_v49 = vld [vmem:[%s6059_s23 + $0x2f0] sm:$0xf0] }
 0x16f   : > { %3197 = vmatpush.bf16.msra.mxu0 %v4723_v32  ;;  %v2191_v28 = vpop.f32.mrf.mxu2  ;;  %v2167_v24 = vpop.f32.mrf.mxu0  ;;  %v4754_v32 = vld [vmem:[%s6059_s23 + $0x100] sm:$0xf]  ;;  %v4871_v44 = vor.u32 %v5458_v37, %v4868_v39  ;;  %v5454_v52 = vld [vmem:[%s6059_s23 + $0x1c4] sm:$0xf]  ;;  %v4999_v54 = vor.u32 %v5490_v48, %v4996_v49 }
 0x170   : > { %v2179_v0 = vadd.f32 %v2178_v59, %v2166_v58  ;;  %v6718_v38 = vpack.c.bf16 %v2416_v46, %v2416_v46  ;;  %v5486_v58 = vld [vmem:[%s6059_s23 + $0x2c4] sm:$0xf]  ;;  %v4980_v59 = vld [vmem:[%s6059_s23 + $0x2d0] sm:$0xf0]  ;;  %v4855_v60 = vor.u32 %v5454_v52, %v4852_v53  ;;  %v6759_v46 = vld [vmem:[%s6057_s4] sm:$0xf] }
 0x171   : > { %3210 = vmatpush.bf16.msra.mxu1 %v4851_v15  ;;  %v2180_v16 = vpop.f32.mrf.mxu1  ;;  %v5426_v15 = vld [vmem:[%s6059_s23 + $0xe4] sm:$0xf]  ;;  %v4983_v20 = vor.u32 %v5486_v58, %v4980_v59  ;;  %v4948_v24 = vld [vmem:[%s6059_s23 + $0x290] sm:$0xf0]  ;;  %v4746_v58 = vld [vmem:[%s6059_s23 + $0xe8] sm:$0xf] }
 0x172   : > { %3223 = vmatpush.bf16.msra.mxu2 %v4979_v42  ;;  %v2204_v22 = vpop.f32.mrf.mxu3  ;;  %v2192_v8 = vadd.f32 %v2191_v28, %v2179_v0  ;;  %v4743_v40 = vor.u32 %v5426_v15, %v4740_v26  ;;  %v4836_v0 = vld [vmem:[%s6059_s23 + $0x1b0] sm:$0xf0]  ;;  %v5414_v28 = vld [vmem:[%s6059_s23 + $0x84] sm:$0xf]  ;;  %v5429_v59 = vld [vmem:[%s6059_s23 + $0xf4] sm:$0xf0] }
 0x173   : > { %3198 = vmatpush.bf16.msra.mxu0 %v4707_v43  ;;  %v4627_v43 = vor.u32 %v5400_v31, %v4626_v30  ;;  %v4804_v16 = vld [vmem:[%s6059_s23 + $0x170] sm:$0xf0]  ;;  %v5438_v30 = vld [vmem:[%s6059_s23 + $0x144] sm:$0xf] }
 0x174   : > { %v2205_v9 = vadd.f32 %v2204_v22, %v2192_v8  ;;  %v4820_v22 = vld [vmem:[%s6059_s23 + $0x190] sm:$0xf0]  ;;  %v5478_v8 = vld [vmem:[%s6059_s23 + $0x284] sm:$0xf]  ;;  %v4807_v25 = vor.u32 %v5442_v14, %v4804_v16  ;;  %v5090_v16 = vld [vmem:[%s6059_s23 + $0x3a0] sm:$0xf] }
 0x175   : > { %3211 = vmatpush.bf16.msra.mxu1 %v4835_v47  ;;  %v4755_v47 = vor.u32 %v5432_v35, %v4754_v32  ;;  %v4823_v10 = vor.u32 %v5446_v5, %v4820_v22  ;;  %v4951_v18 = vor.u32 %v5478_v8, %v4948_v24  ;;  %v4788_v31 = vld [vmem:[%s6059_s23 + $0x150] sm:$0xf0]  ;;  %v5470_v26 = vld [vmem:[%s6059_s23 + $0x244] sm:$0xf]  ;;  %v5106_v5 = vld [vmem:[%s6059_s23 + $0x3c0] sm:$0xf] }
 0x176   : > { %3224 = vmatpush.bf16.msra.mxu2 %v4963_v50  ;;  %v2417_v42 = vmax.f32 %v2205_v9, 0.0  ;;  %v5422_v50 = vld [vmem:[%s6059_s23 + $0xc4] sm:$0xf]  ;;  %v4791_v37 = vor.u32 %v5438_v30, %v4788_v31  ;;  %v5520_v22 = vld [vmem:[%s6059_s23 + $0x3cc] sm:$0xf0] }
 0x177   : > { %3199 = vmatpush.bf16.msra.mxu0 %v4691_v51  ;;  %v2193_v33 = vpop.f32.mrf.mxu2  ;;  %v4724_v51 = vld [vmem:[%s6059_s23 + $0xd0] sm:$0xf0]  ;;  %v5474_v9 = vld [vmem:[%s6059_s23 + $0x264] sm:$0xf]  ;;  %v5425_v8 = vld [vmem:[%s6059_s23 + $0xd4] sm:$0xf0]  ;;  %v5107_v24 = vor.u32 %v5520_v22, %v5106_v5 }
 0x178   : > { %v4727_v57 = vor.u32 %v5422_v50, %v4724_v51  ;;  %v5402_v39 = vld [vmem:[%s6059_s23 + $0x24] sm:$0xf]  ;;  %v4900_v51 = vld [vmem:[%s6059_s23 + $0x230] sm:$0xf0]  ;;  %v5074_v31 = vld [vmem:[%s6059_s23 + $0x380] sm:$0xf] }
 0x179   : > { %3212 = vmatpush.bf16.msra.mxu1 %v4819_v56  ;;  %v6716_v56 = vpack.c.bf16 %v2417_v42, %v2417_v42  ;;  %v5466_v50 = vld [vmem:[%s6059_s23 + $0x224] sm:$0xf]  ;;  %v4778_v5 = vld [vmem:[%s6059_s23 + $0x128] sm:$0xf] }
 0x17a   : > { %3225 = vmatpush.bf16.msra.mxu2 %v4947_v62  ;;  %v2206_v36 = vpop.f32.mrf.mxu3  ;;  %v4708_v62 = vld [vmem:[%s6059_s23 + $0xb0] sm:$0xf0]  ;;  %v5430_v53 = vld [vmem:[%s6059_s23 + $0x104] sm:$0xf] }
 0x17b   : > { %3200 = vmatpush.bf16.msra.mxu0 %v4675_v63  ;;  %v5450_v63 = vld [vmem:[%s6059_s23 + $0x1a4] sm:$0xf]  ;;  %v4711_v1 = vor.u32 %v5418_v61, %v4708_v62  ;;  %v4916_v36 = vld [vmem:[%s6059_s23 + $0x250] sm:$0xf0]  ;;  %v4874_v62 = vld [vmem:[%s6059_s23 + $0x1e8] sm:$0xf] }
 0x17c   : > { %v4839_v4 = vor.u32 %v5450_v63, %v4836_v0  ;;  %v4919_v48 = vor.u32 %v5470_v26, %v4916_v36  ;;  %v5461_v63 = vld [vmem:[%s6059_s23 + $0x1f4] sm:$0xf0]  ;;  %v4698_v26 = vld [vmem:[%s6059_s23 + $0x88] sm:$0xf] }
 0x17d   : > { %3213 = vmatpush.bf16.msra.mxu1 %v4803_v2  ;;  %v5482_v2 = vld [vmem:[%s6059_s23 + $0x2a4] sm:$0xf]  ;;  %v5417_v36 = vld [vmem:[%s6059_s23 + $0x94] sm:$0xf0] }
 0x17e   : > { %3226 = vmatpush.bf16.msra.mxu2 %v4931_v6  ;;  %v4967_v6 = vor.u32 %v5482_v2, %v4964_v3  ;;  %v5462_v3 = vld [vmem:[%s6059_s23 + $0x204] sm:$0xf] }
 0x17f   : > { %3201 = vmatpush.bf16.msra.mxu0 %v4659_v7  ;;  %v4695_v7 = vor.u32 %v5414_v28, %v4692_v21  ;;  %v4747_v21 = vor.u32 %v5429_v59, %v4746_v58  ;;  %v4666_v58 = vld [vmem:[%s6059_s23 + $0x48] sm:$0xf]  ;;  %v5409_v59 = vld [vmem:[%s6059_s23 + $0x54] sm:$0xf0] }
 0x181   : > { %3214 = vmatpush.bf16.msra.mxu1 %v4787_v12  ;;  %v4676_v12 = vld [vmem:[%s6059_s23 + $0x70] sm:$0xf0] }
 0x182   : > { %3227 = vmatpush.bf16.msra.mxu2 %v4915_v19  ;;  %v4679_v19 = vor.u32 %v5410_v11, %v4676_v12  ;;  %v5457_v11 = vld [vmem:[%s6059_s23 + $0x1d4] sm:$0xf0] }
 0x183   : > { %3202 = vmatpush.bf16.msra.mxu0 %v4643_v23  ;;  %v4932_v23 = vld [vmem:[%s6059_s23 + $0x270] sm:$0xf0] }
 0x184   : > { %v4935_v35 = vor.u32 %v5474_v9, %v4932_v23  ;;  %v4714_v9 = vld [vmem:[%s6059_s23 + $0xa8] sm:$0xf]  ;;  %v5421_v23 = vld [vmem:[%s6059_s23 + $0xb4] sm:$0xf0] }
 0x185   : > { %3215 = vmatpush.bf16.msra.mxu1 %v4771_v29  ;;  %v4660_v29 = vld [vmem:[%s6059_s23 + $0x50] sm:$0xf0]  ;;  %v4715_v30 = vor.u32 %v5421_v23, %v4714_v9  ;;  %v5496_v9 = vld [vmem:[%s6059_s23 + $0x30c] sm:$0xf0] }
 0x186   : > { %3228 = vmatpush.bf16.msra.mxu2 %v4899_v41  ;;  %v4663_v15 = vor.u32 %v5406_v27, %v4660_v29  ;;  %v4644_v41 = vld [vmem:[%s6059_s23 + $0x30] sm:$0xf0]  ;;  %v5453_v27 = vld [vmem:[%s6059_s23 + $0x1b4] sm:$0xf0] }
 0x187   : > { %3203 = vmatpush.bf16.msra.mxu0 %v4627_v43  ;;  %v2217_v13 = vpop.f32.mrf.mxu0  ;;  %v5434_v43 = vld [vmem:[%s6059_s23 + $0x124] sm:$0xf]  ;;  %v4647_v49 = vor.u32 %v5402_v39, %v4644_v41  ;;  %v4826_v39 = vld [vmem:[%s6059_s23 + $0x188] sm:$0xf] }
 0x188   : > { %v4775_v52 = vor.u32 %v5434_v43, %v4772_v34  ;;  %v5058_v43 = vld [vmem:[%s6059_s23 + $0x360] sm:$0xf]  ;;  %v5508_v34 = vld [vmem:[%s6059_s23 + $0x36c] sm:$0xf0] }
 0x189   : > { %3216 = vmatpush.bf16.msra.mxu1 %v4755_v47  ;;  %v6740_v17 = vpop.f32.mrf.mxu1  ;;  %v686_v47 = vperm.slane %v6759_v46, 2 }
 0x18a   : > { %3204 = vmatmul.bf16.vlgmr.msra.gmra.mxu0 %v6718_v38  ;;  %3229 = vmatpush.bf16.msra.mxu2 %v4883_v55  ;;  %v5122_v55 = vld [vmem:[%s6059_s23 + $0x3e0] sm:$0xf] }
 0x18b   : > { %3248 = vmatpush.bf16.msrb.mxu0 %v4743_v40  ;;  %v5398_v40 = vld [vmem:[%s6059_s23 + $0x4] sm:$0xf] }
 0x18c   : > { %3217 = vmatmul.bf16.vlgmr.msra.gmra.mxu1 %v6716_v56 }
 0x18d   : > { %3261 = vmatpush.bf16.msrb.mxu1 %v4871_v44  ;;  %v4628_v44 = vld [vmem:[%s6059_s23 + $0x10] sm:$0xf0] }
 0x18e   : > { %3274 = vmatpush.bf16.msrb.mxu2 %v4999_v54  ;;  %v5524_v54 = vld [vmem:[%s6059_s23 + $0x3ec] sm:$0xf0]  ;;  %v4631_v2 = vor.u32 %v5398_v40, %v4628_v44  ;;  %v5413_v40 = vld [vmem:[%s6059_s23 + $0x74] sm:$0xf0]  ;;  %v4810_v44 = vld [vmem:[%s6059_s23 + $0x168] sm:$0xf] }
 0x18f   : > { %3249 = vmatpush.bf16.msrb.mxu0 %v4727_v57  ;;  %v6748_v32 = vpop.f32.mrf.mxu2  ;;  %v2219_v42 = vpop.f32.mrf.mxu0  ;;  %v4756_v57 = vld [vmem:[%s6059_s23 + $0x110] sm:$0xf0]  ;;  %v5123_v61 = vor.u32 %v5524_v54, %v5122_v55  ;;  %v5504_v55 = vld [vmem:[%s6059_s23 + $0x34c] sm:$0xf0] }
 0x190   : > { %v4759_v28 = vor.u32 %v5430_v53, %v4756_v57  ;;  %v4699_v42 = vor.u32 %v5417_v36, %v4698_v26  ;;  %v5042_v53 = vld [vmem:[%s6059_s23 + $0x340] sm:$0xf]  ;;  %v5124_v26 = vld [vmem:[%s6059_s23 + $0x3f0] sm:$0xf0]  ;;  %v4876_v36 = vld [vmem:[%s6059_s23 + $0x1f8] sm:$0xf0] }
 0x191   : > { %3262 = vmatpush.bf16.msrb.mxu1 %v4855_v60  ;;  %v2232_v45 = vpop.f32.mrf.mxu1  ;;  %3235 = vmatpush.bf16.msra.mxu3 %v5123_v61  ;;  %v4794_v61 = vld [vmem:[%s6059_s23 + $0x148] sm:$0xf] }
 0x192   : > { %3275 = vmatpush.bf16.msrb.mxu2 %v4983_v20  ;;  %v6750_v33 = vpop.f32.mrf.mxu3  ;;  %v4903_v20 = vor.u32 %v5466_v50, %v4900_v51  ;;  %v5445_v50 = vld [vmem:[%s6059_s23 + $0x174] sm:$0xf0] }
 0x193   : > { %3250 = vmatpush.bf16.msrb.mxu0 %v4711_v1  ;;  %v2218_v1 = vadd.f32 %v2217_v13, %v686_v47  ;;  %v4682_v47 = vld [vmem:[%s6059_s23 + $0x68] sm:$0xf]  ;;  %v4811_v57 = vor.u32 %v5445_v50, %v4810_v44  ;;  %v5423_v44 = vld [vmem:[%s6059_s23 + $0xcc] sm:$0xf]  ;;  %v4732_v50 = vld [vmem:[%s6059_s23 + $0xd8] sm:$0xf0] }
 0x195   : > { %3263 = vmatpush.bf16.msrb.mxu1 %v4839_v4  ;;  %v4884_v4 = vld [vmem:[%s6059_s23 + $0x210] sm:$0xf0]  ;;  %v2231_v13 = vadd.f32 %v6740_v17, %v2218_v1  ;;  %3236 = vmatpush.bf16.msra.mxu3 %v5107_v24  ;;  %v4842_v17 = vld [vmem:[%s6059_s23 + $0x1a8] sm:$0xf]  ;;  %v4667_v1 = vor.u32 %v5409_v59, %v4666_v58  ;;  %v5493_v24 = vld [vmem:[%s6059_s23 + $0x2f4] sm:$0xf0] }
 0x196   : > { %3276 = vmatpush.bf16.msrb.mxu2 %v4967_v6  ;;  %v4875_v6 = vor.u32 %v5461_v63, %v4874_v62  ;;  %v4887_v12 = vor.u32 %v5462_v3, %v4884_v4  ;;  %v5441_v62 = vld [vmem:[%s6059_s23 + $0x154] sm:$0xf0]  ;;  %v5500_v3 = vld [vmem:[%s6059_s23 + $0x32c] sm:$0xf0]  ;;  %v5092_v58 = vld [vmem:[%s6059_s23 + $0x3b0] sm:$0xf0] }
 0x197   : > { %3251 = vmatpush.bf16.msrb.mxu0 %v4695_v7  ;;  %v2245_v60 = vpop.f32.mrf.mxu2  ;;  %v4730_v7 = vld [vmem:[%s6059_s23 + $0xc8] sm:$0xf]  ;;  %v2244_v29 = vadd.f32 %v6748_v32, %v2231_v13  ;;  %v5449_v32 = vld [vmem:[%s6059_s23 + $0x194] sm:$0xf0]  ;;  %v4795_v4 = vor.u32 %v5441_v62, %v4794_v61  ;;  %v5419_v61 = vld [vmem:[%s6059_s23 + $0xac] sm:$0xf] }
 0x198   : > { %v4731_v14 = vor.u32 %v5425_v8, %v4730_v7  ;;  %v4827_v45 = vor.u32 %v5449_v32, %v4826_v39  ;;  %v5043_v60 = vor.u32 %v5504_v55, %v5042_v53  ;;  %v5437_v7 = vld [vmem:[%s6059_s23 + $0x134] sm:$0xf0]  ;;  %v5002_v8 = vld [vmem:[%s6059_s23 + $0x2e8] sm:$0xf]  ;;  %v4716_v62 = vld [vmem:[%s6059_s23 + $0xb8] sm:$0xf0] }
 0x199   : > { %3264 = vmatpush.bf16.msrb.mxu1 %v4823_v10  ;;  %v4858_v10 = vld [vmem:[%s6059_s23 + $0x1c8] sm:$0xf]  ;;  %v2257_v41 = vadd.f32 %v6750_v33, %v2244_v29  ;;  %v4779_v23 = vor.u32 %v5437_v7, %v4778_v5  ;;  %v5489_v39 = vld [vmem:[%s6059_s23 + $0x2d4] sm:$0xf0]  ;;  %v5447_v7 = vld [vmem:[%s6059_s23 + $0x18c] sm:$0xf] }
 0x19a   : > { %3277 = vmatpush.bf16.msrb.mxu2 %v4951_v18  ;;  %v2258_v0 = vpop.f32.mrf.mxu3  ;;  %v5516_v18 = vld [vmem:[%s6059_s23 + $0x3ac] sm:$0xf0]  ;;  %v5485_v53 = vld [vmem:[%s6059_s23 + $0x2b4] sm:$0xf0] }
 0x19b   : > { %3252 = vmatpush.bf16.msrb.mxu0 %v4679_v19  ;;  %v4859_v19 = vor.u32 %v5457_v11, %v4858_v10  ;;  %v4634_v11 = vld [vmem:[%s6059_s23 + $0x8] sm:$0xf] }
 0x19d   : > { %3265 = vmatpush.bf16.msrb.mxu1 %v4807_v25  ;;  %v5091_v25 = vor.u32 %v5516_v18, %v5090_v16  ;;  %v4762_v18 = vld [vmem:[%s6059_s23 + $0x108] sm:$0xf] }
 0x19e   : > { %3278 = vmatpush.bf16.msrb.mxu2 %v4935_v35  ;;  %v5512_v35 = vld [vmem:[%s6059_s23 + $0x38c] sm:$0xf0] }
 0x19f   : > { %3253 = vmatpush.bf16.msrb.mxu0 %v4663_v15  ;;  %3237 = vmatpush.bf16.msra.mxu3 %v5091_v25  ;;  %v4843_v15 = vor.u32 %v5453_v27, %v4842_v17  ;;  %v5003_v25 = vor.u32 %v5493_v24, %v5002_v8  ;;  %v5433_v17 = vld [vmem:[%s6059_s23 + $0x114] sm:$0xf0]  ;;  %v5427_v27 = vld [vmem:[%s6059_s23 + $0xec] sm:$0xf]  ;;  %v4828_v8 = vld [vmem:[%s6059_s23 + $0x198] sm:$0xf0] }
 0x1a0   : > { %v4938_v24 = vld [vmem:[%s6059_s23 + $0x268] sm:$0xf] }
 0x1a1   : > { %3266 = vmatpush.bf16.msrb.mxu1 %v4791_v37  ;;  %v5075_v37 = vor.u32 %v5512_v35, %v5074_v31  ;;  %v4748_v35 = vld [vmem:[%s6059_s23 + $0xf8] sm:$0xf0] }
 0x1a2   : > { %3279 = vmatpush.bf16.msrb.mxu2 %v4919_v48  ;;  %v5059_v48 = vor.u32 %v5508_v34, %v5058_v43  ;;  %v4763_v34 = vor.u32 %v5433_v17, %v4762_v18  ;;  %v4922_v17 = vld [vmem:[%s6059_s23 + $0x248] sm:$0xf] }
 0x1a3   : > { %3254 = vmatpush.bf16.msrb.mxu0 %v4647_v49  ;;  %3238 = vmatpush.bf16.msra.mxu3 %v5075_v37  ;;  %v4986_v37 = vld [vmem:[%s6059_s23 + $0x2c8] sm:$0xf] }
 0x1a5   : > { %3267 = vmatpush.bf16.msrb.mxu1 %v4775_v52  ;;  %v4683_v52 = vor.u32 %v5413_v40, %v4682_v47  ;;  %v5518_v47 = vld [vmem:[%s6059_s23 + $0x3c4] sm:$0xf]  ;;  %v5108_v40 = vld [vmem:[%s6059_s23 + $0x3d0] sm:$0xf0] }
 0x1a6   : > { %3280 = vmatpush.bf16.msrb.mxu2 %v4903_v20  ;;  %v5111_v55 = vor.u32 %v5518_v47, %v5108_v40 }
 0x1a7   : > { %3255 = vmatpush.bf16.msrb.mxu0 %v4631_v2  ;;  %v2269_v49 = vpop.f32.mrf.mxu0  ;;  %3239 = vmatpush.bf16.msra.mxu3 %v5059_v48  ;;  %v5026_v2 = vld [vmem:[%s6059_s23 + $0x320] sm:$0xf] }
 0x1a8   : > { %v2270_v33 = vadd.f32 %v2269_v49, %v2257_v41  ;;  %v5027_v22 = vor.u32 %v5500_v3, %v5026_v2  ;;  %v4987_v49 = vor.u32 %v5489_v39, %v4986_v37  ;;  %v5510_v3 = vld [vmem:[%s6059_s23 + $0x384] sm:$0xf] }
 0x1a9   : > { %3268 = vmatpush.bf16.msrb.mxu1 %v4759_v28  ;;  %v2282_v51 = vpop.f32.mrf.mxu1  ;;  %v4650_v28 = vld [vmem:[%s6059_s23 + $0x28] sm:$0xf] }
 0x1aa   : > { %3256 = vmatmul.bf16.vlgmr.msrb.gmra.mxu0 %v6718_v38  ;;  %3281 = vmatpush.bf16.msrb.mxu2 %v4887_v12  ;;  %v2283_v54 = vadd.f32 %v2282_v51, %v2270_v33  ;;  %v5401_v12 = vld [vmem:[%s6059_s23 + $0x14] sm:$0xf0]  ;;  %v5455_v33 = vld [vmem:[%s6059_s23 + $0x1cc] sm:$0xf]  ;;  %v4860_v51 = vld [vmem:[%s6059_s23 + $0x1d8] sm:$0xf0] }
 0x1ab   : > { %3300 = vmatpush.bf16.msra.mxu0 %v4747_v21  ;;  %3240 = vmatpush.bf16.msra.mxu3 %v5043_v60  ;;  %v5405_v21 = vld [vmem:[%s6059_s23 + $0x34] sm:$0xf0]  ;;  %v4863_v59 = vor.u32 %v5455_v33, %v4860_v51 }
 0x1ac   : > { %3269 = vmatmul.bf16.vlgmr.msrb.gmra.mxu1 %v6716_v56  ;;  %v4651_v16 = vor.u32 %v5405_v21, %v4650_v28  ;;  %v4719_v28 = vor.u32 %v5419_v61, %v4716_v62  ;;  %v5491_v61 = vld [vmem:[%s6059_s23 + $0x2ec] sm:$0xf]  ;;  %v5004_v62 = vld [vmem:[%s6059_s23 + $0x2f8] sm:$0xf0] }
 0x1ad   : > { %3313 = vmatpush.bf16.msra.mxu1 %v4875_v6 }
 0x1af   : > { %3301 = vmatpush.bf16.msra.mxu0 %v4731_v14  ;;  %v2295_v63 = vpop.f32.mrf.mxu2  ;;  %v2271_v10 = vpop.f32.mrf.mxu0  ;;  %3241 = vmatpush.bf16.msra.mxu3 %v5027_v22  ;;  %v5415_v22 = vld [vmem:[%s6059_s23 + $0x8c] sm:$0xf] }
 0x1b0   : > { %v2296_v0 = vadd.f32 %v2295_v63, %v2283_v54  ;;  %v4735_v54 = vor.u32 %v5423_v44, %v4732_v50  ;;  %v5451_v63 = vld [vmem:[%s6059_s23 + $0x1ac] sm:$0xf]  ;;  %v5477_v10 = vld [vmem:[%s6059_s23 + $0x274] sm:$0xf0]  ;;  %v5028_v44 = vld [vmem:[%s6059_s23 + $0x330] sm:$0xf0] }
 0x1b1   : > { %3314 = vmatpush.bf16.msra.mxu1 %v4859_v19  ;;  %v2284_v13 = vpop.f32.mrf.mxu1  ;;  %v5010_v19 = vld [vmem:[%s6059_s23 + $0x300] sm:$0xf]  ;;  %v4939_v18 = vor.u32 %v5477_v10, %v4938_v24  ;;  %v4988_v24 = vld [vmem:[%s6059_s23 + $0x2d8] sm:$0xf0] }
 0x1b2   : > { %v2308_v20 = vpop.f32.mrf.mxu3  ;;  %v5011_v29 = vor.u32 %v5496_v9, %v5010_v19  ;;  %v5506_v13 = vld [vmem:[%s6059_s23 + $0x364] sm:$0xf]  ;;  %v5411_v19 = vld [vmem:[%s6059_s23 + $0x6c] sm:$0xf]  ;;  %v4684_v9 = vld [vmem:[%s6059_s23 + $0x78] sm:$0xf0] }
 0x1b3   : > { %3302 = vmatpush.bf16.msra.mxu0 %v4715_v30  ;;  %v2309_v6 = vadd.f32 %v2308_v20, %v2296_v0  ;;  %v5522_v30 = vld [vmem:[%s6059_s23 + $0x3e4] sm:$0xf]  ;;  %v4844_v0 = vld [vmem:[%s6059_s23 + $0x1b8] sm:$0xf0]  ;;  %v4954_v20 = vld [vmem:[%s6059_s23 + $0x288] sm:$0xf] }
 0x1b4   : > { %3242 = vmatpush.bf16.msra.mxu3 %v5011_v29  ;;  %v5127_v41 = vor.u32 %v5522_v30, %v5124_v26  ;;  %v4847_v21 = vor.u32 %v5451_v63, %v4844_v0  ;;  %v5502_v26 = vld [vmem:[%s6059_s23 + $0x344] sm:$0xf] }
 0x1b5   : > { %3315 = vmatpush.bf16.msra.mxu1 %v4843_v15  ;;  %v2418_v14 = vmax.f32 %v2309_v6, 0.0  ;;  %v5459_v15 = vld [vmem:[%s6059_s23 + $0x1ec] sm:$0xf]  ;;  %v4700_v6 = vld [vmem:[%s6059_s23 + $0x98] sm:$0xf0] }
 0x1b6   : > { %v4879_v48 = vor.u32 %v5459_v15, %v4876_v36  ;;  %v5044_v36 = vld [vmem:[%s6059_s23 + $0x350] sm:$0xf0] }
 0x1b7   : > { %3303 = vmatpush.bf16.msra.mxu0 %v4699_v42  ;;  %v6827_v31 = vpack.c.bf16 %v2418_v14, %v2418_v14  ;;  %v2297_v32 = vpop.f32.mrf.mxu2  ;;  %v4635_v42 = vor.u32 %v5401_v12, %v4634_v11  ;;  %v4703_v12 = vor.u32 %v5415_v22, %v4700_v6  ;;  %v5060_v14 = vld [vmem:[%s6059_s23 + $0x370] sm:$0xf0]  ;;  %v5047_v47 = vor.u32 %v5502_v26, %v5044_v36  ;;  %v4764_v22 = vld [vmem:[%s6059_s23 + $0x118] sm:$0xf0] }
 0x1b8   : > { %3287 = vmatpush.bf16.msrb.mxu3 %v5127_v41  ;;  %v5063_v29 = vor.u32 %v5506_v13, %v5060_v14  ;;  %v5407_v32 = vld [vmem:[%s6059_s23 + $0x4c] sm:$0xf]  ;;  %v4668_v41 = vld [vmem:[%s6059_s23 + $0x58] sm:$0xf0] }
 0x1b9   : > { %3316 = vmatpush.bf16.msra.mxu1 %v4827_v45  ;;  %3230 = vmatmul.bf16.vlgmr.msra.gmra.mxu2 %v6827_v31  ;;  %v4751_v45 = vor.u32 %v5427_v27, %v4748_v35  ;;  %v5473_v27 = vld [vmem:[%s6059_s23 + $0x254] sm:$0xf0]  ;;  %v4687_v35 = vor.u32 %v5411_v19, %v4684_v9  ;;  %v4671_v40 = vor.u32 %v5407_v32, %v4668_v41  ;;  %v5467_v32 = vld [vmem:[%s6059_s23 + $0x22c] sm:$0xf]  ;;  %v4908_v41 = vld [vmem:[%s6059_s23 + $0x238] sm:$0xf0] }
 0x1ba   : > { %v2310_v43 = vpop.f32.mrf.mxu3  ;;  %3326 = vmatpush.bf16.msra.mxu2 %v5003_v25  ;;  %v4812_v25 = vld [vmem:[%s6059_s23 + $0x178] sm:$0xf0]  ;;  %v4923_v39 = vor.u32 %v5473_v27, %v4922_v17 }
 0x1bb   : > { %3304 = vmatpush.bf16.msra.mxu0 %v4683_v52  ;;  %v4970_v52 = vld [vmem:[%s6059_s23 + $0x2a8] sm:$0xf]  ;;  %v4796_v43 = vld [vmem:[%s6059_s23 + $0x158] sm:$0xf0] }
 0x1bc   : > { %v4971_v60 = vor.u32 %v5485_v53, %v4970_v52  ;;  %3288 = vmatpush.bf16.msrb.mxu3 %v5111_v55  ;;  %v5403_v52 = vld [vmem:[%s6059_s23 + $0x2c] sm:$0xf]  ;;  %v4652_v53 = vld [vmem:[%s6059_s23 + $0x38] sm:$0xf0] }
 0x1bd   : > { %3317 = vmatpush.bf16.msra.mxu1 %v4811_v57  ;;  %v5514_v57 = vld [vmem:[%s6059_s23 + $0x3a4] sm:$0xf]  ;;  %v5435_v55 = vld [vmem:[%s6059_s23 + $0x12c] sm:$0xf]  ;;  %v4655_v63 = vor.u32 %v5403_v52, %v4652_v53 }
 0x1be   : > { %3327 = vmatpush.bf16.msra.mxu2 %v4987_v49  ;;  %v5095_v2 = vor.u32 %v5514_v57, %v5092_v58  ;;  %v5498_v49 = vld [vmem:[%s6059_s23 + $0x324] sm:$0xf]  ;;  %v4890_v57 = vld [vmem:[%s6059_s23 + $0x208] sm:$0xf]  ;;  %v5465_v58 = vld [vmem:[%s6059_s23 + $0x214] sm:$0xf0] }
 0x1bf   : > { %3305 = vmatpush.bf16.msra.mxu0 %v4667_v1  ;;  %v5481_v1 = vld [vmem:[%s6059_s23 + $0x294] sm:$0xf0] }
 0x1c0   : > { %v4955_v5 = vor.u32 %v5481_v1, %v4954_v20  ;;  %3289 = vmatpush.bf16.msrb.mxu3 %v5095_v2  ;;  %v5494_v20 = vld [vmem:[%s6059_s23 + $0x304] sm:$0xf]  ;;  %v5012_v1 = vld [vmem:[%s6059_s23 + $0x310] sm:$0xf0] }
 0x1c1   : > { %3318 = vmatpush.bf16.msra.mxu1 %v4795_v4  ;;  %v5076_v4 = vld [vmem:[%s6059_s23 + $0x390] sm:$0xf0]  ;;  %v5015_v6 = vor.u32 %v5494_v20, %v5012_v1  ;;  %v5082_v20 = vld [vmem:[%s6059_s23 + $0x388] sm:$0xf]  ;;  %v5513_v1 = vld [vmem:[%s6059_s23 + $0x394] sm:$0xf0] }
 0x1c2   : > { %3328 = vmatpush.bf16.msra.mxu2 %v4971_v60  ;;  %v5079_v11 = vor.u32 %v5510_v3, %v5076_v4  ;;  %v4891_v3 = vor.u32 %v5465_v58, %v4890_v57  ;;  %v5399_v4 = vld [vmem:[%s6059_s23 + $0xc] sm:$0xf]  ;;  %v5114_v57 = vld [vmem:[%s6059_s23 + $0x3c8] sm:$0xf]  ;;  %v5521_v58 = vld [vmem:[%s6059_s23 + $0x3d4] sm:$0xf0] }
 0x1c3   : > { %3306 = vmatpush.bf16.msra.mxu0 %v4651_v16  ;;  %v4831_v16 = vor.u32 %v5447_v7, %v4828_v8  ;;  %v687_v7 = vperm.slane %v6759_v46, 3  ;;  %v5487_v8 = vld [vmem:[%s6059_s23 + $0x2cc] sm:$0xf]  ;;  %v4972_v46 = vld [vmem:[%s6059_s23 + $0x2b8] sm:$0xf0] }
 0x1c4   : > { %3290 = vmatpush.bf16.msrb.mxu3 %v5079_v11  ;;  %v4991_v14 = vor.u32 %v5487_v8, %v4988_v24  ;;  %v5034_v8 = vld [vmem:[%s6059_s23 + $0x328] sm:$0xf]  ;;  %v5501_v24 = vld [vmem:[%s6059_s23 + $0x334] sm:$0xf0] }
 0x1c5   : > { %3319 = vmatpush.bf16.msra.mxu1 %v4779_v23  ;;  %v5443_v23 = vld [vmem:[%s6059_s23 + $0x16c] sm:$0xf] }
 0x1c6   : > { %3329 = vmatpush.bf16.msra.mxu2 %v4955_v5  ;;  %v4815_v37 = vor.u32 %v5443_v23, %v4812_v25  ;;  %v5431_v5 = vld [vmem:[%s6059_s23 + $0x10c] sm:$0xf]  ;;  %v4956_v25 = vld [vmem:[%s6059_s23 + $0x298] sm:$0xf0] }
 0x1c7   : > { %3307 = vmatpush.bf16.msra.mxu0 %v4635_v42  ;;  %v6871_v30 = vpop.f32.mrf.mxu0  ;;  %v5439_v42 = vld [vmem:[%s6059_s23 + $0x14c] sm:$0xf] }
 0x1c8   : > { %3291 = vmatpush.bf16.msrb.mxu3 %v5063_v29  ;;  %v4799_v50 = vor.u32 %v5439_v42, %v4796_v43  ;;  %v5479_v23 = vld [vmem:[%s6059_s23 + $0x28c] sm:$0xf] }
 0x1c9   : > { %3320 = vmatpush.bf16.msra.mxu1 %v4763_v34  ;;  %3282 = vmatmul.bf16.vlgmr.msrb.gmra.mxu2 %v6827_v31  ;;  %v6873_v15 = vpop.f32.mrf.mxu1  ;;  %v4906_v34 = vld [vmem:[%s6059_s23 + $0x228] sm:$0xf]  ;;  %v4959_v17 = vor.u32 %v5479_v23, %v4956_v25  ;;  %v5475_v29 = vld [vmem:[%s6059_s23 + $0x26c] sm:$0xf]  ;;  %v5116_v23 = vld [vmem:[%s6059_s23 + $0x3d8] sm:$0xf0] }
 0x1ca   : > { %3308 = vmatmul.bf16.vlgmr.msra.gmra.mxu0 %v6718_v38  ;;  %3330 = vmatpush.bf16.msra.mxu2 %v4939_v18  ;;  %v5483_v18 = vld [vmem:[%s6059_s23 + $0x2ac] sm:$0xf] }
 0x1cb   : > { %3352 = vmatpush.bf16.msrb.mxu0 %v4751_v45  ;;  %v5469_v45 = vld [vmem:[%s6059_s23 + $0x234] sm:$0xf0]  ;;  %v4975_v19 = vor.u32 %v5483_v18, %v4972_v46  ;;  %v5132_v18 = vld [vmem:[%s6059_s23 + $0x3f8] sm:$0xf0] }
 0x1cc   : > { %3321 = vmatmul.bf16.vlgmr.msra.gmra.mxu1 %v6716_v56  ;;  %v4907_v33 = vor.u32 %v5469_v45, %v4906_v34  ;;  %3292 = vmatpush.bf16.msrb.mxu3 %v5047_v47  ;;  %v4911_v34 = vor.u32 %v5467_v32, %v4908_v41 }
 0x1cd   : > { %3365 = vmatpush.bf16.msrb.mxu1 %v4879_v48 }
 0x1ce   : > { %3331 = vmatpush.bf16.msra.mxu2 %v4923_v39 }
 0x1cf   : > { %3353 = vmatpush.bf16.msrb.mxu0 %v4735_v54  ;;  %v6883_v48 = vpop.f32.mrf.mxu2  ;;  %v4780_v54 = vld [vmem:[%s6059_s23 + $0x138] sm:$0xf0]  ;;  %v2323_v60 = vpop.f32.mrf.mxu0 }
 0x1d0   : > { %v4783_v2 = vor.u32 %v5435_v55, %v4780_v54 }
 0x1d1   : > { %3366 = vmatpush.bf16.msrb.mxu1 %v4863_v59  ;;  %v5031_v59 = vor.u32 %v5498_v49, %v5028_v44  ;;  %v2336_v0 = vpop.f32.mrf.mxu1  ;;  %v4892_v49 = vld [vmem:[%s6059_s23 + $0x218] sm:$0xf0] }
 0x1d2   : > { %v2360_v51 = vpop.f32.mrf.mxu3  ;;  %3332 = vmatpush.bf16.msra.mxu2 %v4907_v33  ;;  %v5130_v33 = vld [vmem:[%s6059_s23 + $0x3e8] sm:$0xf] }
 0x1d3   : > { %3354 = vmatpush.bf16.msrb.mxu0 %v4719_v28  ;;  %v4636_v28 = vld [vmem:[%s6059_s23 + $0x18] sm:$0xf0]  ;;  %3293 = vmatpush.bf16.msrb.mxu3 %v5031_v59 }
 0x1d4   : > { %v4639_v10 = vor.u32 %v5399_v4, %v4636_v28  ;;  %v5509_v4 = vld [vmem:[%s6059_s23 + $0x374] sm:$0xf0] }
 0x1d5   : > { %3367 = vmatpush.bf16.msrb.mxu1 %v4847_v21  ;;  %v5007_v21 = vor.u32 %v5491_v61, %v5004_v62  ;;  %v5115_v61 = vor.u32 %v5521_v58, %v5114_v57  ;;  %v5098_v62 = vld [vmem:[%s6059_s23 + $0x3a8] sm:$0xf] }
 0x1d6   : > { %3333 = vmatpush.bf16.msra.mxu2 %v4891_v3  ;;  %v5066_v3 = vld [vmem:[%s6059_s23 + $0x368] sm:$0xf] }
 0x1d7   : > { %3355 = vmatpush.bf16.msrb.mxu0 %v4703_v12  ;;  %v2349_v11 = vpop.f32.mrf.mxu2  ;;  %v4767_v12 = vor.u32 %v5431_v5, %v4764_v22  ;;  %3294 = vmatpush.bf16.msrb.mxu3 %v5015_v6  ;;  %v5067_v28 = vor.u32 %v5509_v4, %v5066_v3  ;;  %v5050_v5 = vld [vmem:[%s6059_s23 + $0x348] sm:$0xf] }
 0x1d8   : > { %v2420_v3 = vld [vmem:[#allocation2 + $0x10] sm:$0xff] }
 0x1d9   : > { %3368 = vmatpush.bf16.msrb.mxu1 %v4831_v16  ;;  %v2322_v16 = vadd.f32 %v6871_v30, %v687_v7  ;;  %3334 = vmatmul.bf16.vlgmr.msra.gmra.mxu2 %v6827_v31  ;;  %v4940_v30 = vld [vmem:[%s6059_s23 + $0x278] sm:$0xf0] }
 0x1da   : > { %v2362_v13 = vpop.f32.mrf.mxu3  ;;  %3378 = vmatpush.bf16.msrb.mxu2 %v5007_v21 }
 0x1db   : > { %3356 = vmatpush.bf16.msrb.mxu0 %v4687_v35  ;;  %v2335_v9 = vadd.f32 %v6873_v15, %v2322_v16  ;;  %v4943_v35 = vor.u32 %v5475_v29, %v4940_v30  ;;  %v5471_v15 = vld [vmem:[%s6059_s23 + $0x24c] sm:$0xf]  ;;  %v5497_v13 = vld [vmem:[%s6059_s23 + $0x314] sm:$0xf0] }
 0x1dc   : > { %v5523_v16 = vld [vmem:[%s6059_s23 + $0x3ec] sm:$0xf] }
 0x1dd   : > { %3369 = vmatpush.bf16.msrb.mxu1 %v4815_v37  ;;  %v2348_v27 = vadd.f32 %v6883_v48, %v2335_v9  ;;  %v5463_v48 = vld [vmem:[%s6059_s23 + $0x20c] sm:$0xf] }
 0x1de   : > { %3379 = vmatpush.bf16.msrb.mxu2 %v4991_v14  ;;  %v4895_v52 = vor.u32 %v5463_v48, %v4892_v49  ;;  %v5519_v9 = vld [vmem:[%s6059_s23 + $0x3cc] sm:$0xf]  ;;  %v5020_v48 = vld [vmem:[%s6059_s23 + $0x318] sm:$0xf0] }
 0x1df   : > { %3357 = vmatpush.bf16.msrb.mxu0 %v4671_v40  ;;  %v2361_v26 = vadd.f32 %v2360_v51, %v2348_v27  ;;  %v5525_v51 = vld [vmem:[%s6059_s23 + $0x3f4] sm:$0xf0]  ;;  %v5119_v25 = vor.u32 %v5519_v9, %v5116_v23  ;;  %v5100_v27 = vld [vmem:[%s6059_s23 + $0x3b8] sm:$0xf0]  ;;  %v5511_v30 = vld [vmem:[%s6059_s23 + $0x38c] sm:$0xf] }
 0x1e0   : > { %v5131_v55 = vor.u32 %v5525_v51, %v5130_v33 }
 0x1e1   : > { %3370 = vmatpush.bf16.msrb.mxu1 %v4799_v50 }
 0x1e2   : > { %3380 = vmatpush.bf16.msrb.mxu2 %v4975_v19  ;;  %v5135_v19 = vor.u32 %v5523_v16, %v5132_v18 }
 0x1e3   : > { %3358 = vmatpush.bf16.msrb.mxu0 %v4655_v63  ;;  %v5517_v63 = vld [vmem:[%s6059_s23 + $0x3b4] sm:$0xf0] }
 0x1e4   : > { %v5099_v0 = vor.u32 %v5517_v63, %v5098_v62 }
 0x1e5   : > { %3371 = vmatpush.bf16.msrb.mxu1 %v4783_v2  ;;  %v5083_v2 = vor.u32 %v5513_v1, %v5082_v20 }
 0x1e6   : > { %3381 = vmatpush.bf16.msrb.mxu2 %v4959_v17  ;;  %v5515_v17 = vld [vmem:[%s6059_s23 + $0x3ac] sm:$0xf] }
 0x1e7   : > { %3359 = vmatpush.bf16.msrb.mxu0 %v4639_v10  ;;  %v2373_v36 = vpop.f32.mrf.mxu0  ;;  %v5035_v10 = vor.u32 %v5501_v24, %v5034_v8  ;;  %v5103_v29 = vor.u32 %v5515_v17, %v5100_v27 }
 0x1e8   : > { %v2374_v39 = vadd.f32 %v2373_v36, %v2361_v26  ;;  %v5507_v36 = vld [vmem:[%s6059_s23 + $0x36c] sm:$0xf] }
 0x1e9   : > { %3372 = vmatpush.bf16.msrb.mxu1 %v4767_v12  ;;  %v2386_v37 = vpop.f32.mrf.mxu1  ;;  %v5018_v12 = vld [vmem:[%s6059_s23 + $0x308] sm:$0xf] }
 0x1ea   : > { %3360 = vmatmul.bf16.vlgmr.msrb.gmra.mxu0 %v6718_v38  ;;  %v4924_v38 = vld [vmem:[%s6059_s23 + $0x258] sm:$0xf0]  ;;  %3382 = vmatpush.bf16.msrb.mxu2 %v4943_v35  ;;  %v2387_v42 = vadd.f32 %v2386_v37, %v2374_v39  ;;  %v5019_v46 = vor.u32 %v5497_v13, %v5018_v12  ;;  %v5503_v39 = vld [vmem:[%s6059_s23 + $0x34c] sm:$0xf] }
 0x1eb   : > { %v5084_v35 = vld [vmem:[%s6059_s23 + $0x398] sm:$0xf0]  ;;  %v2422_v13 = vld [vmem:[#allocation2 + $0x18] sm:$0xff] }
 0x1ec   : > { %3373 = vmatmul.bf16.vlgmr.msrb.gmra.mxu1 %v6716_v56  ;;  %v4927_v56 = vor.u32 %v5471_v15, %v4924_v38  ;;  %v5087_v26 = vor.u32 %v5511_v30, %v5084_v35  ;;  %v5068_v15 = vld [vmem:[%s6059_s23 + $0x378] sm:$0xf0] }
 0x1ed   : > { %v5071_v38 = vor.u32 %v5507_v36, %v5068_v15 }
 0x1ee   : > { %3383 = vmatpush.bf16.msrb.mxu2 %v4927_v56  ;;  %v5052_v56 = vld [vmem:[%s6059_s23 + $0x358] sm:$0xf0] }
 0x1ef   : > { %v2399_v43 = vpop.f32.mrf.mxu2  ;;  %v2375_v40 = vpop.f32.mrf.mxu0 }
 0x1f0   : > { %v2400_v45 = vadd.f32 %v2399_v43, %v2387_v42  ;;  %v2412_v47 = vpop.f32.mrf.mxu3  ;;  %v5055_v42 = vor.u32 %v5503_v39, %v5052_v56  ;;  %v5499_v43 = vld [vmem:[%s6059_s23 + $0x32c] sm:$0xf] }
 0x1f1   : > { %v2388_v44 = vpop.f32.mrf.mxu1  ;;  %v5495_v40 = vld [vmem:[%s6059_s23 + $0x30c] sm:$0xf] }
 0x1f2   : > { %v2413_v50 = vadd.f32 %v2412_v47, %v2400_v45  ;;  %3384 = vmatpush.bf16.msrb.mxu2 %v4911_v34  ;;  %v5036_v34 = vld [vmem:[%s6059_s23 + $0x338] sm:$0xf0]  ;;  %v5023_v44 = vor.u32 %v5495_v40, %v5020_v48 }
 0x1f3   : > { %v5039_v45 = vor.u32 %v5499_v43, %v5036_v34 }
 0x1f4   : > { %v2419_v53 = vmax.f32 %v2413_v50, 0.0 }
 0x1f6   : > { %v6924_v54 = vpack.c.bf16 %v2419_v53, %v2419_v53  ;;  %3385 = vmatpush.bf16.msrb.mxu2 %v4895_v52 }
 0x1f7   : > { %v2401_v59 = vpop.f32.mrf.mxu2 }
 0x1f8   : > { %v2414_v60 = vpop.f32.mrf.mxu3  ;;  %3243 = vmatmul.bf16.vlgmr.msra.gmra.mxu3 %v6924_v54 }
 0x1f9   : > { %3339 = vmatpush.bf16.msra.mxu3 %v5131_v55  ;;  %3386 = vmatmul.bf16.vlgmr.msrb.gmra.mxu2 %v6827_v31  ;;  %v5505_v31 = vld [vmem:[%s6059_s23 + $0x354] sm:$0xf0] }
 0x1fa   : > { %v5051_v7 = vor.u32 %v5505_v31, %v5050_v5 }
 0x1fd   : > { %3340 = vmatpush.bf16.msra.mxu3 %v5115_v61 }
 0x201   : > { %3341 = vmatpush.bf16.msra.mxu3 %v5099_v0 }
 0x205   : > { %3342 = vmatpush.bf16.msra.mxu3 %v5083_v2 }
 0x207   : > { %v3205_v21 = vpop.f32.mrf.mxu0 }
 0x208   : > { %3295 = vmatmul.bf16.vlgmr.msrb.gmra.mxu3 %v6924_v54 }
 0x209   : > { %v3218_v22 = vpop.f32.mrf.mxu1  ;;  %3343 = vmatpush.bf16.msra.mxu3 %v5067_v28 }
 0x20a   : > { %v6938_v6 = vadd.f32 %v3218_v22, %v3205_v21 }
 0x20d   : > { %3344 = vmatpush.bf16.msra.mxu3 %v5051_v7  ;;  %v2421_v7 = vld [vmem:[#allocation2] sm:$0xff] }
 0x20f   : > { %v3207_v11 = vpop.f32.mrf.mxu0 }
 0x211   : > { %v3220_v14 = vpop.f32.mrf.mxu1  ;;  %3345 = vmatpush.bf16.msra.mxu3 %v5035_v10 }
 0x215   : > { %3346 = vmatpush.bf16.msra.mxu3 %v5019_v46 }
 0x218   : > { %3347 = vmatmul.bf16.vlgmr.msra.gmra.mxu3 %v6924_v54 }
 0x219   : > { %3391 = vmatpush.bf16.msrb.mxu3 %v5135_v19  ;;  %v2423_v19 = vld [vmem:[#allocation2 + $0x8] sm:$0xff] }
 0x21d   : > { %3392 = vmatpush.bf16.msrb.mxu3 %v5119_v25 }
 0x221   : > { %3393 = vmatpush.bf16.msrb.mxu3 %v5103_v29 }
 0x225   : > { %3394 = vmatpush.bf16.msrb.mxu3 %v5087_v26 }
 0x227   : > { %v3257_v37 = vpop.f32.mrf.mxu0 }
 0x229   : > { %v3270_v32 = vpop.f32.mrf.mxu1  ;;  %3395 = vmatpush.bf16.msrb.mxu3 %v5071_v38 }
 0x22a   : > { %v3271_v41 = vadd.f32 %v3270_v32, %v3257_v37 }
 0x22d   : > { %3396 = vmatpush.bf16.msrb.mxu3 %v5055_v42 }
 0x22f   : > { %v3259_v47 = vpop.f32.mrf.mxu0 }
 0x231   : > { %v3272_v49 = vpop.f32.mrf.mxu1  ;;  %3397 = vmatpush.bf16.msrb.mxu3 %v5039_v45 }
 0x235   : > { %3398 = vmatpush.bf16.msrb.mxu3 %v5023_v44 }
 0x238   : > { %3399 = vmatmul.bf16.vlgmr.msrb.gmra.mxu3 %v6924_v54 }
 0x23c   : > { %v3231_v50 = vpop.f32.mrf.mxu2 }
 0x23d   : > { %v3232_v2 = vadd.f32 %v3231_v50, %v6938_v6 }
 0x244   : > { %v3233_v53 = vpop.f32.mrf.mxu2 }
 0x247   : > { %v3309_v33 = vpop.f32.mrf.mxu0 }
 0x249   : > { %v3322_v51 = vpop.f32.mrf.mxu1 }
 0x24a   : > { %v3323_v52 = vadd.f32 %v3322_v51, %v3309_v33 }
 0x24c   : > { %v3283_v58 = vpop.f32.mrf.mxu2 }
 0x24d   : > { %v3284_v22 = vadd.f32 %v3283_v58, %v3271_v41 }
 0x24f   : > { %v3311_v55 = vpop.f32.mrf.mxu0 }
 0x251   : > { %v3324_v57 = vpop.f32.mrf.mxu1 }
 0x254   : > { %v3285_v59 = vpop.f32.mrf.mxu2 }
 0x25c   : > { %v3335_v63 = vpop.f32.mrf.mxu2 }
 0x25d   : > { %v3336_v12 = vadd.f32 %v3335_v63, %v3323_v52 }
 0x264   : > { %v3337_v1 = vpop.f32.mrf.mxu2 }
 0x267   : > { %v3361_v60 = vpop.f32.mrf.mxu0 }
 0x269   : > { %v3374_v61 = vpop.f32.mrf.mxu1 }
 0x26a   : > { %v3375_v62 = vadd.f32 %v3374_v61, %v3361_v60 }
 0x26f   : > { %v3363_v0 = vpop.f32.mrf.mxu0 }
 0x271   : > { %v3376_v20 = vpop.f32.mrf.mxu1 }
 0x27b   : > { %v3244_v54 = vpop.f32.mrf.mxu3 }
 0x27c   : > { %v3245_v4 = vadd.f32 %v3244_v54, %v3232_v2  ;;  %v3387_v28 = vpop.f32.mrf.mxu2 }
 0x27d   : > { %v3388_v46 = vadd.f32 %v3387_v28, %v3375_v62 }
 0x27e   : > { %v3404_v21 = vadd.f32 %v3245_v4, %v2420_v3 }
 0x280   : > { %3408 = vst [vmem:[#allocation2 + $0x10] sm:$0xff] %v3404_v21 }
 0x283   : > { %v3246_v5 = vpop.f32.mrf.mxu3 }
 0x284   : > { %v3389_v31 = vpop.f32.mrf.mxu2 }
 0x28b   : > { %v3296_v8 = vpop.f32.mrf.mxu3 }
 0x28c   : > { %v3297_v24 = vadd.f32 %v3296_v8, %v3284_v22 }
 0x28e   : > { %v3405_v10 = vadd.f32 %v3297_v24, %v2421_v7 }
 0x290   : > { %3409 = vst [vmem:[#allocation2] sm:$0xff] %v3405_v10 }
 0x293   : > { %v3298_v11 = vpop.f32.mrf.mxu3 }
 0x29b   : > { %v3348_v14 = vpop.f32.mrf.mxu3 }
 0x29c   : > { %v3349_v16 = vadd.f32 %v3348_v14, %v3336_v12 }
 0x29e   : > { %v3406_v6 = vadd.f32 %v3349_v16, %v2422_v13 }
 0x2a0   : > { %3410 = vst [vmem:[#allocation2 + $0x18] sm:$0xff] %v3406_v6 }
 0x2a3   : > { %v3350_v18 = vpop.f32.mrf.mxu3 }
 0x2bb   : > { %v3400_v9 = vpop.f32.mrf.mxu3 }
 0x2bc   : > { %v3401_v23 = vadd.f32 %v3400_v9, %v3388_v46 }
 0x2be   : > { %v3407_v25 = vadd.f32 %v3401_v23, %v2423_v19 }
 0x2bf   : > { %3415 = sbr.rel (%p5136_p5) target bundleno = 843 (0x34b), region = 80 }
 0x2c0   : > { %3411 = vst [vmem:[#allocation2 + $0x8] sm:$0xff] %v3407_v25 }
 0x2c3   : > { %v3402_v17 = vpop.f32.mrf.mxu3 }
 0x2c4   : > { %v3416_v27 = vld [vmem:[#allocation2 + $0x10] sm:$0xff]  ;;  %v3417_v29 = vld [vmem:[#allocation2] sm:$0xff]  ;;  %v3418_v30 = vld [vmem:[#allocation2 + $0x18] sm:$0xff]  ;;  %vm3462_vm0 = vcmask 7168  }
 0x2c5   : > { %v3420_v26 = vld [vmem:[#allocation11] sm:$0xf]  ;;  %v3438_v36 = vld [vmem:[#allocation12] sm:$0xf]  ;;  %v5611_v58 = vld [vmem:[#allocation3] ss:$0 sm:$0xff] }
 0x2c6   : > { %v3422_v15 = vperm.slane %v3420_v26, 0  ;;  %v3423_v38 = vperm.slane %v3420_v26, 1  ;;  %v3424_v37 = vperm.slane %v3420_v26, 2  ;;  %v3425_v39 = vperm.slane %v3420_v26, 3 }
 0x2c7   : > { %v3419_v35 = vld [vmem:[#allocation2 + $0x8] sm:$0xff]  ;;  %v3440_v56 = vperm.slane %v3438_v36, 0  ;;  %v3441_v32 = vperm.slane %v3438_v36, 1  ;;  %v3442_v41 = vperm.slane %v3438_v36, 2  ;;  %v3443_v47 = vperm.slane %v3438_v36, 3 }
 0x2c8   : > { %v3430_v42 = vadd.f32 %v3422_v15, %v3416_v27  ;;  %v3431_v43 = vadd.f32 %v3423_v38, %v3417_v29  ;;  %v3432_v34 = vadd.f32 %v3424_v37, %v3418_v30  ;;  %v3433_v45 = vadd.f32 %v3425_v39, %v3419_v35 }
 0x2ca   : > { %v3434_v40 = vmax.f32 %v3430_v42, 0.0  ;;  %v3435_v48 = vmax.f32 %v3431_v43, 0.0  ;;  %v3436_v49 = vmax.f32 %v3432_v34, 0.0  ;;  %v3437_v44 = vmax.f32 %v3433_v45, 0.0 }
 0x2cc   : > { %v3448_v50 = vmul.f32 %v3440_v56, %v3434_v40  ;;  %v3449_v33 = vmul.f32 %v3441_v32, %v3435_v48  ;;  %v3450_v51 = vmul.f32 %v3442_v41, %v3436_v49  ;;  %v3451_v52 = vmul.f32 %v3443_v47, %v3437_v44 }
 0x2ce   : > { %v3452_v53 = vadd.f32 %v3449_v33, %v3448_v50 }
 0x2d0   : > { %v3453_v55 = vadd.f32 %v3452_v53, %v3450_v51 }
 0x2d2   : > { %v3454_v57 = vadd.f32 %v3453_v55, %v3451_v52 }
 0x2d4   : > { %3455 = vadd.xlane.f32.xlu0 %v3454_v57 }
 0x347   : > { %v3456_v59 = vpop.xlane.xlu0 %3455 }
 0x348   : > { %v3461_v60 = vadd.f32 %v5611_v58, %v3456_v59 }
 0x34a   : > { %3463 = vst.msk [vmem:[%s6988_s7] sm:$0xff] %vm3462_vm0, %v3461_v60 }
 0x34b PF: > { %s7003_s20 = sld [smem:[#allocation19_spill]]  ;;  %p24_p8 = scmp.ge.s32.totalorder %s5916_s30, 6  }
 0x34c   : > { %s7004_s26 = smov %s5834_s27  ;;  %s7005_s27 = smov %s5838_s28 }
 0x34d   : > { %s7007_s29 = smov %s5916_s30  ;;  %26 = sbr.rel (!%p24_p8) target bundleno = 10 (0xa), region = 129 }
 0x351   : > { %s7006_s28 = smov %s7003_s20 }
 0x352   :  { %3475 = vsyncpa [#allocation5], 1 }
 0x353   :  { %3477 = vsyncpa [#allocation5 + $0x1], 1 }
 0x354   :  { %3478 = vsyncpa [#allocation7], 1 }
 0x355   :  { %3480 = vsyncpa [#allocation7 + $0x1], 1 }
 0x356   :  { %3481 = vsyncpa [#allocation10], 1 }
 0x357   :  { %3483 = vsyncpa [#allocation10 + $0x1], 1 }
 0x358   :  { %3484 = vsyncpa [#allocation13], 1 }

</bundles_post_ra>
